<compile_context>
chip_gen: v7x
topology: tpu7x:2x2x1
jax: 0.10.0
libtpu: 0.0.40
codegen_flags: <defaults>
</compile_context>

<pallas_src>
import functools

import jax
import jax.numpy as jnp
from jax.experimental import pallas as pl
from jax.experimental.pallas import tpu as pltpu

LANE = 128                            # feature dims padded to multiples of this
EPS = 1e-5                            # BatchNorm1d eps
_VMEM_LIMIT = 48 * 1024 * 1024        # safe on v7x (64 MiB) and v5e/v6e (128 MiB)
_ADJ_BLOCK_BUDGET = 24 * 1024 * 1024  # budget for the double-buffered Â row block


# ----------------------------- small helpers -------------------------------

def _round_up(n, m):
    return (n + m - 1) // m * m


def _pad2(a, rows, cols, dtype=None):
    out = jnp.pad(a, ((0, rows - a.shape[0]), (0, cols - a.shape[1])))
    return out.astype(dtype) if dtype is not None else out


def gcn_norm_dense(edge_index, edge_weight, n):
    # Dense equivalent of PyG gcn_norm (adds self loops with weight 1).
    # TODO(synk): graphs that already contain self loops get them double counted
    # here (slightly different from PyG's add_self_loops behaviour).
    a = jnp.zeros((n, n), jnp.float32).at[edge_index[0], edge_index[1]].add(edge_weight)
    a = a + jnp.eye(n, dtype=jnp.float32)
    deg = jnp.sum(a, axis=1)
    d = jax.lax.rsqrt(jnp.maximum(deg, 1e-12))
    return a * d[:, None] * d[None, :]


# ----------------------------- Pallas kernels ------------------------------

def _xw_matmul(x, w, *, tm, out_dtype=jnp.bfloat16):
    """Row-tiled X @ W; W (tiny, lane-padded) stays fully VMEM resident."""
    np_, kp = x.shape
    _, cp = w.shape

    def kernel(x_ref, w_ref, o_ref):
        o_ref[...] = jnp.dot(x_ref[...], w_ref[...],
                             preferred_element_type=jnp.float32).astype(o_ref.dtype)

    return pl.pallas_call(
        kernel,
        out_shape=jax.ShapeDtypeStruct((np_, cp), out_dtype),
        grid=(np_ // tm,),
        in_specs=[pl.BlockSpec((tm, kp), lambda i: (i, 0)),
                  pl.BlockSpec((kp, cp), lambda i: (0, 0))],
        out_specs=pl.BlockSpec((tm, cp), lambda i: (i, 0)),
        compiler_params=pltpu.CompilerParams(dimension_semantics=("parallel",)),
    )(x, w)


def _conv1_fused(a, xw1, b1, w2, mask, *, tm):
    """conv1: XW2 = dropout(relu(Â @ XW1 + b1)) @ W2, one full-K dot per row tile.

    Â is streamed once; XW1 and W2 are VMEM-resident; h1 never goes to HBM.
    `mask` is a (N_pad, dhid_pad) bf16 array of {0, 1/(1-p)} values, or None.
    """
    np_r, npk = a.shape
    dh = xw1.shape[1]
    do = w2.shape[1]
    has_mask = mask is not None

    def kernel(*refs):
        if has_mask:
            a_ref, xw_ref, b_ref, m_ref, w2_ref, o_ref = refs
        else:
            a_ref, xw_ref, b_ref, w2_ref, o_ref = refs
        acc = jnp.dot(a_ref[...], xw_ref[...], preferred_element_type=jnp.float32)
        h = jnp.maximum(acc + b_ref[...], 0.0)
        if has_mask:
            h = h * m_ref[...]
        o_ref[...] = jnp.dot(h.astype(jnp.bfloat16), w2_ref[...],
                             preferred_element_type=jnp.float32).astype(o_ref.dtype)

    in_specs = [pl.BlockSpec((tm, npk), lambda i: (i, 0)),      # Â row block (streamed once)
                pl.BlockSpec((npk, dh), lambda i: (0, 0)),      # XW1: VMEM resident
                pl.BlockSpec((1, dh), lambda i: (0, 0))]
    operands = [a, xw1, b1]
    if has_mask:
        in_specs.append(pl.BlockSpec((tm, dh), lambda i: (i, 0)))
        operands.append(mask)
    in_specs.append(pl.BlockSpec((dh, do), lambda i: (0, 0)))   # W2: VMEM resident
    operands.append(w2)

    cost = pl.CostEstimate(
        flops=2 * np_r * npk * dh + 2 * np_r * dh * do, transcendentals=0,
        bytes_accessed=np_r * npk * 2 + npk * dh * 2 + np_r * (dh + do) * 2)
    return pl.pallas_call(
        kernel,
        out_shape=jax.ShapeDtypeStruct((np_r, do), jnp.bfloat16),
        grid=(np_r // tm,),
        in_specs=in_specs,
        out_specs=pl.BlockSpec((tm, do), lambda i: (i, 0)),
        compiler_params=pltpu.CompilerParams(
            dimension_semantics=("parallel",), vmem_limit_bytes=_VMEM_LIMIT),
        cost_estimate=cost,
    )(*operands)


def _conv2_bn_stats(a, xw2, b2, *, tm, n_valid):
    """conv2: Â @ XW2 + b2 (bf16), plus per-row-tile BN partial sum / sum-of-squares.

    Each row tile writes its own stats row -> no cross-tile accumulation, so the
    grid is safely megacore-parallel.  The tiny reduction happens in JAX glue.
    """
    np_r, npk = a.shape
    do = xw2.shape[1]
    nrt = np_r // tm

    def kernel(a_ref, xw_ref, b_ref, o_ref, s_ref, q_ref):
        i = pl.program_id(0)
        h = jnp.dot(a_ref[...], xw_ref[...],
                    preferred_element_type=jnp.float32) + b_ref[...]
        o_ref[...] = h.astype(o_ref.dtype)
        # exclude padded rows from the batch statistics
        row = i * tm + jax.lax.broadcasted_iota(jnp.int32, h.shape, 0)
        hv = jnp.where(row < n_valid, h, 0.0)
        s_ref[...] = jnp.sum(hv, axis=0, keepdims=True)[None]
        q_ref[...] = jnp.sum(hv * hv, axis=0, keepdims=True)[None]

    cost = pl.CostEstimate(
        flops=2 * np_r * npk * do, transcendentals=0,
        bytes_accessed=np_r * npk * 2 + npk * do * 2 + np_r * do * 2)
    return pl.pallas_call(
        kernel,
        out_shape=(jax.ShapeDtypeStruct((np_r, do), jnp.bfloat16),
                   jax.ShapeDtypeStruct((nrt, 1, do), jnp.float32),
                   jax.ShapeDtypeStruct((nrt, 1, do), jnp.float32)),
        grid=(nrt,),
        in_specs=[pl.BlockSpec((tm, npk), lambda i: (i, 0)),    # Â row block
                  pl.BlockSpec((npk, do), lambda i: (0, 0)),    # XW2: VMEM resident
                  pl.BlockSpec((1, do), lambda i: (0, 0))],
        out_specs=(pl.BlockSpec((tm, do), lambda i: (i, 0)),
                   pl.BlockSpec((1, 1, do), lambda i: (i, 0, 0)),
                   pl.BlockSpec((1, 1, do), lambda i: (i, 0, 0))),
        compiler_params=pltpu.CompilerParams(
            dimension_semantics=("parallel",), vmem_limit_bytes=_VMEM_LIMIT),
        cost_estimate=cost,
    )(a, xw2, b2)


def _fused_head(h2, e, d, h_sc, h_sh, e_sc, e_sh, d_sc, d_sh,
                w3h, w3e, w3d, b3, *, tm):
    """BN scale/shift + ReLU for all three branches; concat folded into fc_2."""
    np_, cp = h2.shape
    cout = w3h.shape[1]

    def kernel(h_ref, e_ref, d_ref, hsc, hsh, esc, esh, dsc, dsh,
               wh_ref, we_ref, wd_ref, b3_ref, o_ref):
        hb = jnp.maximum(h_ref[...] * hsc[...] + hsh[...], 0.0).astype(jnp.bfloat16)
        eb = jnp.maximum(e_ref[...] * esc[...] + esh[...], 0.0).astype(jnp.bfloat16)
        db = jnp.maximum(d_ref[...] * dsc[...] + dsh[...], 0.0).astype(jnp.bfloat16)
        acc = jnp.dot(hb, wh_ref[...], preferred_element_type=jnp.float32)
        acc += jnp.dot(eb, we_ref[...], preferred_element_type=jnp.float32)
        acc += jnp.dot(db, wd_ref[...], preferred_element_type=jnp.float32)
        o_ref[...] = acc + b3_ref[...]

    vec = lambda: pl.BlockSpec((1, cp), lambda i: (0, 0))
    return pl.pallas_call(
        kernel,
        out_shape=jax.ShapeDtypeStruct((np_, cout), jnp.float32),
        grid=(np_ // tm,),
        in_specs=[pl.BlockSpec((tm, cp), lambda i: (i, 0)),
                  pl.BlockSpec((tm, 1), lambda i: (i, 0)),
                  pl.BlockSpec((tm, cp), lambda i: (i, 0)),
                  vec(), vec(), vec(), vec(), vec(), vec(),
                  pl.BlockSpec((cp, cout), lambda i: (0, 0)),
                  pl.BlockSpec((cp, cout), lambda i: (0, 0)),
                  pl.BlockSpec((cp, cout), lambda i: (0, 0)),
                  pl.BlockSpec((1, cout), lambda i: (0, 0))],
        out_specs=pl.BlockSpec((tm, cout), lambda i: (i, 0)),
        compiler_params=pltpu.CompilerParams(dimension_semantics=("parallel",)),
    )(h2, e, d, h_sc, h_sh, e_sc, e_sh, d_sc, d_sh, w3h, w3e, w3d, b3)


# ------------------------------- forward -----------------------------------

def gcn_forward(params, x, edge_index, edge_weight, edges, degree,
                *, drop_p=0.2, dropout_seed=0, tm=512):
    n, din = x.shape
    dhid = params["w1"].shape[1]
    dout = params["w2"].shape[1]
    f32, bf16 = jnp.float32, jnp.bfloat16

    dinp = _round_up(din, LANE)
    dhidp = _round_up(dhid, LANE)
    doutp = _round_up(dout, LANE)

    # Row tile: as large as requested, capped so the double-buffered (tm, N_pad)
    # bf16 Â row block stays within budget (keeps v7x's 64 MiB VMEM safe) and
    # never exceeds the lane-padded node count.  Single tm-multiple padding.
    npc = _round_up(n, LANE)
    cap = max(LANE, (_ADJ_BLOCK_BUDGET // (4 * npc)) // LANE * LANE)
    tm = max(LANE, min(tm, npc, cap))
    np_ = _round_up(n, tm)

    # glue: dense normalized adjacency, lane/row padding, bf16 MXU operands
    a_p = _pad2(gcn_norm_dense(edge_index, edge_weight, n), np_, np_, bf16)
    x_p = _pad2(x, np_, dinp, bf16)
    w1_p = _pad2(params["w1"], dinp, dhidp, bf16)
    w2_p = _pad2(params["w2"], dhidp, doutp, bf16)
    b1_p = _pad2(params["b1"], 1, dhidp)
    b2_p = _pad2(params["b2"], 1, doutp)

    # conv1: XW1 once, then fused Â@(XW1) + bias + ReLU + dropout + (@W2)
    xw1 = _xw_matmul(x_p, w1_p, tm=tm)
    if drop_p > 0.0:
        # TODO(synk): torch F.dropout draws a fresh mask per call; here the mask is
        # a deterministic function of dropout_seed, generated host-side (avoids the
        # in-kernel TPU PRNG so the kernel also runs under the interpret fallback).
        keep = jax.random.bernoulli(jax.random.PRNGKey(dropout_seed),
                                    1.0 - drop_p, (np_, dhidp))
        mask = (keep.astype(f32) * (1.0 / (1.0 - drop_p))).astype(bf16)
    else:
        mask = None
    xw2 = _conv1_fused(a_p, xw1, b1_p, w2_p, mask, tm=tm)

    # conv2: Â@(XW2) + bias with fused per-row-tile BN partial sums
    h2, psum, psq = _conv2_bn_stats(a_p, xw2, b2_p, tm=tm, n_valid=n)
    h_sum = jnp.sum(psum, axis=0)     # (1, doutp)
    h_sq = jnp.sum(psq, axis=0)

    # BN scale/shift finalization (tiny (1, C) math; biased batch variance).
    # TODO(synk): BatchNorm running_mean/var are not tracked (training-mode stats only).
    bn_g = _pad2(params["bn_g"], 1, doutp)
    bn_b = _pad2(params["bn_b"], 1, doutp)
    mean_h = h_sum / n
    var_h = h_sq / n - mean_h * mean_h
    h_sc = bn_g * jax.lax.rsqrt(var_h + EPS)
    h_sh = bn_b - mean_h * h_sc

    # edge branch: fc_0 is an outer product -> BN folds analytically (b0 cancels)
    e = edges.astype(f32)
    m_e = jnp.mean(e)
    v_e = jnp.mean((e - m_e) ** 2)
    w0 = _pad2(params["w0"], 1, doutp)
    be_g = _pad2(params["be_g"], 1, doutp)
    be_b = _pad2(params["be_b"], 1, doutp)
    e_sc = w0 * be_g * jax.lax.rsqrt(v_e * w0 * w0 + EPS)
    e_sh = be_b - m_e * e_sc
    e_p = _pad2(e, np_, 1)

    # degree branch: embedding gather + per-column batch stats (tiny glue)
    d = jnp.take(params["emb"], degree, axis=0)
    m_d = jnp.mean(d, axis=0, keepdims=True)
    v_d = jnp.mean((d - m_d) ** 2, axis=0, keepdims=True)
    bd_g = _pad2(params["bd_g"], 1, doutp)
    bd_b = _pad2(params["bd_b"], 1, doutp)
    d_sc = bd_g * jax.lax.rsqrt(_pad2(v_d, 1, doutp) + EPS)
    d_sh = bd_b - _pad2(m_d, 1, doutp) * d_sc
    d_p = _pad2(d, np_, doutp, bf16)

    # fused head: BN+ReLU for all branches, concat folded into fc_2 partial matmuls
    w3 = params["w3"]
    w3h = _pad2(w3[:dout], doutp, doutp, bf16)
    w3e = _pad2(w3[dout:2 * dout], doutp, doutp, bf16)
    w3d = _pad2(w3[2 * dout:], doutp, doutp, bf16)
    b3_p = _pad2(params["b3"], 1, doutp)
    out = _fused_head(h2, e_p, d_p, h_sc, h_sh, e_sc, e_sh, d_sc, d_sh,
                      w3h, w3e, w3d, b3_p, tm=tm)
    return out[:n, :dout]


# ------------------------- pure-JAX reference ------------------------------

def gcn_reference(params, x, edge_index, edge_weight, edges, degree):
    """No-dropout reference mirroring the kernel's bf16 operand/storage casts."""
    f32, bf16 = jnp.float32, jnp.bfloat16
    a = gcn_norm_dense(edge_index, edge_weight, x.shape[0]).astype(bf16)
    mm = lambda p, q: jnp.dot(p, q, preferred_element_type=f32)

    xw1 = mm(x.astype(bf16), params["w1"].astype(bf16)).astype(bf16)
    h1 = jnp.maximum(mm(a, xw1) + params["b1"], 0.0)
    xw2 = mm(h1.astype(bf16), params["w2"].astype(bf16)).astype(bf16)
    h2 = (mm(a, xw2) + params["b2"]).astype(bf16).astype(f32)   # kernel stores h2 bf16

    def bn_relu(v, g, b):
        m = jnp.mean(v, axis=0, keepdims=True)
        var = jnp.mean((v - m) ** 2, axis=0, keepdims=True)
        return jnp.maximum((v - m) * jax.lax.rsqrt(var + EPS) * g + b, 0.0)

    hb = bn_relu(h2, params["bn_g"], params["bn_b"])
    eb = bn_relu(edges * params["w0"] + params["b0"], params["be_g"], params["be_b"])
    d = jnp.take(params["emb"], degree, axis=0).astype(bf16).astype(f32)
    db = bn_relu(d, params["bd_g"], params["bd_b"])
    cat = jnp.concatenate([hb, eb, db], axis=1).astype(bf16)
    return mm(cat, params["w3"].astype(bf16)) + params["b3"]


# ----------------------------- params / main -------------------------------

def init_gcn_params(key, dim_in, dim_hidden, dim_out):
    ks = jax.random.split(key, 9)

    def glorot(k, shape):
        limit = jnp.sqrt(6.0 / (shape[0] + shape[1]))
        return jax.random.uniform(k, shape, jnp.float32, -limit, limit)

    nb = lambda k, c: 0.1 * jax.random.normal(k, (1, c), jnp.float32)
    zc = lambda c: jnp.zeros((1, c), jnp.float32)
    oc = lambda c: jnp.ones((1, c), jnp.float32)
    return {
        "w1": glorot(ks[0], (dim_in, dim_hidden)), "b1": nb(ks[1], dim_hidden),
        "w2": glorot(ks[2], (dim_hidden, dim_out)), "b2": nb(ks[3], dim_out),
        "w0": glorot(ks[4], (1, dim_out)), "b0": nb(ks[5], dim_out),           # fc_0
        "emb": 0.1 * jax.random.normal(ks[6], (2000, dim_out), jnp.float32),   # fc_1
        "w3": glorot(ks[7], (3 * dim_out, dim_out)), "b3": nb(ks[8], dim_out), # fc_2
        "bn_g": oc(dim_out), "bn_b": zc(dim_out),
        "be_g": oc(dim_out), "be_b": zc(dim_out),
        "bd_g": oc(dim_out), "bd_b": zc(dim_out),
    }


if __name__ == "__main__":
    N, DIN, DHID, DOUT = 256, 16, 32, 16

    key = jax.random.PRNGKey(0)
    kp, kx, ke, kd = jax.random.split(key, 4)

    params = init_gcn_params(kp, DIN, DHID, DOUT)
    x = jax.random.normal(kx, (N, DIN), jnp.float32)

    # symmetric ring graph with unit edge weights (no pre-existing self loops)
    src = jnp.arange(N, dtype=jnp.int32)
    dst = (src + 1) % N
    edge_index = jnp.stack([jnp.concatenate([src, dst]), jnp.concatenate([dst, src])])
    edge_weight = jnp.ones((edge_index.shape[1],), jnp.float32)

    edges = jax.random.normal(ke, (N, 1), jnp.float32)               # fc_0 input
    degree = jax.random.randint(kd, (N,), 0, 2000, dtype=jnp.int32)  # Embedding indices

    # correctness check against the pure-JAX reference (dropout disabled)
    fwd_nodrop = jax.jit(functools.partial(gcn_forward, drop_p=0.0))
    out_nodrop = fwd_nodrop(params, x, edge_index, edge_weight, edges, degree)
    ref = gcn_reference(params, x, edge_index, edge_weight, edges, degree)
    jax.block_until_ready((out_nodrop, ref))
    assert out_nodrop.shape == (N, DOUT)
    assert bool(jnp.allclose(out_nodrop, ref, atol=3e-2, rtol=3e-2)), \
        float(jnp.max(jnp.abs(out_nodrop - ref)))

    # full forward with dropout (mask generated host-side from the seed)
    fwd = jax.jit(functools.partial(gcn_forward, drop_p=0.2, dropout_seed=42))
    out = fwd(params, x, edge_index, edge_weight, edges, degree)
    jax.block_until_ready(out)
    assert out.shape == (N, DOUT)
    assert bool(jnp.all(jnp.isfinite(out)))
    print("KERNEL_OK")
</pallas_src>

<mosaic_0001>
module attributes {stable_mosaic.version = 11 : i64} {
  func.func private @main(%arg0: i32) attributes {dimension_semantics = [#tpu.dimension_semantics<core_parallel>], iteration_bounds = array<i64: 2>, tpu.core_type = #tpu.core_type<sc_scalar_subcore>, window_params = []} {
    return
  }
}

module attributes {stable_mosaic.version = 11 : i64} {
  func.func private @main(%arg0: i32) attributes {dimension_semantics = [#tpu.dimension_semantics<core_parallel>], iteration_bounds = array<i64: 2>, tpu.core_type = #tpu.core_type<sc_scalar_subcore>, window_params = []} {
    return
  }
}

module attributes {stable_mosaic.version = 11 : i64} {
  func.func @kernel(%arg0: i32, %arg1: memref<256x128xbf16, #tpu.memory_space<vmem>>, %arg2: memref<128x128xbf16, #tpu.memory_space<vmem>>, %arg3: memref<256x128xbf16, #tpu.memory_space<vmem>>) attributes {dimension_semantics = [#tpu.dimension_semantics<parallel>], iteration_bounds = array<i64: 1>, scalar_prefetch = 0 : i64, scratch_operands = 0 : i64, tpu.core_type = #tpu.core_type<tc>, window_params = [{transform_indices = @transform_0, window_bounds = array<i64: 256, 128>}, {pipeline_mode = #tpu.pipeline_mode<synchronous>, transform_indices = @transform_1, window_bounds = array<i64: 128, 128>}, {transform_indices = @transform_2, window_bounds = array<i64: 256, 128>}]} {
    %c0 = arith.constant 0 : index
    %c0_0 = arith.constant 0 : index
    %0 = vector.load %arg1[%c0, %c0_0] : memref<256x128xbf16, #tpu.memory_space<vmem>>, vector<256x128xbf16>
    %c0_1 = arith.constant 0 : index
    %c0_2 = arith.constant 0 : index
    %1 = vector.load %arg2[%c0_1, %c0_2] : memref<128x128xbf16, #tpu.memory_space<vmem>>, vector<128x128xbf16>
    %cst = arith.constant dense<0.000000e+00> : vector<256x128xf32>
    %2 = tpu.matmul %0, %1, %cst {dimension_numbers = #tpu.dot_dimension_numbers<[1], [0], [0], [1], [0, 0, 1, 1], [], []>} : vector<256x128xbf16>, vector<128x128xbf16>, vector<256x128xf32> -> vector<256x128xf32>
    %3 = arith.truncf %2 : vector<256x128xf32> to vector<256x128xbf16>
    %c0_3 = arith.constant 0 : index
    %c0_4 = arith.constant 0 : index
    %4 = vector.load %arg3[%c0_3, %c0_4] : memref<256x128xbf16, #tpu.memory_space<vmem>>, vector<256x128xbf16>
    tpu.vector_store %arg3[%c0_3, %c0_4], %3 {strides = array<i32>} : memref<256x128xbf16, #tpu.memory_space<vmem>>, vector<256x128xbf16>,
    return
  }
  func.func @transform_0(%arg0: i32) -> (i32, i32) {
    %c0_i32 = arith.constant 0 : i32
    %c0_i32_0 = arith.constant 0 : i32
    return %arg0, %c0_i32 : i32, i32
  }
  func.func @transform_1(%arg0: i32) -> (i32, i32) {
    %c0_i32 = arith.constant 0 : i32
    %c0_i32_0 = arith.constant 0 : i32
    %c0_i32_1 = arith.constant 0 : i32
    return %c0_i32, %c0_i32_0 : i32, i32
  }
  func.func @transform_2(%arg0: i32) -> (i32, i32) {
    %c0_i32 = arith.constant 0 : i32
    %c0_i32_0 = arith.constant 0 : i32
    return %arg0, %c0_i32 : i32, i32
  }
}

module attributes {stable_mosaic.version = 11 : i64} {
  func.func @kernel(%arg0: i32, %arg1: memref<256x256xbf16, #tpu.memory_space<vmem>>, %arg2: memref<256x128xbf16, #tpu.memory_space<vmem>>, %arg3: memref<1x128xf32, #tpu.memory_space<vmem>>, %arg4: memref<128x128xbf16, #tpu.memory_space<vmem>>, %arg5: memref<256x128xbf16, #tpu.memory_space<vmem>>) attributes {dimension_semantics = [#tpu.dimension_semantics<parallel>], iteration_bounds = array<i64: 1>, scalar_prefetch = 0 : i64, scratch_operands = 0 : i64, tpu.core_type = #tpu.core_type<tc>, window_params = [{transform_indices = @transform_0, window_bounds = array<i64: 256, 256>}, {pipeline_mode = #tpu.pipeline_mode<synchronous>, transform_indices = @transform_1, window_bounds = array<i64: 256, 128>}, {pipeline_mode = #tpu.pipeline_mode<synchronous>, transform_indices = @transform_2, window_bounds = array<i64: 1, 128>}, {pipeline_mode = #tpu.pipeline_mode<synchronous>, transform_indices = @transform_3, window_bounds = array<i64: 128, 128>}, {transform_indices = @transform_4, window_bounds = array<i64: 256, 128>}]} {
    %c0 = arith.constant 0 : index
    %c0_0 = arith.constant 0 : index
    %0 = vector.load %arg1[%c0, %c0_0] : memref<256x256xbf16, #tpu.memory_space<vmem>>, vector<256x256xbf16>
    %c0_1 = arith.constant 0 : index
    %c0_2 = arith.constant 0 : index
    %1 = vector.load %arg2[%c0_1, %c0_2] : memref<256x128xbf16, #tpu.memory_space<vmem>>, vector<256x128xbf16>
    %cst = arith.constant dense<0.000000e+00> : vector<256x128xf32>
    %2 = tpu.matmul %0, %1, %cst {dimension_numbers = #tpu.dot_dimension_numbers<[1], [0], [0], [1], [0, 0, 1, 1], [], []>} : vector<256x256xbf16>, vector<256x128xbf16>, vector<256x128xf32> -> vector<256x128xf32>
    %c0_3 = arith.constant 0 : index
    %c0_4 = arith.constant 0 : index
    %3 = vector.load %arg3[%c0_3, %c0_4] : memref<1x128xf32, #tpu.memory_space<vmem>>, vector<1x128xf32>
    %4 = vector.broadcast %3 : vector<1x128xf32> to vector<256x128xf32>
    %5 = arith.addf %2, %4 : vector<256x128xf32>
    %cst_5 = arith.constant 0.000000e+00 : f32
    %6 = vector.broadcast %cst_5 : f32 to vector<256x128xf32>
    %7 = arith.maximumf %5, %6 : vector<256x128xf32>
    %8 = arith.truncf %7 : vector<256x128xf32> to vector<256x128xbf16>
    %c0_6 = arith.constant 0 : index
    %c0_7 = arith.constant 0 : index
    %9 = vector.load %arg4[%c0_6, %c0_7] : memref<128x128xbf16, #tpu.memory_space<vmem>>, vector<128x128xbf16>
    %cst_8 = arith.constant dense<0.000000e+00> : vector<256x128xf32>
    %10 = tpu.matmul %8, %9, %cst_8 {dimension_numbers = #tpu.dot_dimension_numbers<[1], [0], [0], [1], [0, 0, 1, 1], [], []>} : vector<256x128xbf16>, vector<128x128xbf16>, vector<256x128xf32> -> vector<256x128xf32>
    %11 = arith.truncf %10 : vector<256x128xf32> to vector<256x128xbf16>
    %c0_9 = arith.constant 0 : index
    %c0_10 = arith.constant 0 : index
    %12 = vector.load %arg5[%c0_9, %c0_10] : memref<256x128xbf16, #tpu.memory_space<vmem>>, vector<256x128xbf16>
    tpu.vector_store %arg5[%c0_9, %c0_10], %11 {strides = array<i32>} : memref<256x128xbf16, #tpu.memory_space<vmem>>, vector<256x128xbf16>,
    return
  }
  func.func @transform_0(%arg0: i32) -> (i32, i32) {
    %c0_i32 = arith.constant 0 : i32
    %c0_i32_0 = arith.constant 0 : i32
    return %arg0, %c0_i32 : i32, i32
  }
  func.func @transform_1(%arg0: i32) -> (i32, i32) {
    %c0_i32 = arith.constant 0 : i32
    %c0_i32_0 = arith.constant 0 : i32
    %c0_i32_1 = arith.constant 0 : i32
    return %c0_i32, %c0_i32_0 : i32, i32
  }
  func.func @transform_2(%arg0: i32) -> (i32, i32) {
    %c0_i32 = arith.constant 0 : i32
    %c0_i32_0 = arith.constant 0 : i32
    %c0_i32_1 = arith.constant 0 : i32
    return %c0_i32, %c0_i32_0 : i32, i32
  }
  func.func @transform_3(%arg0: i32) -> (i32, i32) {
    %c0_i32 = arith.constant 0 : i32
    %c0_i32_0 = arith.constant 0 : i32
    %c0_i32_1 = arith.constant 0 : i32
    return %c0_i32, %c0_i32_0 : i32, i32
  }
  func.func @transform_4(%arg0: i32) -> (i32, i32) {
    %c0_i32 = arith.constant 0 : i32
    %c0_i32_0 = arith.constant 0 : i32
    return %arg0, %c0_i32 : i32, i32
  }
}

module attributes {stable_mosaic.version = 11 : i64} {
  func.func @kernel(%arg0: i32, %arg1: memref<256x256xbf16, #tpu.memory_space<vmem>>, %arg2: memref<256x128xbf16, #tpu.memory_space<vmem>>, %arg3: memref<1x128xf32, #tpu.memory_space<vmem>>, %arg4: memref<256x128xbf16, #tpu.memory_space<vmem>>, %arg5: memref<1x1x128xf32, #tpu.memory_space<vmem>>, %arg6: memref<1x1x128xf32, #tpu.memory_space<vmem>>) attributes {dimension_semantics = [#tpu.dimension_semantics<parallel>], iteration_bounds = array<i64: 1>, scalar_prefetch = 0 : i64, scratch_operands = 0 : i64, tpu.core_type = #tpu.core_type<tc>, window_params = [{transform_indices = @transform_0, window_bounds = array<i64: 256, 256>}, {pipeline_mode = #tpu.pipeline_mode<synchronous>, transform_indices = @transform_1, window_bounds = array<i64: 256, 128>}, {pipeline_mode = #tpu.pipeline_mode<synchronous>, transform_indices = @transform_2, window_bounds = array<i64: 1, 128>}, {transform_indices = @transform_3, window_bounds = array<i64: 256, 128>}, {transform_indices = @transform_4, window_bounds = array<i64: 1, 1, 128>}, {transform_indices = @transform_5, window_bounds = array<i64: 1, 1, 128>}]} {
    %c0 = arith.constant 0 : index
    %c0_0 = arith.constant 0 : index
    %0 = vector.load %arg1[%c0, %c0_0] : memref<256x256xbf16, #tpu.memory_space<vmem>>, vector<256x256xbf16>
    %c0_1 = arith.constant 0 : index
    %c0_2 = arith.constant 0 : index
    %1 = vector.load %arg2[%c0_1, %c0_2] : memref<256x128xbf16, #tpu.memory_space<vmem>>, vector<256x128xbf16>
    %cst = arith.constant dense<0.000000e+00> : vector<256x128xf32>
    %2 = tpu.matmul %0, %1, %cst {dimension_numbers = #tpu.dot_dimension_numbers<[1], [0], [0], [1], [0, 0, 1, 1], [], []>} : vector<256x256xbf16>, vector<256x128xbf16>, vector<256x128xf32> -> vector<256x128xf32>
    %c0_3 = arith.constant 0 : index
    %c0_4 = arith.constant 0 : index
    %3 = vector.load %arg3[%c0_3, %c0_4] : memref<1x128xf32, #tpu.memory_space<vmem>>, vector<1x128xf32>
    %4 = vector.broadcast %3 : vector<1x128xf32> to vector<256x128xf32>
    %5 = arith.addf %2, %4 : vector<256x128xf32>
    %6 = arith.truncf %5 : vector<256x128xf32> to vector<256x128xbf16>
    %c0_5 = arith.constant 0 : index
    %c0_6 = arith.constant 0 : index
    %7 = vector.load %arg4[%c0_5, %c0_6] : memref<256x128xbf16, #tpu.memory_space<vmem>>, vector<256x128xbf16>
    tpu.vector_store %arg4[%c0_5, %c0_6], %6 {strides = array<i32>} : memref<256x128xbf16, #tpu.memory_space<vmem>>, vector<256x128xbf16>,
    %c256_i32 = arith.constant 256 : i32
    %8 = arith.muli %arg0, %c256_i32 : i32
    %9 = tpu.iota {dimensions = array<i32: 0>} : vector<256x128xi32>
    %10 = vector.broadcast %8 : i32 to vector<256x128xi32>
    %11 = arith.addi %10, %9 : vector<256x128xi32>
    %c256_i32_7 = arith.constant 256 : i32
    %12 = vector.broadcast %c256_i32_7 : i32 to vector<256x128xi32>
    %13 = arith.cmpi slt, %11, %12 : vector<256x128xi32>
    %cst_8 = arith.constant 0.000000e+00 : f32
    %14 = vector.broadcast %cst_8 : f32 to vector<256x128xf32>
    %15 = arith.select %13, %5, %14 : vector<256x128xi1>, vector<256x128xf32>
    %cst_9 = arith.constant dense<0.000000e+00> : vector<128xf32>
    %16 = vector.multi_reduction <add>, %15, %cst_9 [0] : vector<256x128xf32> to vector<128xf32>
    %17 = vector.shape_cast %16 : vector<128xf32> to vector<1x128xf32>
    %18 = vector.shape_cast %17 : vector<1x128xf32> to vector<1x1x128xf32>
    %c0_10 = arith.constant 0 : index
    %c0_11 = arith.constant 0 : index
    %c0_12 = arith.constant 0 : index
    %19 = vector.load %arg5[%c0_10, %c0_11, %c0_12] : memref<1x1x128xf32, #tpu.memory_space<vmem>>, vector<1x1x128xf32>
    tpu.vector_store %arg5[%c0_10, %c0_11, %c0_12], %18 {strides = array<i32>} : memref<1x1x128xf32, #tpu.memory_space<vmem>>, vector<1x1x128xf32>,
    %20 = arith.mulf %15, %15 : vector<256x128xf32>
    %cst_13 = arith.constant dense<0.000000e+00> : vector<128xf32>
    %21 = vector.multi_reduction <add>, %20, %cst_13 [0] : vector<256x128xf32> to vector<128xf32>
    %22 = vector.shape_cast %21 : vector<128xf32> to vector<1x128xf32>
    %23 = vector.shape_cast %22 : vector<1x128xf32> to vector<1x1x128xf32>
    %c0_14 = arith.constant 0 : index
    %c0_15 = arith.constant 0 : index
    %c0_16 = arith.constant 0 : index
    %24 = vector.load %arg6[%c0_14, %c0_15, %c0_16] : memref<1x1x128xf32, #tpu.memory_space<vmem>>, vector<1x1x128xf32>
    tpu.vector_store %arg6[%c0_14, %c0_15, %c0_16], %23 {strides = array<i32>} : memref<1x1x128xf32, #tpu.memory_space<vmem>>, vector<1x1x128xf32>,
    return
  }
  func.func @transform_0(%arg0: i32) -> (i32, i32) {
    %c0_i32 = arith.constant 0 : i32
    %c0_i32_0 = arith.constant 0 : i32
    return %arg0, %c0_i32 : i32, i32
  }
  func.func @transform_1(%arg0: i32) -> (i32, i32) {
    %c0_i32 = arith.constant 0 : i32
    %c0_i32_0 = arith.constant 0 : i32
    %c0_i32_1 = arith.constant 0 : i32
    return %c0_i32, %c0_i32_0 : i32, i32
  }
  func.func @transform_2(%arg0: i32) -> (i32, i32) {
    %c0_i32 = arith.constant 0 : i32
    %c0_i32_0 = arith.constant 0 : i32
    %c0_i32_1 = arith.constant 0 : i32
    return %c0_i32, %c0_i32_0 : i32, i32
  }
  func.func @transform_3(%arg0: i32) -> (i32, i32) {
    %c0_i32 = arith.constant 0 : i32
    %c0_i32_0 = arith.constant 0 : i32
    return %arg0, %c0_i32 : i32, i32
  }
  func.func @transform_4(%arg0: i32) -> (i32, i32, i32) {
    %c0_i32 = arith.constant 0 : i32
    %c0_i32_0 = arith.constant 0 : i32
    %c0_i32_1 = arith.constant 0 : i32
    return %arg0, %c0_i32, %c0_i32_0 : i32, i32, i32
  }
  func.func @transform_5(%arg0: i32) -> (i32, i32, i32) {
    %c0_i32 = arith.constant 0 : i32
    %c0_i32_0 = arith.constant 0 : i32
    %c0_i32_1 = arith.constant 0 : i32
    return %arg0, %c0_i32, %c0_i32_0 : i32, i32, i32
  }
}

module attributes {stable_mosaic.version = 11 : i64} {
  func.func @kernel(%arg0: i32, %arg1: memref<256x128xbf16, #tpu.memory_space<vmem>>, %arg2: memref<256x1xf32, #tpu.memory_space<vmem>>, %arg3: memref<256x128xbf16, #tpu.memory_space<vmem>>, %arg4: memref<1x128xf32, #tpu.memory_space<vmem>>, %arg5: memref<1x128xf32, #tpu.memory_space<vmem>>, %arg6: memref<1x128xf32, #tpu.memory_space<vmem>>, %arg7: memref<1x128xf32, #tpu.memory_space<vmem>>, %arg8: memref<1x128xf32, #tpu.memory_space<vmem>>, %arg9: memref<1x128xf32, #tpu.memory_space<vmem>>, %arg10: memref<128x128xbf16, #tpu.memory_space<vmem>>, %arg11: memref<128x128xbf16, #tpu.memory_space<vmem>>, %arg12: memref<128x128xbf16, #tpu.memory_space<vmem>>, %arg13: memref<1x128xf32, #tpu.memory_space<vmem>>, %arg14: memref<256x128xf32, #tpu.memory_space<vmem>>) attributes {dimension_semantics = [#tpu.dimension_semantics<parallel>], iteration_bounds = array<i64: 1>, scalar_prefetch = 0 : i64, scratch_operands = 0 : i64, tpu.core_type = #tpu.core_type<tc>, window_params = [{transform_indices = @transform_0, window_bounds = array<i64: 256, 128>}, {transform_indices = @transform_1, window_bounds = array<i64: 256, 1>}, {transform_indices = @transform_2, window_bounds = array<i64: 256, 128>}, {pipeline_mode = #tpu.pipeline_mode<synchronous>, transform_indices = @transform_3, window_bounds = array<i64: 1, 128>}, {pipeline_mode = #tpu.pipeline_mode<synchronous>, transform_indices = @transform_4, window_bounds = array<i64: 1, 128>}, {pipeline_mode = #tpu.pipeline_mode<synchronous>, transform_indices = @transform_5, window_bounds = array<i64: 1, 128>}, {pipeline_mode = #tpu.pipeline_mode<synchronous>, transform_indices = @transform_6, window_bounds = array<i64: 1, 128>}, {pipeline_mode = #tpu.pipeline_mode<synchronous>, transform_indices = @transform_7, window_bounds = array<i64: 1, 128>}, {pipeline_mode = #tpu.pipeline_mode<synchronous>, transform_indices = @transform_8, window_bounds = array<i64: 1, 128>}, {pipeline_mode = #tpu.pipeline_mode<synchronous>, transform_indices = @transform_9, window_bounds = array<i64: 128, 128>}, {pipeline_mode = #tpu.pipeline_mode<synchronous>, transform_indices = @transform_10, window_bounds = array<i64: 128, 128>}, {pipeline_mode = #tpu.pipeline_mode<synchronous>, transform_indices = @transform_11, window_bounds = array<i64: 128, 128>}, {pipeline_mode = #tpu.pipeline_mode<synchronous>, transform_indices = @transform_12, window_bounds = array<i64: 1, 128>}, {transform_indices = @transform_13, window_bounds = array<i64: 256, 128>}]} {
    %c0 = arith.constant 0 : index
    %c0_0 = arith.constant 0 : index
    %0 = vector.load %arg1[%c0, %c0_0] : memref<256x128xbf16, #tpu.memory_space<vmem>>, vector<256x128xbf16>
    %c0_1 = arith.constant 0 : index
    %c0_2 = arith.constant 0 : index
    %1 = vector.load %arg4[%c0_1, %c0_2] : memref<1x128xf32, #tpu.memory_space<vmem>>, vector<1x128xf32>
    %2 = arith.extf %0 : vector<256x128xbf16> to vector<256x128xf32>
    %3 = vector.broadcast %1 : vector<1x128xf32> to vector<256x128xf32>
    %4 = arith.mulf %2, %3 : vector<256x128xf32>
    %c0_3 = arith.constant 0 : index
    %c0_4 = arith.constant 0 : index
    %5 = vector.load %arg5[%c0_3, %c0_4] : memref<1x128xf32, #tpu.memory_space<vmem>>, vector<1x128xf32>
    %6 = vector.broadcast %5 : vector<1x128xf32> to vector<256x128xf32>
    %7 = arith.addf %4, %6 : vector<256x128xf32>
    %cst = arith.constant 0.000000e+00 : f32
    %8 = vector.broadcast %cst : f32 to vector<256x128xf32>
    %9 = arith.maximumf %7, %8 : vector<256x128xf32>
    %10 = arith.truncf %9 : vector<256x128xf32> to vector<256x128xbf16>
    %c0_5 = arith.constant 0 : index
    %c0_6 = arith.constant 0 : index
    %11 = vector.load %arg2[%c0_5, %c0_6] : memref<256x1xf32, #tpu.memory_space<vmem>>, vector<256x1xf32>
    %c0_7 = arith.constant 0 : index
    %c0_8 = arith.constant 0 : index
    %12 = vector.load %arg6[%c0_7, %c0_8] : memref<1x128xf32, #tpu.memory_space<vmem>>, vector<1x128xf32>
    %13 = vector.broadcast %11 : vector<256x1xf32> to vector<256x128xf32>
    %14 = vector.broadcast %12 : vector<1x128xf32> to vector<256x128xf32>
    %15 = arith.mulf %13, %14 : vector<256x128xf32>
    %c0_9 = arith.constant 0 : index
    %c0_10 = arith.constant 0 : index
    %16 = vector.load %arg7[%c0_9, %c0_10] : memref<1x128xf32, #tpu.memory_space<vmem>>, vector<1x128xf32>
    %17 = vector.broadcast %16 : vector<1x128xf32> to vector<256x128xf32>
    %18 = arith.addf %15, %17 : vector<256x128xf32>
    %cst_11 = arith.constant 0.000000e+00 : f32
    %19 = vector.broadcast %cst_11 : f32 to vector<256x128xf32>
    %20 = arith.maximumf %18, %19 : vector<256x128xf32>
    %21 = arith.truncf %20 : vector<256x128xf32> to vector<256x128xbf16>
    %c0_12 = arith.constant 0 : index
    %c0_13 = arith.constant 0 : index
    %22 = vector.load %arg3[%c0_12, %c0_13] : memref<256x128xbf16, #tpu.memory_space<vmem>>, vector<256x128xbf16>
    %c0_14 = arith.constant 0 : index
    %c0_15 = arith.constant 0 : index
    %23 = vector.load %arg8[%c0_14, %c0_15] : memref<1x128xf32, #tpu.memory_space<vmem>>, vector<1x128xf32>
    %24 = arith.extf %22 : vector<256x128xbf16> to vector<256x128xf32>
    %25 = vector.broadcast %23 : vector<1x128xf32> to vector<256x128xf32>
    %26 = arith.mulf %24, %25 : vector<256x128xf32>
    %c0_16 = arith.constant 0 : index
    %c0_17 = arith.constant 0 : index
    %27 = vector.load %arg9[%c0_16, %c0_17] : memref<1x128xf32, #tpu.memory_space<vmem>>, vector<1x128xf32>
    %28 = vector.broadcast %27 : vector<1x128xf32> to vector<256x128xf32>
    %29 = arith.addf %26, %28 : vector<256x128xf32>
    %cst_18 = arith.constant 0.000000e+00 : f32
    %30 = vector.broadcast %cst_18 : f32 to vector<256x128xf32>
    %31 = arith.maximumf %29, %30 : vector<256x128xf32>
    %32 = arith.truncf %31 : vector<256x128xf32> to vector<256x128xbf16>
    %c0_19 = arith.constant 0 : index
    %c0_20 = arith.constant 0 : index
    %33 = vector.load %arg10[%c0_19, %c0_20] : memref<128x128xbf16, #tpu.memory_space<vmem>>, vector<128x128xbf16>
    %cst_21 = arith.constant dense<0.000000e+00> : vector<256x128xf32>
    %34 = tpu.matmul %10, %33, %cst_21 {dimension_numbers = #tpu.dot_dimension_numbers<[1], [0], [0], [1], [0, 0, 1, 1], [], []>} : vector<256x128xbf16>, vector<128x128xbf16>, vector<256x128xf32> -> vector<256x128xf32>
    %c0_22 = arith.constant 0 : index
    %c0_23 = arith.constant 0 : index
    %35 = vector.load %arg11[%c0_22, %c0_23] : memref<128x128xbf16, #tpu.memory_space<vmem>>, vector<128x128xbf16>
    %cst_24 = arith.constant dense<0.000000e+00> : vector<256x128xf32>
    %36 = tpu.matmul %21, %35, %cst_24 {dimension_numbers = #tpu.dot_dimension_numbers<[1], [0], [0], [1], [0, 0, 1, 1], [], []>} : vector<256x128xbf16>, vector<128x128xbf16>, vector<256x128xf32> -> vector<256x128xf32>
    %37 = arith.addf %34, %36 : vector<256x128xf32>
    %c0_25 = arith.constant 0 : index
    %c0_26 = arith.constant 0 : index
    %38 = vector.load %arg12[%c0_25, %c0_26] : memref<128x128xbf16, #tpu.memory_space<vmem>>, vector<128x128xbf16>
    %cst_27 = arith.constant dense<0.000000e+00> : vector<256x128xf32>
    %39 = tpu.matmul %32, %38, %cst_27 {dimension_numbers = #tpu.dot_dimension_numbers<[1], [0], [0], [1], [0, 0, 1, 1], [], []>} : vector<256x128xbf16>, vector<128x128xbf16>, vector<256x128xf32> -> vector<256x128xf32>
    %40 = arith.addf %37, %39 : vector<256x128xf32>
    %c0_28 = arith.constant 0 : index
    %c0_29 = arith.constant 0 : index
    %41 = vector.load %arg13[%c0_28, %c0_29] : memref<1x128xf32, #tpu.memory_space<vmem>>, vector<1x128xf32>
    %42 = vector.broadcast %41 : vector<1x128xf32> to vector<256x128xf32>
    %43 = arith.addf %40, %42 : vector<256x128xf32>
    %c0_30 = arith.constant 0 : index
    %c0_31 = arith.constant 0 : index
    %44 = vector.load %arg14[%c0_30, %c0_31] : memref<256x128xf32, #tpu.memory_space<vmem>>, vector<256x128xf32>
    tpu.vector_store %arg14[%c0_30, %c0_31], %43 {strides = array<i32>} : memref<256x128xf32, #tpu.memory_space<vmem>>, vector<256x128xf32>,
    return
  }
  func.func @transform_0(%arg0: i32) -> (i32, i32) {
    %c0_i32 = arith.constant 0 : i32
    %c0_i32_0 = arith.constant 0 : i32
    return %arg0, %c0_i32 : i32, i32
  }
  func.func @transform_1(%arg0: i32) -> (i32, i32) {
    %c0_i32 = arith.constant 0 : i32
    %c0_i32_0 = arith.constant 0 : i32
    return %arg0, %c0_i32 : i32, i32
  }
  func.func @transform_2(%arg0: i32) -> (i32, i32) {
    %c0_i32 = arith.constant 0 : i32
    %c0_i32_0 = arith.constant 0 : i32
    return %arg0, %c0_i32 : i32, i32
  }
  func.func @transform_3(%arg0: i32) -> (i32, i32) {
    %c0_i32 = arith.constant 0 : i32
    %c0_i32_0 = arith.constant 0 : i32
    %c0_i32_1 = arith.constant 0 : i32
    return %c0_i32, %c0_i32_0 : i32, i32
  }
  func.func @transform_4(%arg0: i32) -> (i32, i32) {
    %c0_i32 = arith.constant 0 : i32
    %c0_i32_0 = arith.constant 0 : i32
    %c0_i32_1 = arith.constant 0 : i32
    return %c0_i32, %c0_i32_0 : i32, i32
  }
  func.func @transform_5(%arg0: i32) -> (i32, i32) {
    %c0_i32 = arith.constant 0 : i32
    %c0_i32_0 = arith.constant 0 : i32
    %c0_i32_1 = arith.constant 0 : i32
    return %c0_i32, %c0_i32_0 : i32, i32
  }
  func.func @transform_6(%arg0: i32) -> (i32, i32) {
    %c0_i32 = arith.constant 0 : i32
    %c0_i32_0 = arith.constant 0 : i32
    %c0_i32_1 = arith.constant 0 : i32
    return %c0_i32, %c0_i32_0 : i32, i32
  }
  func.func @transform_7(%arg0: i32) -> (i32, i32) {
    %c0_i32 = arith.constant 0 : i32
    %c0_i32_0 = arith.constant 0 : i32
    %c0_i32_1 = arith.constant 0 : i32
    return %c0_i32, %c0_i32_0 : i32, i32
  }
  func.func @transform_8(%arg0: i32) -> (i32, i32) {
    %c0_i32 = arith.constant 0 : i32
    %c0_i32_0 = arith.constant 0 : i32
    %c0_i32_1 = arith.constant 0 : i32
    return %c0_i32, %c0_i32_0 : i32, i32
  }
  func.func @transform_9(%arg0: i32) -> (i32, i32) {
    %c0_i32 = arith.constant 0 : i32
    %c0_i32_0 = arith.constant 0 : i32
    %c0_i32_1 = arith.constant 0 : i32
    return %c0_i32, %c0_i32_0 : i32, i32
  }
  func.func @transform_10(%arg0: i32) -> (i32, i32) {
    %c0_i32 = arith.constant 0 : i32
    %c0_i32_0 = arith.constant 0 : i32
    %c0_i32_1 = arith.constant 0 : i32
    return %c0_i32, %c0_i32_0 : i32, i32
  }
  func.func @transform_11(%arg0: i32) -> (i32, i32) {
    %c0_i32 = arith.constant 0 : i32
    %c0_i32_0 = arith.constant 0 : i32
    %c0_i32_1 = arith.constant 0 : i32
    return %c0_i32, %c0_i32_0 : i32, i32
  }
  func.func @transform_12(%arg0: i32) -> (i32, i32) {
    %c0_i32 = arith.constant 0 : i32
    %c0_i32_0 = arith.constant 0 : i32
    %c0_i32_1 = arith.constant 0 : i32
    return %c0_i32, %c0_i32_0 : i32, i32
  }
  func.func @transform_13(%arg0: i32) -> (i32, i32) {
    %c0_i32 = arith.constant 0 : i32
    %c0_i32_0 = arith.constant 0 : i32
    return %arg0, %c0_i32 : i32, i32
  }
}

</mosaic_0001>

<bundles_post_ra>
// kernel: gcn_forward.4
= control target key start
LH: loop header
LB: loop body
LE: loop exit
PB: predicated region body
PF: predicated region fallthrough
CT: control target
= control target key end

     0   :  { %s959_s1 = inlined_call_operand.vmem [shape: bf16[128,128], index: 1, kind: input, shape index: {}]   ;;  %s960_s0 = inlined_call_operand.vmem [shape: bf16[256,128], index: 0, kind: input, shape index: {}]   ;;  %s961_s2 = inlined_call_operand.vmem [shape: bf16[256,128], index: 2, kind: output, shape index: {}]  }
   0x1   :  { %v800_v0 = vld [vmem:[%s959_s1] sm:$0xff]   ;;  %v801_v1 = vld [vmem:[%s959_s1 + $0x8] sm:$0xff]   ;;  %v802_v2 = vld [vmem:[%s959_s1 + $0x10] sm:$0xff]  }
   0x2   :  { %736 = vmatprep.subr.bf16.mxu0 %v800_v0  ;;  %784 = vmatprep.subr.bf16.mxu1 %v800_v0  ;;  %v803_v3 = vld [vmem:[%s959_s1 + $0x18] sm:$0xff]   ;;  %v808_v4 = vld [vmem:[%s960_s0] sm:$0xff]   ;;  %v805_v7 = vld [vmem:[%s959_s1 + $0x28] sm:$0xff]  }
   0x3   :  { %737 = vmatpush3.bf16.msra.mxu0 %v800_v0  ;;  %792 = vmatpush3.bf16.msra.mxu1 %v800_v0  ;;  %v809_v5 = vld [vmem:[%s960_s0 + $0x40] sm:$0xff]   ;;  %v806_v8 = vld [vmem:[%s959_s1 + $0x30] sm:$0xff]   ;;  %v807_v9 = vld [vmem:[%s959_s1 + $0x38] sm:$0xff]  }
   0x4   :  { %738 = vmatprep.subr.bf16.mxu0 %v801_v1  ;;  %785 = vmatprep.subr.bf16.mxu1 %v801_v1  ;;  %v804_v6 = vld [vmem:[%s959_s1 + $0x20] sm:$0xff]   ;;  %v810_v10 = vld [vmem:[%s960_s0 + $0x8] sm:$0xff]   ;;  %v812_v12 = vld [vmem:[%s960_s0 + $0x10] sm:$0xff]  }
   0x5   :  { %752 = vmatprep.mubr.bf16.mxu0 %v808_v4  ;;  %768 = vmatprep.mubr.bf16.mxu1 %v809_v5  ;;  %v811_v11 = vld [vmem:[%s960_s0 + $0x48] sm:$0xff]   ;;  %v813_v13 = vld [vmem:[%s960_s0 + $0x50] sm:$0xff]   ;;  %v814_v14 = vld [vmem:[%s960_s0 + $0x18] sm:$0xff]  }
   0x6   :  { %v815_v15 = vld [vmem:[%s960_s0 + $0x58] sm:$0xff]   ;;  %v816_v16 = vld [vmem:[%s960_s0 + $0x20] sm:$0xff]   ;;  %v818_v18 = vld [vmem:[%s960_s0 + $0x28] sm:$0xff]  }
   0x7   :  { %739 = vmatpush3.bf16.msra.mxu0 %v801_v1  ;;  %793 = vmatpush3.bf16.msra.mxu1 %v801_v1  ;;  %v817_v17 = vld [vmem:[%s960_s0 + $0x60] sm:$0xff]   ;;  %v819_v19 = vld [vmem:[%s960_s0 + $0x68] sm:$0xff]   ;;  %v820_v20 = vld [vmem:[%s960_s0 + $0x30] sm:$0xff]  }
   0x8   :  { %740 = vmatprep.subr.bf16.mxu0 %v802_v2  ;;  %786 = vmatprep.subr.bf16.mxu1 %v802_v2  ;;  %v821_v21 = vld [vmem:[%s960_s0 + $0x70] sm:$0xff]   ;;  %v822_v22 = vld [vmem:[%s960_s0 + $0x38] sm:$0xff]  }
   0x9   :  { %v823_v23 = vld [vmem:[%s960_s0 + $0x78] sm:$0xff]  }
   0xb   :  { %741 = vmatpush3.bf16.msra.mxu0 %v802_v2  ;;  %794 = vmatpush3.bf16.msra.mxu1 %v802_v2 }
   0xc   :  { %742 = vmatprep.subr.bf16.mxu0 %v803_v3  ;;  %787 = vmatprep.subr.bf16.mxu1 %v803_v3 }
   0xf   :  { %743 = vmatpush3.bf16.msra.mxu0 %v803_v3  ;;  %795 = vmatpush3.bf16.msra.mxu1 %v803_v3 }
  0x10   :  { %744 = vmatprep.subr.bf16.mxu0 %v804_v6  ;;  %788 = vmatprep.subr.bf16.mxu1 %v804_v6 }
  0x13   :  { %745 = vmatpush3.bf16.msra.mxu0 %v804_v6  ;;  %796 = vmatpush3.bf16.msra.mxu1 %v804_v6 }
  0x14   :  { %746 = vmatprep.subr.bf16.mxu0 %v805_v7  ;;  %789 = vmatprep.subr.bf16.mxu1 %v805_v7 }
  0x17   :  { %747 = vmatpush3.bf16.msra.mxu0 %v805_v7  ;;  %797 = vmatpush3.bf16.msra.mxu1 %v805_v7 }
  0x18   :  { %748 = vmatprep.subr.bf16.mxu0 %v806_v8  ;;  %790 = vmatprep.subr.bf16.mxu1 %v806_v8 }
  0x1b   :  { %749 = vmatpush3.bf16.msra.mxu0 %v806_v8  ;;  %798 = vmatpush3.bf16.msra.mxu1 %v806_v8 }
  0x1c   :  { %750 = vmatprep.subr.bf16.mxu0 %v807_v9  ;;  %791 = vmatprep.subr.bf16.mxu1 %v807_v9 }
  0x1f   :  { %751 = vmatpush3.bf16.msra.mxu0 %v807_v9  ;;  %799 = vmatpush3.bf16.msra.mxu1 %v807_v9 }
  0x22   :  { %753 = vmatmul.mubr.bf16.vlgmr.msra.gmra.mrb[0].mxu0 %v810_v10  ;;  %769 = vmatmul.mubr.bf16.vlgmr.msra.gmra.mrb[0].mxu1 %v811_v11 }
  0x23   :  { %756 = vmatprep.mubr.bf16.mxu0 %v812_v12  ;;  %772 = vmatprep.mubr.bf16.mxu1 %v813_v13 }
  0x2a   :  { %757 = vmatmul.mubr.bf16.gmra.mrb[4].mxu0 %v814_v14  ;;  %773 = vmatmul.mubr.bf16.gmra.mrb[4].mxu1 %v815_v15 }
  0x2b   :  { %760 = vmatprep.mubr.bf16.mxu0 %v816_v16  ;;  %776 = vmatprep.mubr.bf16.mxu1 %v817_v17 }
  0x32   :  { %761 = vmatmul.mubr.bf16.gmra.mrb[8].mxu0 %v818_v18  ;;  %777 = vmatmul.mubr.bf16.gmra.mrb[8].mxu1 %v819_v19 }
  0x33   :  { %764 = vmatprep.mubr.bf16.mxu0 %v820_v20  ;;  %780 = vmatprep.mubr.bf16.mxu1 %v821_v21 }
  0x3a   :  { %765 = vmatmul.mubr.bf16.gmra.mrb[12].mxu0 %v822_v22  ;;  %781 = vmatmul.mubr.bf16.gmra.mrb[12].mxu1 %v823_v23 }
  0xf5   :  { %v754_v24 = vpop.f32.mrb[0].mxu0  ;;  %v770_v25 = vpop.f32.mrb[0].mxu1 }
  0xf6   :  { %v238_v26 = vpop.f32.mrb[1].mxu0  ;;  %v302_v27 = vpop.f32.mrb[1].mxu1 }
  0xf7   :  { %v755_v28 = vpop.f32.mrb[2].mxu0  ;;  %v771_v29 = vpop.f32.mrb[2].mxu1 }
  0xf8   :  { %v625_v30 = vpack.c.bf16 %v755_v28, %v754_v24  ;;  %v665_v31 = vpack.c.bf16 %v771_v29, %v770_v25  ;;  %v241_v32 = vpop.f32.mrb[3].mxu0  ;;  %v305_v33 = vpop.f32.mrb[3].mxu1 }
  0xf9   :  { %v620_v34 = vpack.c.bf16 %v241_v32, %v238_v26  ;;  %v660_v35 = vpack.c.bf16 %v305_v33, %v302_v27 }
  0xfa   :  { %697 = vst [vmem:[%s961_s2 + $0x8] sm:$0xff] %v625_v30   ;;  %705 = vst [vmem:[%s961_s2 + $0x48] sm:$0xff] %v665_v31  }
  0xfb   :  { %621 = vst [vmem:[%s961_s2] sm:$0xff] %v620_v34   ;;  %704 = vst [vmem:[%s961_s2 + $0x40] sm:$0xff] %v660_v35  }
  0xfd   :  { %v758_v36 = vpop.f32.mrb[4].mxu0  ;;  %v774_v37 = vpop.f32.mrb[4].mxu1 }
  0xfe   :  { %v254_v38 = vpop.f32.mrb[5].mxu0  ;;  %v318_v39 = vpop.f32.mrb[5].mxu1 }
  0xff   :  { %v759_v40 = vpop.f32.mrb[6].mxu0  ;;  %v775_v41 = vpop.f32.mrb[6].mxu1 }
 0x100   :  { %v635_v42 = vpack.c.bf16 %v759_v40, %v758_v36  ;;  %v675_v43 = vpack.c.bf16 %v775_v41, %v774_v37  ;;  %v257_v44 = vpop.f32.mrb[7].mxu0  ;;  %v321_v45 = vpop.f32.mrb[7].mxu1 }
 0x101   :  { %v630_v46 = vpack.c.bf16 %v257_v44, %v254_v38  ;;  %v670_v47 = vpack.c.bf16 %v321_v45, %v318_v39 }
 0x102   :  { %699 = vst [vmem:[%s961_s2 + $0x18] sm:$0xff] %v635_v42   ;;  %707 = vst [vmem:[%s961_s2 + $0x58] sm:$0xff] %v675_v43  }
 0x103   :  { %698 = vst [vmem:[%s961_s2 + $0x10] sm:$0xff] %v630_v46   ;;  %706 = vst [vmem:[%s961_s2 + $0x50] sm:$0xff] %v670_v47  }
 0x105   :  { %v762_v48 = vpop.f32.mrb[8].mxu0  ;;  %v778_v49 = vpop.f32.mrb[8].mxu1 }
 0x106   :  { %v270_v50 = vpop.f32.mrb[9].mxu0  ;;  %v334_v51 = vpop.f32.mrb[9].mxu1 }
 0x107   :  { %v763_v52 = vpop.f32.mrb[10].mxu0  ;;  %v779_v53 = vpop.f32.mrb[10].mxu1 }
 0x108   :  { %v645_v54 = vpack.c.bf16 %v763_v52, %v762_v48  ;;  %v685_v55 = vpack.c.bf16 %v779_v53, %v778_v49  ;;  %v273_v56 = vpop.f32.mrb[11].mxu0  ;;  %v337_v57 = vpop.f32.mrb[11].mxu1 }
 0x109   :  { %v640_v58 = vpack.c.bf16 %v273_v56, %v270_v50  ;;  %v680_v59 = vpack.c.bf16 %v337_v57, %v334_v51 }
 0x10a   :  { %701 = vst [vmem:[%s961_s2 + $0x28] sm:$0xff] %v645_v54   ;;  %709 = vst [vmem:[%s961_s2 + $0x68] sm:$0xff] %v685_v55  }
 0x10b   :  { %700 = vst [vmem:[%s961_s2 + $0x20] sm:$0xff] %v640_v58   ;;  %708 = vst [vmem:[%s961_s2 + $0x60] sm:$0xff] %v680_v59  }
 0x10d   :  { %v766_v60 = vpop.f32.mrb[12].mxu0  ;;  %v782_v61 = vpop.f32.mrb[12].mxu1 }
 0x10e   :  { %v286_v62 = vpop.f32.mrb[13].mxu0  ;;  %v350_v63 = vpop.f32.mrb[13].mxu1 }
 0x10f   :  { %v767_v0 = vpop.f32.mrb[14].mxu0  ;;  %v783_v1 = vpop.f32.mrb[14].mxu1 }
 0x110   :  { %v655_v2 = vpack.c.bf16 %v767_v0, %v766_v60  ;;  %v695_v3 = vpack.c.bf16 %v783_v1, %v782_v61  ;;  %v289_v4 = vpop.f32.mrb[15].mxu0  ;;  %v353_v5 = vpop.f32.mrb[15].mxu1 }
 0x111   :  { %v650_v6 = vpack.c.bf16 %v289_v4, %v286_v62  ;;  %v690_v7 = vpack.c.bf16 %v353_v5, %v350_v63 }
 0x112   :  { %703 = vst [vmem:[%s961_s2 + $0x38] sm:$0xff] %v655_v2   ;;  %711 = vst [vmem:[%s961_s2 + $0x78] sm:$0xff] %v695_v3  }
 0x113   :  { %702 = vst [vmem:[%s961_s2 + $0x30] sm:$0xff] %v650_v6   ;;  %710 = vst [vmem:[%s961_s2 + $0x70] sm:$0xff] %v690_v7  }

// kernel: gcn_forward.5
= control target key start
LH: loop header
LB: loop body
LE: loop exit
PB: predicated region body
PF: predicated region fallthrough
CT: control target
= control target key end

     0   :  { %s1721_s1 = inlined_call_operand.vmem [shape: bf16[256,128], index: 1, kind: input, shape index: {}]   ;;  %s1722_s0 = inlined_call_operand.vmem [shape: bf16[256,256], index: 0, kind: input, shape index: {}]   ;;  %s1723_s3 = inlined_call_operand.vmem [shape: bf16[128,128], index: 3, kind: input, shape index: {}]   ;;  %s1724_s2 = inlined_call_operand.vmem [shape: f32[1,128], index: 2, kind: input, shape index: {}]   ;;  %s1725_s4 = inlined_call_operand.vmem [shape: bf16[256,128], index: 4, kind: output, shape index: {}]  }
   0x1   :  { %v1359_v0 = vld [vmem:[%s1721_s1 + $0x40] sm:$0xff]   ;;  %v1361_v2 = vld [vmem:[%s1721_s1 + $0x48] sm:$0xff]   ;;  %v1363_v4 = vld [vmem:[%s1721_s1 + $0x50] sm:$0xff]  }
   0x2   :  { %v1360_v1 = vld [vmem:[%s1721_s1] sm:$0xff]   ;;  %1159 = vmatprep.subr.bf16.mxu0 %v1359_v0  ;;  %1343 = vmatprep.subr.bf16.mxu1 %v1359_v0  ;;  %v1362_v3 = vld [vmem:[%s1721_s1 + $0x8] sm:$0xff]   ;;  %v1364_v5 = vld [vmem:[%s1721_s1 + $0x10] sm:$0xff]  }
   0x3   :  { %1160 = vmatpush3.bf16.msra.mxu0 %v1360_v1  ;;  %1351 = vmatpush3.bf16.msra.mxu1 %v1360_v1  ;;  %v1365_v6 = vld [vmem:[%s1721_s1 + $0x58] sm:$0xff]   ;;  %v1367_v8 = vld [vmem:[%s1721_s1 + $0x60] sm:$0xff]   ;;  %v1369_v10 = vld [vmem:[%s1721_s1 + $0x68] sm:$0xff]  }
   0x4   :  { %1161 = vmatprep.subr.bf16.mxu0 %v1361_v2  ;;  %1344 = vmatprep.subr.bf16.mxu1 %v1361_v2  ;;  %v1366_v7 = vld [vmem:[%s1721_s1 + $0x18] sm:$0xff]   ;;  %v1368_v9 = vld [vmem:[%s1721_s1 + $0x20] sm:$0xff]   ;;  %v1370_v12 = vld [vmem:[%s1721_s1 + $0x28] sm:$0xff]  }
   0x5   :  { %v1377_v11 = vld [vmem:[%s1722_s0 + $0x4] ss:$8 sps:$4 sm:$0xff]   ;;  %v1371_v13 = vld [vmem:[%s1721_s1 + $0x70] sm:$0xff]   ;;  %v1373_v15 = vld [vmem:[%s1721_s1 + $0x78] sm:$0xff]  }
   0x6   :  { %377 = vmatprep.mubr.bf16.mxu0 %v1377_v11  ;;  %v1372_v14 = vld [vmem:[%s1721_s1 + $0x30] sm:$0xff]   ;;  %v1374_v16 = vld [vmem:[%s1721_s1 + $0x38] sm:$0xff]   ;;  %v1375_v17 = vld [vmem:[%s1722_s0] ss:$8 sps:$4 sm:$0xff]  }
   0x7   :  { %1162 = vmatpush3.bf16.msra.mxu0 %v1362_v3  ;;  %1352 = vmatpush3.bf16.msra.mxu1 %v1362_v3  ;;  %v1407_v18 = vld [vmem:[%s1722_s0 + $0xc4] ss:$8 sps:$4 sm:$0xff]   ;;  %v1378_v19 = vld [vmem:[%s1722_s0 + $0x14] ss:$8 sps:$4 sm:$0xff]   ;;  %v1405_v20 = vld [vmem:[%s1722_s0 + $0xc0] ss:$8 sps:$4 sm:$0xff]  }
   0x8   :  { %1163 = vmatprep.subr.bf16.mxu0 %v1363_v4  ;;  %1345 = vmatprep.subr.bf16.mxu1 %v1363_v4  ;;  %v1411_v21 = vld [vmem:[%s1722_s0 + $0xd4] ss:$8 sps:$4 sm:$0xff]   ;;  %v1380_v22 = vld [vmem:[%s1722_s0 + $0x10] ss:$8 sps:$4 sm:$0xff]   ;;  %v1381_v23 = vld [vmem:[%s1722_s0 + $0x24] ss:$8 sps:$4 sm:$0xff]  }
   0x9   :  { %473 = vmatprep.mubr.bf16.mxu1 %v1407_v18  ;;  %v1413_v24 = vld [vmem:[%s1722_s0 + $0xd0] ss:$8 sps:$4 sm:$0xff]   ;;  %v1417_v25 = vld [vmem:[%s1722_s0 + $0xe4] ss:$8 sps:$4 sm:$0xff]   ;;  %v1383_v29 = vld [vmem:[%s1722_s0 + $0x20] ss:$8 sps:$4 sm:$0xff]  }
   0xa   :  { %v1423_v26 = vld [vmem:[%s1723_s3] sm:$0xff]   ;;  %v1424_v27 = vld [vmem:[%s1723_s3 + $0x8] sm:$0xff]   ;;  %v1425_v28 = vld [vmem:[%s1723_s3 + $0x10] sm:$0xff]  }
   0xb   :  { %1164 = vmatpush3.bf16.msra.mxu0 %v1364_v5  ;;  %1353 = vmatpush3.bf16.msra.mxu1 %v1364_v5  ;;  %v1384_v30 = vld [vmem:[%s1722_s0 + $0x34] ss:$8 sps:$4 sm:$0xff]   ;;  %v1419_v31 = vld [vmem:[%s1722_s0 + $0xe0] ss:$8 sps:$4 sm:$0xff]   ;;  %v1386_v33 = vld [vmem:[%s1722_s0 + $0x30] ss:$8 sps:$4 sm:$0xff]  }
   0xc   :  { %1165 = vmatprep.subr.bf16.mxu0 %v1365_v6  ;;  %1346 = vmatprep.subr.bf16.mxu1 %v1365_v6  ;;  %v1420_v32 = vld [vmem:[%s1722_s0 + $0xf4] ss:$8 sps:$4 sm:$0xff]   ;;  %v1387_v34 = vld [vmem:[%s1722_s0 + $0x44] ss:$8 sps:$4 sm:$0xff]   ;;  %v1422_v35 = vld [vmem:[%s1722_s0 + $0xf0] ss:$8 sps:$4 sm:$0xff]  }
   0xd   :  { %v1389_v36 = vld [vmem:[%s1722_s0 + $0x40] ss:$8 sps:$4 sm:$0xff]   ;;  %v1390_v37 = vld [vmem:[%s1722_s0 + $0x54] ss:$8 sps:$4 sm:$0xff]   ;;  %v1392_v38 = vld [vmem:[%s1722_s0 + $0x50] ss:$8 sps:$4 sm:$0xff]  }
   0xe   :  { %v1393_v39 = vld [vmem:[%s1722_s0 + $0x64] ss:$8 sps:$4 sm:$0xff]   ;;  %v1395_v40 = vld [vmem:[%s1722_s0 + $0x60] ss:$8 sps:$4 sm:$0xff]   ;;  %v1396_v41 = vld [vmem:[%s1722_s0 + $0x74] ss:$8 sps:$4 sm:$0xff]  }
   0xf   :  { %1166 = vmatpush3.bf16.msra.mxu0 %v1366_v7  ;;  %1354 = vmatpush3.bf16.msra.mxu1 %v1366_v7  ;;  %v1398_v42 = vld [vmem:[%s1722_s0 + $0x70] ss:$8 sps:$4 sm:$0xff]   ;;  %v1399_v43 = vld [vmem:[%s1722_s0 + $0x84] ss:$8 sps:$4 sm:$0xff]   ;;  %v1401_v44 = vld [vmem:[%s1722_s0 + $0x80] ss:$8 sps:$4 sm:$0xff]  }
  0x10   :  { %1167 = vmatprep.subr.bf16.mxu0 %v1367_v8  ;;  %1347 = vmatprep.subr.bf16.mxu1 %v1367_v8  ;;  %v1402_v45 = vld [vmem:[%s1722_s0 + $0x94] ss:$8 sps:$4 sm:$0xff]   ;;  %v1404_v46 = vld [vmem:[%s1722_s0 + $0x90] ss:$8 sps:$4 sm:$0xff]   ;;  %v1408_v47 = vld [vmem:[%s1722_s0 + $0xa4] ss:$8 sps:$4 sm:$0xff]  }
  0x11   :  { %v1410_v48 = vld [vmem:[%s1722_s0 + $0xa0] ss:$8 sps:$4 sm:$0xff]   ;;  %v1414_v49 = vld [vmem:[%s1722_s0 + $0xb4] ss:$8 sps:$4 sm:$0xff]   ;;  %v1416_v51 = vld [vmem:[%s1722_s0 + $0xb0] ss:$8 sps:$4 sm:$0xff]  }
  0x12   :  { %v1426_v50 = vld [vmem:[%s1723_s3 + $0x18] sm:$0xff]   ;;  %v1427_v52 = vld [vmem:[%s1723_s3 + $0x20] sm:$0xff]   ;;  %v1428_v53 = vld [vmem:[%s1723_s3 + $0x28] sm:$0xff]  }
  0x13   :  { %1168 = vmatpush3.bf16.msra.mxu0 %v1368_v9  ;;  %1355 = vmatpush3.bf16.msra.mxu1 %v1368_v9  ;;  %v1429_v54 = vld [vmem:[%s1723_s3 + $0x30] sm:$0xff]   ;;  %v1430_v55 = vld [vmem:[%s1723_s3 + $0x38] sm:$0xff]   ;;  %v1627_v57 = vld [vmem:[%s1724_s2] ss:$0 sm:$0xff] }
  0x14   :  { %1169 = vmatprep.subr.bf16.mxu0 %v1369_v10  ;;  %1348 = vmatprep.subr.bf16.mxu1 %v1369_v10 }
  0x17   :  { %1170 = vmatpush3.bf16.msra.mxu0 %v1370_v12  ;;  %1356 = vmatpush3.bf16.msra.mxu1 %v1370_v12 }
  0x18   :  { %1171 = vmatprep.subr.bf16.mxu0 %v1371_v13  ;;  %1349 = vmatprep.subr.bf16.mxu1 %v1371_v13 }
  0x1b   :  { %1172 = vmatpush3.bf16.msra.mxu0 %v1372_v14  ;;  %1357 = vmatpush3.bf16.msra.mxu1 %v1372_v14 }
  0x1c   :  { %1173 = vmatprep.subr.bf16.mxu0 %v1373_v15  ;;  %1350 = vmatprep.subr.bf16.mxu1 %v1373_v15 }
  0x1f   :  { %1174 = vmatpush3.bf16.msra.mxu0 %v1374_v16  ;;  %1358 = vmatpush3.bf16.msra.mxu1 %v1374_v16 }
  0x20   :  { %1295 = vmatprep.subr.bf16.mxu1 %v1423_v26 }
  0x22   :  { %378 = vmatmul.mubr.bf16.vlgmr.msra.gmra.mrb[0].mxu0 %v1375_v17  ;;  %474 = vmatmul.mubr.bf16.vlgmr.msra.gmra.mrb[0].mxu1 %v1405_v20 }
  0x23   :  { %385 = vmatprep.mubr.bf16.mxu0 %v1378_v19  ;;  %481 = vmatprep.mubr.bf16.mxu1 %v1411_v21 }
  0x24   :  { %1296 = vmatpush3.bf16.msra.mxu1 %v1423_v26 }
  0x25   :  { %1297 = vmatprep.subr.bf16.mxu1 %v1424_v27 }
  0x28   :  { %1298 = vmatpush3.bf16.msra.mxu1 %v1424_v27 }
  0x29   :  { %1299 = vmatprep.subr.bf16.mxu1 %v1425_v28 }
  0x2a   :  { %386 = vmatmul.mubr.bf16.gmra.mrb[4].mxu0 %v1380_v22  ;;  %482 = vmatmul.mubr.bf16.gmra.mrb[4].mxu1 %v1413_v24 }
  0x2b   :  { %393 = vmatprep.mubr.bf16.mxu0 %v1381_v23  ;;  %489 = vmatprep.mubr.bf16.mxu1 %v1417_v25 }
  0x2c   :  { %1300 = vmatpush3.bf16.msra.mxu1 %v1425_v28 }
  0x2d   :  { %1301 = vmatprep.subr.bf16.mxu1 %v1426_v50 }
  0x30   :  { %1302 = vmatpush3.bf16.msra.mxu1 %v1426_v50 }
  0x31   :  { %1303 = vmatprep.subr.bf16.mxu1 %v1427_v52 }
  0x32   :  { %394 = vmatmul.mubr.bf16.gmra.mrb[8].mxu0 %v1383_v29  ;;  %490 = vmatmul.mubr.bf16.gmra.mrb[8].mxu1 %v1419_v31 }
  0x33   :  { %401 = vmatprep.mubr.bf16.mxu0 %v1384_v30  ;;  %497 = vmatprep.mubr.bf16.mxu1 %v1420_v32 }
  0x34   :  { %1304 = vmatpush3.bf16.msra.mxu1 %v1427_v52 }
  0x35   :  { %1305 = vmatprep.subr.bf16.mxu1 %v1428_v53 }
  0x38   :  { %1306 = vmatpush3.bf16.msra.mxu1 %v1428_v53 }
  0x39   :  { %1307 = vmatprep.subr.bf16.mxu1 %v1429_v54 }
  0x3a   :  { %402 = vmatmul.mubr.bf16.gmra.mrb[12].mxu0 %v1386_v33  ;;  %498 = vmatmul.mubr.bf16.gmra.mrb[12].mxu1 %v1422_v35 }
  0x3b   :  { %409 = vmatprep.mubr.bf16.mxu0 %v1387_v34 }
  0x3c   :  { %1308 = vmatpush3.bf16.msra.mxu1 %v1429_v54 }
  0x3d   :  { %1309 = vmatprep.subr.bf16.mxu1 %v1430_v55 }
  0x40   :  { %1310 = vmatpush3.bf16.msra.mxu1 %v1430_v55 }
  0x42   :  { %410 = vmatmul.mubr.bf16.gmra.mrb[16].mxu0 %v1389_v36 }
  0x43   :  { %417 = vmatprep.mubr.bf16.mxu0 %v1390_v37 }
  0x4a   :  { %418 = vmatmul.mubr.bf16.gmra.mrb[20].mxu0 %v1392_v38 }
  0x4b   :  { %425 = vmatprep.mubr.bf16.mxu0 %v1393_v39 }
  0x52   :  { %426 = vmatmul.mubr.bf16.gmra.mrb[24].mxu0 %v1395_v40 }
  0x53   :  { %433 = vmatprep.mubr.bf16.mxu0 %v1396_v41 }
  0x5a   :  { %434 = vmatmul.mubr.bf16.gmra.mrb[28].mxu0 %v1398_v42 }
  0x5b   :  { %441 = vmatprep.mubr.bf16.mxu0 %v1399_v43 }
  0x62   :  { %442 = vmatmul.mubr.bf16.gmra.mrb[32].mxu0 %v1401_v44 }
  0x63   :  { %449 = vmatprep.mubr.bf16.mxu0 %v1402_v45 }
  0x6a   :  { %450 = vmatmul.mubr.bf16.gmra.mrb[36].mxu0 %v1404_v46 }
  0x6b   :  { %457 = vmatprep.mubr.bf16.mxu0 %v1408_v47 }
  0x72   :  { %458 = vmatmul.mubr.bf16.gmra.mrb[40].mxu0 %v1410_v48 }
  0x73   :  { %465 = vmatprep.mubr.bf16.mxu0 %v1414_v49 }
  0x7a   :  { %466 = vmatmul.mubr.bf16.gmra.mrb[44].mxu0 %v1416_v51 }
  0xf5   :  { %v1175_v56 = vpop.f32.mrb[0].mxu0  ;;  %v1247_v59 = vpop.f32.mrb[0].mxu1 }
  0xf6   :  { %v1176_v58 = vpop.f32.mrb[1].mxu0  ;;  %v1248_v62 = vpop.f32.mrb[1].mxu1 }
  0xf7   :  { %v1177_v60 = vadd.f32 %v1176_v58, %v1175_v56  ;;  %v1178_v61 = vpop.f32.mrb[2].mxu0  ;;  %v1249_v0 = vadd.f32 %v1248_v62, %v1247_v59  ;;  %v1250_v1 = vpop.f32.mrb[2].mxu1 }
  0xf8   :  { %v1179_v63 = vpop.f32.mrb[3].mxu0  ;;  %v1251_v4 = vpop.f32.mrb[3].mxu1 }
  0xf9   :  { %v380_v2 = vadd.f32 %v1177_v60, %v1627_v57  ;;  %v1180_v3 = vadd.f32 %v1179_v63, %v1178_v61  ;;  %v476_v5 = vadd.f32 %v1249_v0, %v1627_v57  ;;  %v1252_v6 = vadd.f32 %v1251_v4, %v1250_v1 }
  0xfb   :  { %v383_v7 = vadd.f32 %v1180_v3, %v1627_v57  ;;  %v530_v8 = vmax.f32 %v476_v5, 0.0  ;;  %v479_v9 = vadd.f32 %v1252_v6, %v1627_v57  ;;  %v506_v10 = vmax.f32 %v380_v2, 0.0 }
  0xfd   :  { %v507_v11 = vmax.f32 %v383_v7, 0.0  ;;  %v1181_v12 = vpop.f32.mrb[4].mxu0  ;;  %v531_v14 = vmax.f32 %v479_v9, 0.0  ;;  %v1253_v15 = vpop.f32.mrb[4].mxu1 }
  0xfe   :  { %v1182_v13 = vpop.f32.mrb[5].mxu0  ;;  %v1254_v19 = vpop.f32.mrb[5].mxu1 }
  0xff   :  { %v1183_v16 = vadd.f32 %v1182_v13, %v1181_v12  ;;  %v1184_v17 = vpop.f32.mrb[6].mxu0  ;;  %v538_v18 = vpack.c.bf16 %v507_v11, %v506_v10  ;;  %v1255_v21 = vadd.f32 %v1254_v19, %v1253_v15  ;;  %v1256_v22 = vpop.f32.mrb[6].mxu1  ;;  %v1633_v23 = vpack.c.bf16 %v531_v14, %v530_v8 }
 0x100   :  { %v1185_v20 = vpop.f32.mrb[7].mxu0  ;;  %v1257_v26 = vpop.f32.mrb[7].mxu1 }
 0x101   :  { %v388_v24 = vadd.f32 %v1183_v16, %v1627_v57  ;;  %v1186_v25 = vadd.f32 %v1185_v20, %v1184_v17  ;;  %1311 = vmatprep.mubr.bf16.mxu1 %v538_v18  ;;  %v484_v27 = vadd.f32 %v1255_v21, %v1627_v57  ;;  %v1258_v28 = vadd.f32 %v1257_v26, %v1256_v22 }
 0x103   :  { %v391_v29 = vadd.f32 %v1186_v25, %v1627_v57  ;;  %v532_v30 = vmax.f32 %v484_v27, 0.0  ;;  %v487_v31 = vadd.f32 %v1258_v28, %v1627_v57  ;;  %v508_v32 = vmax.f32 %v388_v24, 0.0 }
 0x105   :  { %v509_v33 = vmax.f32 %v391_v29, 0.0  ;;  %v1187_v34 = vpop.f32.mrb[8].mxu0  ;;  %v533_v36 = vmax.f32 %v487_v31, 0.0  ;;  %v1259_v37 = vpop.f32.mrb[8].mxu1 }
 0x106   :  { %v1188_v35 = vpop.f32.mrb[9].mxu0  ;;  %v1260_v41 = vpop.f32.mrb[9].mxu1 }
 0x107   :  { %v539_v38 = vpack.c.bf16 %v509_v33, %v508_v32  ;;  %v1189_v39 = vadd.f32 %v1188_v35, %v1187_v34  ;;  %v1190_v40 = vpop.f32.mrb[10].mxu0  ;;  %v1261_v43 = vadd.f32 %v1260_v41, %v1259_v37  ;;  %v1262_v44 = vpop.f32.mrb[10].mxu1  ;;  %v1639_v45 = vpack.c.bf16 %v533_v36, %v532_v30 }
 0x108   :  { %v1191_v42 = vpop.f32.mrb[11].mxu0  ;;  %v1263_v48 = vpop.f32.mrb[11].mxu1 }
 0x109   :  { %v396_v46 = vadd.f32 %v1189_v39, %v1627_v57  ;;  %v1192_v47 = vadd.f32 %v1191_v42, %v1190_v40  ;;  %1312 = vmatmul.mubr.bf16.vlgmr.msra.gmra.mrb[16].mxu1 %v539_v38  ;;  %v492_v49 = vadd.f32 %v1261_v43, %v1627_v57  ;;  %v1264_v50 = vadd.f32 %v1263_v48, %v1262_v44 }
 0x10b   :  { %v399_v51 = vadd.f32 %v1192_v47, %v1627_v57  ;;  %v534_v52 = vmax.f32 %v492_v49, 0.0  ;;  %v495_v53 = vadd.f32 %v1264_v50, %v1627_v57  ;;  %v510_v54 = vmax.f32 %v396_v46, 0.0 }
 0x10d   :  { %v511_v55 = vmax.f32 %v399_v51, 0.0  ;;  %v1193_v56 = vpop.f32.mrb[12].mxu0  ;;  %v535_v59 = vmax.f32 %v495_v53, 0.0  ;;  %v1265_v60 = vpop.f32.mrb[12].mxu1 }
 0x10e   :  { %v1194_v58 = vpop.f32.mrb[13].mxu0  ;;  %v1266_v0 = vpop.f32.mrb[13].mxu1 }
 0x10f   :  { %v1195_v61 = vadd.f32 %v1194_v58, %v1193_v56  ;;  %v1196_v62 = vpop.f32.mrb[14].mxu0  ;;  %v540_v63 = vpack.c.bf16 %v511_v55, %v510_v54  ;;  %v1267_v2 = vadd.f32 %v1266_v0, %v1265_v60  ;;  %v1268_v3 = vpop.f32.mrb[14].mxu1  ;;  %v1645_v4 = vpack.c.bf16 %v535_v59, %v534_v52 }
 0x110   :  { %v1197_v1 = vpop.f32.mrb[15].mxu0  ;;  %v1269_v7 = vpop.f32.mrb[15].mxu1 }
 0x111   :  { %v404_v5 = vadd.f32 %v1195_v61, %v1627_v57  ;;  %v1198_v6 = vadd.f32 %v1197_v1, %v1196_v62  ;;  %1315 = vmatprep.mubr.bf16.mxu1 %v540_v63  ;;  %v500_v8 = vadd.f32 %v1267_v2, %v1627_v57  ;;  %v1270_v9 = vadd.f32 %v1269_v7, %v1268_v3 }
 0x113   :  { %v407_v10 = vadd.f32 %v1198_v6, %v1627_v57  ;;  %v536_v11 = vmax.f32 %v500_v8, 0.0  ;;  %v503_v12 = vadd.f32 %v1270_v9, %v1627_v57  ;;  %v512_v13 = vmax.f32 %v404_v5, 0.0 }
 0x115   :  { %v513_v14 = vmax.f32 %v407_v10, 0.0  ;;  %v1199_v15 = vpop.f32.mrb[16].mxu0  ;;  %v537_v17 = vmax.f32 %v503_v12, 0.0 }
 0x116   :  { %v1200_v16 = vpop.f32.mrb[17].mxu0 }
 0x117   :  { %v1201_v18 = vadd.f32 %v1200_v16, %v1199_v15  ;;  %v1202_v19 = vpop.f32.mrb[18].mxu0  ;;  %v541_v20 = vpack.c.bf16 %v513_v14, %v512_v13  ;;  %v1651_v22 = vpack.c.bf16 %v537_v17, %v536_v11 }
 0x118   :  { %v1203_v21 = vpop.f32.mrb[19].mxu0 }
 0x119   :  { %v412_v24 = vadd.f32 %v1201_v18, %v1627_v57  ;;  %v1204_v25 = vadd.f32 %v1203_v21, %v1202_v19  ;;  %1316 = vmatmul.mubr.bf16.gmra.mrb[20].mxu1 %v541_v20 }
 0x11b   :  { %v415_v26 = vadd.f32 %v1204_v25, %v1627_v57  ;;  %v514_v27 = vmax.f32 %v412_v24, 0.0 }
 0x11d   :  { %v515_v28 = vmax.f32 %v415_v26, 0.0  ;;  %v1205_v29 = vpop.f32.mrb[20].mxu0 }
 0x11e   :  { %v1206_v30 = vpop.f32.mrb[21].mxu0 }
 0x11f   :  { %v1207_v31 = vadd.f32 %v1206_v30, %v1205_v29  ;;  %v1208_v32 = vpop.f32.mrb[22].mxu0  ;;  %v542_v33 = vpack.c.bf16 %v515_v28, %v514_v27 }
 0x120   :  { %v1209_v34 = vpop.f32.mrb[23].mxu0 }
 0x121   :  { %v420_v35 = vadd.f32 %v1207_v31, %v1627_v57  ;;  %v1210_v36 = vadd.f32 %v1209_v34, %v1208_v32  ;;  %1319 = vmatprep.mubr.bf16.mxu1 %v542_v33 }
 0x123   :  { %v423_v37 = vadd.f32 %v1210_v36, %v1627_v57  ;;  %v516_v38 = vmax.f32 %v420_v35, 0.0 }
 0x125   :  { %v517_v39 = vmax.f32 %v423_v37, 0.0  ;;  %v1211_v40 = vpop.f32.mrb[24].mxu0 }
 0x126   :  { %v1212_v41 = vpop.f32.mrb[25].mxu0 }
 0x127   :  { %v1213_v42 = vadd.f32 %v1212_v41, %v1211_v40  ;;  %v1214_v43 = vpop.f32.mrb[26].mxu0  ;;  %v543_v44 = vpack.c.bf16 %v517_v39, %v516_v38 }
 0x128   :  { %v1215_v46 = vpop.f32.mrb[27].mxu0 }
 0x129   :  { %v428_v47 = vadd.f32 %v1213_v42, %v1627_v57  ;;  %v1216_v48 = vadd.f32 %v1215_v46, %v1214_v43  ;;  %1320 = vmatmul.mubr.bf16.gmra.mrb[24].mxu1 %v543_v44 }
 0x12b   :  { %v431_v49 = vadd.f32 %v1216_v48, %v1627_v57  ;;  %v518_v50 = vmax.f32 %v428_v47, 0.0 }
 0x12d   :  { %v519_v51 = vmax.f32 %v431_v49, 0.0  ;;  %v1217_v52 = vpop.f32.mrb[28].mxu0 }
 0x12e   :  { %v1218_v53 = vpop.f32.mrb[29].mxu0 }
 0x12f   :  { %v1219_v54 = vadd.f32 %v1218_v53, %v1217_v52  ;;  %v1220_v55 = vpop.f32.mrb[30].mxu0  ;;  %v544_v56 = vpack.c.bf16 %v519_v51, %v518_v50 }
 0x130   :  { %v1221_v58 = vpop.f32.mrb[31].mxu0 }
 0x131   :  { %v436_v59 = vadd.f32 %v1219_v54, %v1627_v57  ;;  %v1222_v60 = vadd.f32 %v1221_v58, %v1220_v55  ;;  %1323 = vmatprep.mubr.bf16.mxu1 %v544_v56 }
 0x133   :  { %v439_v61 = vadd.f32 %v1222_v60, %v1627_v57  ;;  %v520_v62 = vmax.f32 %v436_v59, 0.0 }
 0x135   :  { %v521_v63 = vmax.f32 %v439_v61, 0.0  ;;  %v1223_v0 = vpop.f32.mrb[32].mxu0 }
 0x136   :  { %v1224_v1 = vpop.f32.mrb[33].mxu0 }
 0x137   :  { %v1225_v2 = vadd.f32 %v1224_v1, %v1223_v0  ;;  %v1226_v3 = vpop.f32.mrb[34].mxu0  ;;  %v545_v5 = vpack.c.bf16 %v521_v63, %v520_v62 }
 0x138   :  { %v1227_v6 = vpop.f32.mrb[35].mxu0 }
 0x139   :  { %v444_v7 = vadd.f32 %v1225_v2, %v1627_v57  ;;  %v1228_v8 = vadd.f32 %v1227_v6, %v1226_v3  ;;  %1324 = vmatmul.mubr.bf16.gmra.mrb[28].mxu1 %v545_v5 }
 0x13b   :  { %v447_v9 = vadd.f32 %v1228_v8, %v1627_v57  ;;  %v522_v10 = vmax.f32 %v444_v7, 0.0 }
 0x13d   :  { %v523_v11 = vmax.f32 %v447_v9, 0.0  ;;  %v1229_v12 = vpop.f32.mrb[36].mxu0 }
 0x13e   :  { %v1230_v13 = vpop.f32.mrb[37].mxu0 }
 0x13f   :  { %v1231_v14 = vadd.f32 %v1230_v13, %v1229_v12  ;;  %v1232_v15 = vpop.f32.mrb[38].mxu0  ;;  %v546_v16 = vpack.c.bf16 %v523_v11, %v522_v10 }
 0x140   :  { %v1233_v17 = vpop.f32.mrb[39].mxu0 }
 0x141   :  { %v452_v18 = vadd.f32 %v1231_v14, %v1627_v57  ;;  %v1234_v19 = vadd.f32 %v1233_v17, %v1232_v15  ;;  %1327 = vmatprep.mubr.bf16.mxu1 %v546_v16 }
 0x143   :  { %v455_v20 = vadd.f32 %v1234_v19, %v1627_v57  ;;  %v524_v21 = vmax.f32 %v452_v18, 0.0 }
 0x145   :  { %v525_v24 = vmax.f32 %v455_v20, 0.0  ;;  %v1235_v25 = vpop.f32.mrb[40].mxu0 }
 0x146   :  { %v1236_v26 = vpop.f32.mrb[41].mxu0 }
 0x147   :  { %v1237_v27 = vadd.f32 %v1236_v26, %v1235_v25  ;;  %v1238_v28 = vpop.f32.mrb[42].mxu0  ;;  %v547_v29 = vpack.c.bf16 %v525_v24, %v524_v21 }
 0x148   :  { %v1239_v30 = vpop.f32.mrb[43].mxu0 }
 0x149   :  { %v460_v31 = vadd.f32 %v1237_v27, %v1627_v57  ;;  %v1240_v32 = vadd.f32 %v1239_v30, %v1238_v28  ;;  %1328 = vmatmul.mubr.bf16.gmra.mrb[32].mxu1 %v547_v29 }
 0x14b   :  { %v463_v33 = vadd.f32 %v1240_v32, %v1627_v57  ;;  %v526_v34 = vmax.f32 %v460_v31, 0.0 }
 0x14d   :  { %v527_v35 = vmax.f32 %v463_v33, 0.0  ;;  %v1241_v36 = vpop.f32.mrb[44].mxu0 }
 0x14e   :  { %v1242_v37 = vpop.f32.mrb[45].mxu0 }
 0x14f   :  { %v1243_v38 = vadd.f32 %v1242_v37, %v1241_v36  ;;  %v1244_v39 = vpop.f32.mrb[46].mxu0  ;;  %v548_v40 = vpack.c.bf16 %v527_v35, %v526_v34 }
 0x150   :  { %v1245_v41 = vpop.f32.mrb[47].mxu0 }
 0x151   :  { %v468_v42 = vadd.f32 %v1243_v38, %v1627_v57  ;;  %v1246_v43 = vadd.f32 %v1245_v41, %v1244_v39  ;;  %1331 = vmatprep.mubr.bf16.mxu1 %v548_v40 }
 0x153   :  { %v471_v44 = vadd.f32 %v1246_v43, %v1627_v57  ;;  %v528_v46 = vmax.f32 %v468_v42, 0.0 }
 0x155   :  { %v529_v47 = vmax.f32 %v471_v44, 0.0 }
 0x157   :  { %v549_v48 = vpack.c.bf16 %v529_v47, %v528_v46 }
 0x159   :  { %1332 = vmatmul.mubr.bf16.gmra.mrb[36].mxu1 %v549_v48 }
 0x15a   :  { %1335 = vmatprep.mubr.bf16.mxu1 %v1633_v23 }
 0x161   :  { %1336 = vmatmul.mubr.bf16.gmra.mrb[40].mxu1 %v1639_v45 }
 0x162   :  { %1339 = vmatprep.mubr.bf16.mxu1 %v1645_v4 }
 0x169   :  { %1340 = vmatmul.mubr.bf16.gmra.mrb[44].mxu1 %v1651_v22 }
 0x1dc   :  { %v1313_v49 = vpop.f32.mrb[16].mxu1 }
 0x1dd   :  { %v652_v50 = vpop.f32.mrb[17].mxu1 }
 0x1de   :  { %v1314_v51 = vpop.f32.mrb[18].mxu1 }
 0x1df   :  { %v1072_v52 = vpack.c.bf16 %v1314_v51, %v1313_v49  ;;  %v655_v53 = vpop.f32.mrb[19].mxu1 }
 0x1e0   :  { %v1067_v54 = vpack.c.bf16 %v655_v53, %v652_v50 }
 0x1e1   :  { %1144 = vst [vmem:[%s1725_s4 + $0x8] sm:$0xff] %v1072_v52  }
 0x1e2   :  { %1068 = vst [vmem:[%s1725_s4] sm:$0xff] %v1067_v54  }
 0x1ec   :  { %v1317_v57 = vpop.f32.mrb[20].mxu1 }
 0x1ed   :  { %v668_v23 = vpop.f32.mrb[21].mxu1 }
 0x1ee   :  { %v1318_v45 = vpop.f32.mrb[22].mxu1 }
 0x1ef   :  { %v1082_v4 = vpack.c.bf16 %v1318_v45, %v1317_v57  ;;  %v671_v55 = vpop.f32.mrb[23].mxu1 }
 0x1f0   :  { %v1077_v22 = vpack.c.bf16 %v671_v55, %v668_v23 }
 0x1f1   :  { %1146 = vst [vmem:[%s1725_s4 + $0x18] sm:$0xff] %v1082_v4  }
 0x1f2   :  { %1145 = vst [vmem:[%s1725_s4 + $0x10] sm:$0xff] %v1077_v22  }
 0x1fc   :  { %v1321_v56 = vpop.f32.mrb[24].mxu1 }
 0x1fd   :  { %v684_v58 = vpop.f32.mrb[25].mxu1 }
 0x1fe   :  { %v1322_v59 = vpop.f32.mrb[26].mxu1 }
 0x1ff   :  { %v1092_v60 = vpack.c.bf16 %v1322_v59, %v1321_v56  ;;  %v687_v61 = vpop.f32.mrb[27].mxu1 }
 0x200   :  { %v1087_v62 = vpack.c.bf16 %v687_v61, %v684_v58 }
 0x201   :  { %1148 = vst [vmem:[%s1725_s4 + $0x28] sm:$0xff] %v1092_v60  }
 0x202   :  { %1147 = vst [vmem:[%s1725_s4 + $0x20] sm:$0xff] %v1087_v62  }
 0x20c   :  { %v1325_v63 = vpop.f32.mrb[28].mxu1 }
 0x20d   :  { %v700_v0 = vpop.f32.mrb[29].mxu1 }
 0x20e   :  { %v1326_v1 = vpop.f32.mrb[30].mxu1 }
 0x20f   :  { %v1102_v2 = vpack.c.bf16 %v1326_v1, %v1325_v63  ;;  %v703_v3 = vpop.f32.mrb[31].mxu1 }
 0x210   :  { %v1097_v5 = vpack.c.bf16 %v703_v3, %v700_v0 }
 0x211   :  { %1150 = vst [vmem:[%s1725_s4 + $0x38] sm:$0xff] %v1102_v2  }
 0x212   :  { %1149 = vst [vmem:[%s1725_s4 + $0x30] sm:$0xff] %v1097_v5  }
 0x21c   :  { %v1329_v6 = vpop.f32.mrb[32].mxu1 }
 0x21d   :  { %v716_v7 = vpop.f32.mrb[33].mxu1 }
 0x21e   :  { %v1330_v8 = vpop.f32.mrb[34].mxu1 }
 0x21f   :  { %v1112_v9 = vpack.c.bf16 %v1330_v8, %v1329_v6  ;;  %v719_v10 = vpop.f32.mrb[35].mxu1 }
 0x220   :  { %v1107_v11 = vpack.c.bf16 %v719_v10, %v716_v7 }
 0x221   :  { %1152 = vst [vmem:[%s1725_s4 + $0x48] sm:$0xff] %v1112_v9  }
 0x222   :  { %1151 = vst [vmem:[%s1725_s4 + $0x40] sm:$0xff] %v1107_v11  }
 0x22c   :  { %v1333_v12 = vpop.f32.mrb[36].mxu1 }
 0x22d   :  { %v732_v13 = vpop.f32.mrb[37].mxu1 }
 0x22e   :  { %v1334_v14 = vpop.f32.mrb[38].mxu1 }
 0x22f   :  { %v1122_v15 = vpack.c.bf16 %v1334_v14, %v1333_v12  ;;  %v735_v16 = vpop.f32.mrb[39].mxu1 }
 0x230   :  { %v1117_v17 = vpack.c.bf16 %v735_v16, %v732_v13 }
 0x231   :  { %1154 = vst [vmem:[%s1725_s4 + $0x58] sm:$0xff] %v1122_v15  }
 0x232   :  { %1153 = vst [vmem:[%s1725_s4 + $0x50] sm:$0xff] %v1117_v17  }
 0x234   :  { %v1337_v18 = vpop.f32.mrb[40].mxu1 }
 0x235   :  { %v748_v19 = vpop.f32.mrb[41].mxu1 }
 0x236   :  { %v1338_v20 = vpop.f32.mrb[42].mxu1 }
 0x237   :  { %v1132_v21 = vpack.c.bf16 %v1338_v20, %v1337_v18  ;;  %v751_v24 = vpop.f32.mrb[43].mxu1 }
 0x238   :  { %v1127_v25 = vpack.c.bf16 %v751_v24, %v748_v19 }
 0x239   :  { %1156 = vst [vmem:[%s1725_s4 + $0x68] sm:$0xff] %v1132_v21  }
 0x23a   :  { %1155 = vst [vmem:[%s1725_s4 + $0x60] sm:$0xff] %v1127_v25  }
 0x23c   :  { %v1341_v26 = vpop.f32.mrb[44].mxu1 }
 0x23d   :  { %v764_v27 = vpop.f32.mrb[45].mxu1 }
 0x23e   :  { %v1342_v28 = vpop.f32.mrb[46].mxu1 }
 0x23f   :  { %v1142_v29 = vpack.c.bf16 %v1342_v28, %v1341_v26  ;;  %v767_v30 = vpop.f32.mrb[47].mxu1 }
 0x240   :  { %v1137_v31 = vpack.c.bf16 %v767_v30, %v764_v27 }
 0x241   :  { %1158 = vst [vmem:[%s1725_s4 + $0x78] sm:$0xff] %v1142_v29  }
 0x242   :  { %1157 = vst [vmem:[%s1725_s4 + $0x70] sm:$0xff] %v1137_v31  }

// kernel: gcn_forward.6
= control target key start
LH: loop header
LB: loop body
LE: loop exit
PB: predicated region body
PF: predicated region fallthrough
CT: control target
= control target key end

     0   :  { %s1666_s1 = inlined_call_operand.vmem [shape: bf16[256,128], index: 1, kind: input, shape index: {}]   ;;  %s1667_s0 = inlined_call_operand.vmem [shape: bf16[256,256], index: 0, kind: input, shape index: {}]   ;;  %s1668_s2 = inlined_call_operand.vmem [shape: f32[1,128], index: 2, kind: input, shape index: {}]   ;;  %s1669_s3 = inlined_call_operand.vmem [shape: bf16[256,128], index: 3, kind: output, shape index: {0}]   ;;  %s1670_s4 = inlined_call_operand.vmem [shape: f32[1,1,128], index: 4, kind: output, shape index: {1}]   ;;  %s1671_s5 = inlined_call_operand.vmem [shape: f32[1,1,128], index: 5, kind: output, shape index: {2}]  }
   0x1   :  { %v1253_v0 = vld [vmem:[%s1666_s1 + $0x40] sm:$0xff]   ;;  %v1255_v2 = vld [vmem:[%s1666_s1 + $0x48] sm:$0xff]   ;;  %v1257_v4 = vld [vmem:[%s1666_s1 + $0x50] sm:$0xff]  }
   0x2   :  { %v1254_v1 = vld [vmem:[%s1666_s1] sm:$0xff]   ;;  %1125 = vmatprep.subr.bf16.mxu0 %v1253_v0  ;;  %1237 = vmatprep.subr.bf16.mxu1 %v1253_v0  ;;  %v1256_v3 = vld [vmem:[%s1666_s1 + $0x8] sm:$0xff]   ;;  %v1258_v5 = vld [vmem:[%s1666_s1 + $0x10] sm:$0xff]  }
   0x3   :  { %1126 = vmatpush3.bf16.msra.mxu0 %v1254_v1  ;;  %1245 = vmatpush3.bf16.msra.mxu1 %v1254_v1  ;;  %v1259_v6 = vld [vmem:[%s1666_s1 + $0x58] sm:$0xff]   ;;  %v1261_v8 = vld [vmem:[%s1666_s1 + $0x60] sm:$0xff]   ;;  %v1263_v10 = vld [vmem:[%s1666_s1 + $0x68] sm:$0xff]  }
   0x4   :  { %1127 = vmatprep.subr.bf16.mxu0 %v1255_v2  ;;  %1238 = vmatprep.subr.bf16.mxu1 %v1255_v2  ;;  %v1260_v7 = vld [vmem:[%s1666_s1 + $0x18] sm:$0xff]   ;;  %v1262_v9 = vld [vmem:[%s1666_s1 + $0x20] sm:$0xff]   ;;  %v1264_v12 = vld [vmem:[%s1666_s1 + $0x28] sm:$0xff]  }
   0x5   :  { %v1271_v11 = vld [vmem:[%s1667_s0 + $0x4] ss:$8 sps:$4 sm:$0xff]   ;;  %v1265_v13 = vld [vmem:[%s1666_s1 + $0x70] sm:$0xff]   ;;  %v1267_v16 = vld [vmem:[%s1666_s1 + $0x78] sm:$0xff]  }
   0x6   :  { %377 = vmatprep.mubr.bf16.mxu0 %v1271_v11  ;;  %v1283_v14 = vld [vmem:[%s1667_s0 + $0x84] ss:$8 sps:$4 sm:$0xff]   ;;  %v1266_v15 = vld [vmem:[%s1666_s1 + $0x30] sm:$0xff]   ;;  %v1268_v17 = vld [vmem:[%s1666_s1 + $0x38] sm:$0xff]  }
   0x7   :  { %1128 = vmatpush3.bf16.msra.mxu0 %v1256_v3  ;;  %1246 = vmatpush3.bf16.msra.mxu1 %v1256_v3  ;;  %v1269_v18 = vld [vmem:[%s1667_s0] ss:$8 sps:$4 sm:$0xff]   ;;  %v1272_v19 = vld [vmem:[%s1667_s0 + $0x14] ss:$8 sps:$4 sm:$0xff]   ;;  %v1274_v22 = vld [vmem:[%s1667_s0 + $0x10] ss:$8 sps:$4 sm:$0xff]  }
   0x8   :  { %1129 = vmatprep.subr.bf16.mxu0 %v1257_v4  ;;  %1239 = vmatprep.subr.bf16.mxu1 %v1257_v4  ;;  %v1281_v20 = vld [vmem:[%s1667_s0 + $0x80] ss:$8 sps:$4 sm:$0xff]   ;;  %v1287_v21 = vld [vmem:[%s1667_s0 + $0x94] ss:$8 sps:$4 sm:$0xff]   ;;  %v1275_v23 = vld [vmem:[%s1667_s0 + $0x24] ss:$8 sps:$4 sm:$0xff]  }
   0x9   :  { %441 = vmatprep.mubr.bf16.mxu1 %v1283_v14  ;;  %v1289_v24 = vld [vmem:[%s1667_s0 + $0x90] ss:$8 sps:$4 sm:$0xff]   ;;  %v1293_v25 = vld [vmem:[%s1667_s0 + $0xa4] ss:$8 sps:$4 sm:$0xff]   ;;  %v1277_v26 = vld [vmem:[%s1667_s0 + $0x20] ss:$8 sps:$4 sm:$0xff]  }
   0xa   :  { %v1278_v27 = vld [vmem:[%s1667_s0 + $0x34] ss:$8 sps:$4 sm:$0xff]   ;;  %v1295_v28 = vld [vmem:[%s1667_s0 + $0xa0] ss:$8 sps:$4 sm:$0xff]   ;;  %v1280_v30 = vld [vmem:[%s1667_s0 + $0x30] ss:$8 sps:$4 sm:$0xff]  }
   0xb   :  { %1130 = vmatpush3.bf16.msra.mxu0 %v1258_v5  ;;  %1247 = vmatpush3.bf16.msra.mxu1 %v1258_v5  ;;  %v1299_v29 = vld [vmem:[%s1667_s0 + $0xb4] ss:$8 sps:$4 sm:$0xff]   ;;  %v1284_v31 = vld [vmem:[%s1667_s0 + $0x44] ss:$8 sps:$4 sm:$0xff]   ;;  %v1301_v32 = vld [vmem:[%s1667_s0 + $0xb0] ss:$8 sps:$4 sm:$0xff]  }
   0xc   :  { %1131 = vmatprep.subr.bf16.mxu0 %v1259_v6  ;;  %1240 = vmatprep.subr.bf16.mxu1 %v1259_v6  ;;  %v1305_v33 = vld [vmem:[%s1667_s0 + $0xc4] ss:$8 sps:$4 sm:$0xff]   ;;  %v1286_v34 = vld [vmem:[%s1667_s0 + $0x40] ss:$8 sps:$4 sm:$0xff]   ;;  %v1290_v35 = vld [vmem:[%s1667_s0 + $0x54] ss:$8 sps:$4 sm:$0xff]  }
   0xd   :  { %v1307_v36 = vld [vmem:[%s1667_s0 + $0xc0] ss:$8 sps:$4 sm:$0xff]   ;;  %v1308_v37 = vld [vmem:[%s1667_s0 + $0xd4] ss:$8 sps:$4 sm:$0xff]   ;;  %v1292_v38 = vld [vmem:[%s1667_s0 + $0x50] ss:$8 sps:$4 sm:$0xff]  }
   0xe   :  { %v1296_v39 = vld [vmem:[%s1667_s0 + $0x64] ss:$8 sps:$4 sm:$0xff]   ;;  %v1310_v40 = vld [vmem:[%s1667_s0 + $0xd0] ss:$8 sps:$4 sm:$0xff]   ;;  %v1298_v42 = vld [vmem:[%s1667_s0 + $0x60] ss:$8 sps:$4 sm:$0xff]  }
   0xf   :  { %1132 = vmatpush3.bf16.msra.mxu0 %v1260_v7  ;;  %1248 = vmatpush3.bf16.msra.mxu1 %v1260_v7  ;;  %v1311_v41 = vld [vmem:[%s1667_s0 + $0xe4] ss:$8 sps:$4 sm:$0xff]   ;;  %v1302_v43 = vld [vmem:[%s1667_s0 + $0x74] ss:$8 sps:$4 sm:$0xff]   ;;  %v1313_v44 = vld [vmem:[%s1667_s0 + $0xe0] ss:$8 sps:$4 sm:$0xff]  }
  0x10   :  { %1133 = vmatprep.subr.bf16.mxu0 %v1261_v8  ;;  %1241 = vmatprep.subr.bf16.mxu1 %v1261_v8  ;;  %v1314_v45 = vld [vmem:[%s1667_s0 + $0xf4] ss:$8 sps:$4 sm:$0xff]   ;;  %v1304_v46 = vld [vmem:[%s1667_s0 + $0x70] ss:$8 sps:$4 sm:$0xff]   ;;  %v1494_v49 = vld [vmem:[%s1668_s2] ss:$0 sm:$0xff] }
  0x11   :  { %v1316_v47 = vld [vmem:[%s1667_s0 + $0xf0] ss:$8 sps:$4 sm:$0xff]  }
  0x13   :  { %1134 = vmatpush3.bf16.msra.mxu0 %v1262_v9  ;;  %1249 = vmatpush3.bf16.msra.mxu1 %v1262_v9 }
  0x14   :  { %1135 = vmatprep.subr.bf16.mxu0 %v1263_v10  ;;  %1242 = vmatprep.subr.bf16.mxu1 %v1263_v10 }
  0x17   :  { %1136 = vmatpush3.bf16.msra.mxu0 %v1264_v12  ;;  %1250 = vmatpush3.bf16.msra.mxu1 %v1264_v12 }
  0x18   :  { %1137 = vmatprep.subr.bf16.mxu0 %v1265_v13  ;;  %1243 = vmatprep.subr.bf16.mxu1 %v1265_v13 }
  0x1b   :  { %1138 = vmatpush3.bf16.msra.mxu0 %v1266_v15  ;;  %1251 = vmatpush3.bf16.msra.mxu1 %v1266_v15 }
  0x1c   :  { %1139 = vmatprep.subr.bf16.mxu0 %v1267_v16  ;;  %1244 = vmatprep.subr.bf16.mxu1 %v1267_v16 }
  0x1f   :  { %1140 = vmatpush3.bf16.msra.mxu0 %v1268_v17  ;;  %1252 = vmatpush3.bf16.msra.mxu1 %v1268_v17 }
  0x22   :  { %378 = vmatmul.mubr.bf16.vlgmr.msra.gmra.mrb[0].mxu0 %v1269_v18  ;;  %442 = vmatmul.mubr.bf16.vlgmr.msra.gmra.mrb[0].mxu1 %v1281_v20 }
  0x23   :  { %385 = vmatprep.mubr.bf16.mxu0 %v1272_v19  ;;  %449 = vmatprep.mubr.bf16.mxu1 %v1287_v21 }
  0x2a   :  { %386 = vmatmul.mubr.bf16.gmra.mrb[4].mxu0 %v1274_v22  ;;  %450 = vmatmul.mubr.bf16.gmra.mrb[4].mxu1 %v1289_v24 }
  0x2b   :  { %393 = vmatprep.mubr.bf16.mxu0 %v1275_v23  ;;  %457 = vmatprep.mubr.bf16.mxu1 %v1293_v25 }
  0x32   :  { %394 = vmatmul.mubr.bf16.gmra.mrb[8].mxu0 %v1277_v26  ;;  %458 = vmatmul.mubr.bf16.gmra.mrb[8].mxu1 %v1295_v28 }
  0x33   :  { %401 = vmatprep.mubr.bf16.mxu0 %v1278_v27  ;;  %465 = vmatprep.mubr.bf16.mxu1 %v1299_v29 }
  0x3a   :  { %402 = vmatmul.mubr.bf16.gmra.mrb[12].mxu0 %v1280_v30  ;;  %466 = vmatmul.mubr.bf16.gmra.mrb[12].mxu1 %v1301_v32 }
  0x3b   :  { %409 = vmatprep.mubr.bf16.mxu0 %v1284_v31  ;;  %473 = vmatprep.mubr.bf16.mxu1 %v1305_v33 }
  0x42   :  { %410 = vmatmul.mubr.bf16.gmra.mrb[16].mxu0 %v1286_v34  ;;  %474 = vmatmul.mubr.bf16.gmra.mrb[16].mxu1 %v1307_v36 }
  0x43   :  { %417 = vmatprep.mubr.bf16.mxu0 %v1290_v35  ;;  %481 = vmatprep.mubr.bf16.mxu1 %v1308_v37 }
  0x4a   :  { %418 = vmatmul.mubr.bf16.gmra.mrb[20].mxu0 %v1292_v38  ;;  %482 = vmatmul.mubr.bf16.gmra.mrb[20].mxu1 %v1310_v40 }
  0x4b   :  { %425 = vmatprep.mubr.bf16.mxu0 %v1296_v39  ;;  %489 = vmatprep.mubr.bf16.mxu1 %v1311_v41 }
  0x52   :  { %426 = vmatmul.mubr.bf16.gmra.mrb[24].mxu0 %v1298_v42  ;;  %490 = vmatmul.mubr.bf16.gmra.mrb[24].mxu1 %v1313_v44 }
  0x53   :  { %433 = vmatprep.mubr.bf16.mxu0 %v1302_v43  ;;  %497 = vmatprep.mubr.bf16.mxu1 %v1314_v45 }
  0x5a   :  { %434 = vmatmul.mubr.bf16.gmra.mrb[28].mxu0 %v1304_v46  ;;  %498 = vmatmul.mubr.bf16.gmra.mrb[28].mxu1 %v1316_v47 }
  0xf5   :  { %v1141_v48 = vpop.f32.mrb[0].mxu0  ;;  %v1189_v51 = vpop.f32.mrb[0].mxu1 }
  0xf6   :  { %v1142_v50 = vpop.f32.mrb[1].mxu0  ;;  %v1190_v54 = vpop.f32.mrb[1].mxu1 }
  0xf7   :  { %v1143_v52 = vadd.f32 %v1142_v50, %v1141_v48  ;;  %v1144_v53 = vpop.f32.mrb[2].mxu0  ;;  %v1191_v56 = vadd.f32 %v1190_v54, %v1189_v51  ;;  %v1192_v57 = vpop.f32.mrb[2].mxu1 }
  0xf8   :  { %v1145_v55 = vpop.f32.mrb[3].mxu0  ;;  %v1193_v60 = vpop.f32.mrb[3].mxu1 }
  0xf9   :  { %v380_v58 = vadd.f32 %v1143_v52, %v1494_v49  ;;  %v1146_v59 = vadd.f32 %v1145_v55, %v1144_v53  ;;  %v1498_v61 = vadd.f32 %v1191_v56, %v1494_v49  ;;  %v1194_v62 = vadd.f32 %v1193_v60, %v1192_v57 }
  0xfb   :  { %v383_v63 = vadd.f32 %v1146_v59, %v1494_v49  ;;  %v1502_v0 = vadd.f32 %v1194_v62, %v1494_v49  ;;  %v835_v1 = vmul.f32 %v380_v58, %v380_v58 }
  0xfd   :  { %v1033_v2 = vpack.c.bf16 %v383_v63, %v380_v58  ;;  %v797_v3 = vadd.f32 %v383_v63, %v380_v58  ;;  %v836_v4 = vmul.f32 %v383_v63, %v383_v63  ;;  %v1147_v5 = vpop.f32.mrb[4].mxu0  ;;  %v1073_v7 = vpack.c.bf16 %v1502_v0, %v1498_v61  ;;  %v1195_v8 = vpop.f32.mrb[4].mxu1 }
  0xfe   :  { %v1148_v6 = vpop.f32.mrb[5].mxu0  ;;  %v1196_v12 = vpop.f32.mrb[5].mxu1 }
  0xff   :  { %1034 = vst [vmem:[%s1669_s3] sm:$0xff] %v1033_v2   ;;  %v867_v9 = vadd.f32 %v836_v4, %v835_v1  ;;  %v1149_v10 = vadd.f32 %v1148_v6, %v1147_v5  ;;  %v1150_v11 = vpop.f32.mrb[6].mxu0  ;;  %1117 = vst [vmem:[%s1669_s3 + $0x40] sm:$0xff] %v1073_v7   ;;  %v1197_v14 = vadd.f32 %v1196_v12, %v1195_v8  ;;  %v1198_v15 = vpop.f32.mrb[6].mxu1 }
 0x100   :  { %v1151_v13 = vpop.f32.mrb[7].mxu0  ;;  %v1199_v18 = vpop.f32.mrb[7].mxu1 }
 0x101   :  { %v388_v16 = vadd.f32 %v1149_v10, %v1494_v49  ;;  %v1152_v17 = vadd.f32 %v1151_v13, %v1150_v11  ;;  %v1514_v19 = vadd.f32 %v1197_v14, %v1494_v49  ;;  %v1200_v20 = vadd.f32 %v1199_v18, %v1198_v15 }
 0x103   :  { %v798_v21 = vadd.f32 %v797_v3, %v388_v16  ;;  %v837_v22 = vmul.f32 %v388_v16, %v388_v16  ;;  %v391_v23 = vadd.f32 %v1152_v17, %v1494_v49  ;;  %v1518_v24 = vadd.f32 %v1200_v20, %v1494_v49 }
 0x105   :  { %v868_v25 = vadd.f32 %v867_v9, %v837_v22  ;;  %v1038_v26 = vpack.c.bf16 %v391_v23, %v388_v16  ;;  %v799_v27 = vadd.f32 %v798_v21, %v391_v23  ;;  %v838_v28 = vmul.f32 %v391_v23, %v391_v23  ;;  %v1153_v29 = vpop.f32.mrb[8].mxu0  ;;  %v1201_v32 = vpop.f32.mrb[8].mxu1 }
 0x106   :  { %v1154_v30 = vpop.f32.mrb[9].mxu0  ;;  %v1078_v31 = vpack.c.bf16 %v1518_v24, %v1514_v19  ;;  %v1202_v36 = vpop.f32.mrb[9].mxu1 }
 0x107   :  { %1110 = vst [vmem:[%s1669_s3 + $0x8] sm:$0xff] %v1038_v26   ;;  %v869_v33 = vadd.f32 %v868_v25, %v838_v28  ;;  %v1155_v34 = vadd.f32 %v1154_v30, %v1153_v29  ;;  %v1156_v35 = vpop.f32.mrb[10].mxu0  ;;  %v1203_v38 = vadd.f32 %v1202_v36, %v1201_v32  ;;  %v1204_v39 = vpop.f32.mrb[10].mxu1 }
 0x108   :  { %v1157_v37 = vpop.f32.mrb[11].mxu0  ;;  %1118 = vst [vmem:[%s1669_s3 + $0x48] sm:$0xff] %v1078_v31   ;;  %v1205_v42 = vpop.f32.mrb[11].mxu1 }
 0x109   :  { %v396_v40 = vadd.f32 %v1155_v34, %v1494_v49  ;;  %v1158_v41 = vadd.f32 %v1157_v37, %v1156_v35  ;;  %v1530_v43 = vadd.f32 %v1203_v38, %v1494_v49  ;;  %v1206_v44 = vadd.f32 %v1205_v42, %v1204_v39 }
 0x10b   :  { %v800_v45 = vadd.f32 %v799_v27, %v396_v40  ;;  %v839_v46 = vmul.f32 %v396_v40, %v396_v40  ;;  %v399_v47 = vadd.f32 %v1158_v41, %v1494_v49  ;;  %v1534_v48 = vadd.f32 %v1206_v44, %v1494_v49 }
 0x10d   :  { %v870_v50 = vadd.f32 %v869_v33, %v839_v46  ;;  %v1043_v51 = vpack.c.bf16 %v399_v47, %v396_v40  ;;  %v801_v52 = vadd.f32 %v800_v45, %v399_v47  ;;  %v840_v53 = vmul.f32 %v399_v47, %v399_v47  ;;  %v1159_v54 = vpop.f32.mrb[12].mxu0  ;;  %v1207_v57 = vpop.f32.mrb[12].mxu1 }
 0x10e   :  { %v1160_v55 = vpop.f32.mrb[13].mxu0  ;;  %v1083_v56 = vpack.c.bf16 %v1534_v48, %v1530_v43  ;;  %v1208_v62 = vpop.f32.mrb[13].mxu1 }
 0x10f   :  { %1111 = vst [vmem:[%s1669_s3 + $0x10] sm:$0xff] %v1043_v51   ;;  %v871_v58 = vadd.f32 %v870_v50, %v840_v53  ;;  %v1161_v59 = vadd.f32 %v1160_v55, %v1159_v54  ;;  %v1162_v60 = vpop.f32.mrb[14].mxu0  ;;  %v1209_v1 = vadd.f32 %v1208_v62, %v1207_v57  ;;  %v1210_v2 = vpop.f32.mrb[14].mxu1 }
 0x110   :  { %v1163_v63 = vpop.f32.mrb[15].mxu0  ;;  %1119 = vst [vmem:[%s1669_s3 + $0x50] sm:$0xff] %v1083_v56   ;;  %v1211_v5 = vpop.f32.mrb[15].mxu1 }
 0x111   :  { %v404_v3 = vadd.f32 %v1161_v59, %v1494_v49  ;;  %v1164_v4 = vadd.f32 %v1163_v63, %v1162_v60  ;;  %v1546_v6 = vadd.f32 %v1209_v1, %v1494_v49  ;;  %v1212_v7 = vadd.f32 %v1211_v5, %v1210_v2 }
 0x113   :  { %v802_v8 = vadd.f32 %v801_v52, %v404_v3  ;;  %v841_v9 = vmul.f32 %v404_v3, %v404_v3  ;;  %v407_v10 = vadd.f32 %v1164_v4, %v1494_v49  ;;  %v1550_v11 = vadd.f32 %v1212_v7, %v1494_v49 }
 0x115   :  { %v872_v12 = vadd.f32 %v871_v58, %v841_v9  ;;  %v1048_v13 = vpack.c.bf16 %v407_v10, %v404_v3  ;;  %v803_v14 = vadd.f32 %v802_v8, %v407_v10  ;;  %v842_v15 = vmul.f32 %v407_v10, %v407_v10  ;;  %v1165_v16 = vpop.f32.mrb[16].mxu0  ;;  %v1213_v20 = vpop.f32.mrb[16].mxu1 }
 0x116   :  { %v1166_v17 = vpop.f32.mrb[17].mxu0  ;;  %v1088_v18 = vpack.c.bf16 %v1550_v11, %v1546_v6  ;;  %v1214_v25 = vpop.f32.mrb[17].mxu1 }
 0x117   :  { %1112 = vst [vmem:[%s1669_s3 + $0x18] sm:$0xff] %v1048_v13   ;;  %v873_v21 = vadd.f32 %v872_v12, %v842_v15  ;;  %v1167_v22 = vadd.f32 %v1166_v17, %v1165_v16  ;;  %v1168_v23 = vpop.f32.mrb[18].mxu0  ;;  %v1215_v27 = vadd.f32 %v1214_v25, %v1213_v20  ;;  %v1216_v28 = vpop.f32.mrb[18].mxu1 }
 0x118   :  { %v1169_v26 = vpop.f32.mrb[19].mxu0  ;;  %1120 = vst [vmem:[%s1669_s3 + $0x58] sm:$0xff] %v1088_v18   ;;  %v1217_v31 = vpop.f32.mrb[19].mxu1 }
 0x119   :  { %v412_v29 = vadd.f32 %v1167_v22, %v1494_v49  ;;  %v1170_v30 = vadd.f32 %v1169_v26, %v1168_v23  ;;  %v1562_v32 = vadd.f32 %v1215_v27, %v1494_v49  ;;  %v1218_v33 = vadd.f32 %v1217_v31, %v1216_v28 }
 0x11b   :  { %v804_v34 = vadd.f32 %v803_v14, %v412_v29  ;;  %v843_v35 = vmul.f32 %v412_v29, %v412_v29  ;;  %v415_v36 = vadd.f32 %v1170_v30, %v1494_v49  ;;  %v1566_v37 = vadd.f32 %v1218_v33, %v1494_v49 }
 0x11d   :  { %v874_v38 = vadd.f32 %v873_v21, %v843_v35  ;;  %v1053_v39 = vpack.c.bf16 %v415_v36, %v412_v29  ;;  %v805_v40 = vadd.f32 %v804_v34, %v415_v36  ;;  %v844_v41 = vmul.f32 %v415_v36, %v415_v36  ;;  %v1171_v42 = vpop.f32.mrb[20].mxu0  ;;  %v1219_v46 = vpop.f32.mrb[20].mxu1 }
 0x11e   :  { %v1172_v44 = vpop.f32.mrb[21].mxu0  ;;  %v1093_v45 = vpack.c.bf16 %v1566_v37, %v1562_v32  ;;  %v1220_v52 = vpop.f32.mrb[21].mxu1 }
 0x11f   :  { %1113 = vst [vmem:[%s1669_s3 + $0x20] sm:$0xff] %v1053_v39   ;;  %v875_v47 = vadd.f32 %v874_v38, %v844_v41  ;;  %v1173_v50 = vadd.f32 %v1172_v44, %v1171_v42  ;;  %v1174_v51 = vpop.f32.mrb[22].mxu0  ;;  %v1221_v54 = vadd.f32 %v1220_v52, %v1219_v46  ;;  %v1222_v55 = vpop.f32.mrb[22].mxu1 }
 0x120   :  { %v1175_v53 = vpop.f32.mrb[23].mxu0  ;;  %1121 = vst [vmem:[%s1669_s3 + $0x60] sm:$0xff] %v1093_v45   ;;  %v1223_v58 = vpop.f32.mrb[23].mxu1 }
 0x121   :  { %v420_v56 = vadd.f32 %v1173_v50, %v1494_v49  ;;  %v1176_v57 = vadd.f32 %v1175_v53, %v1174_v51  ;;  %v1578_v59 = vadd.f32 %v1221_v54, %v1494_v49  ;;  %v1224_v60 = vadd.f32 %v1223_v58, %v1222_v55 }
 0x123   :  { %v806_v62 = vadd.f32 %v805_v40, %v420_v56  ;;  %v845_v63 = vmul.f32 %v420_v56, %v420_v56  ;;  %v423_v1 = vadd.f32 %v1176_v57, %v1494_v49  ;;  %v1582_v2 = vadd.f32 %v1224_v60, %v1494_v49 }
 0x125   :  { %v876_v3 = vadd.f32 %v875_v47, %v845_v63  ;;  %v1058_v4 = vpack.c.bf16 %v423_v1, %v420_v56  ;;  %v807_v5 = vadd.f32 %v806_v62, %v423_v1  ;;  %v846_v7 = vmul.f32 %v423_v1, %v423_v1  ;;  %v1177_v8 = vpop.f32.mrb[24].mxu0  ;;  %v1225_v12 = vpop.f32.mrb[24].mxu1 }
 0x126   :  { %v1178_v9 = vpop.f32.mrb[25].mxu0  ;;  %v1098_v10 = vpack.c.bf16 %v1582_v2, %v1578_v59  ;;  %v1226_v16 = vpop.f32.mrb[25].mxu1 }
 0x127   :  { %1114 = vst [vmem:[%s1669_s3 + $0x28] sm:$0xff] %v1058_v4   ;;  %v877_v13 = vadd.f32 %v876_v3, %v846_v7  ;;  %v1179_v14 = vadd.f32 %v1178_v9, %v1177_v8  ;;  %v1180_v15 = vpop.f32.mrb[26].mxu0  ;;  %v1227_v18 = vadd.f32 %v1226_v16, %v1225_v12  ;;  %v1228_v20 = vpop.f32.mrb[26].mxu1  ;;  %v853_v12 = vmul.f32 %v1514_v19, %v1514_v19 }
 0x128   :  { %v1181_v17 = vpop.f32.mrb[27].mxu0  ;;  %1122 = vst [vmem:[%s1669_s3 + $0x68] sm:$0xff] %v1098_v10   ;;  %v1229_v23 = vpop.f32.mrb[27].mxu1 }
 0x129   :  { %v428_v21 = vadd.f32 %v1179_v14, %v1494_v49  ;;  %v1182_v22 = vadd.f32 %v1181_v17, %v1180_v15  ;;  %v1594_v25 = vadd.f32 %v1227_v18, %v1494_v49  ;;  %v1230_v26 = vadd.f32 %v1229_v23, %v1228_v20 }
 0x12a   :  { %v855_v17 = vmul.f32 %v1530_v43, %v1530_v43 }
 0x12b   :  { %v808_v27 = vadd.f32 %v807_v5, %v428_v21  ;;  %v847_v28 = vmul.f32 %v428_v21, %v428_v21  ;;  %v431_v29 = vadd.f32 %v1182_v22, %v1494_v49  ;;  %v1598_v30 = vadd.f32 %v1230_v26, %v1494_v49 }
 0x12c   :  { %v851_v5 = vmul.f32 %v1498_v61, %v1498_v61 }
 0x12d   :  { %v878_v31 = vadd.f32 %v877_v13, %v847_v28  ;;  %v1063_v33 = vpack.c.bf16 %v431_v29, %v428_v21  ;;  %v809_v34 = vadd.f32 %v808_v27, %v431_v29  ;;  %v848_v35 = vmul.f32 %v431_v29, %v431_v29  ;;  %v1183_v36 = vpop.f32.mrb[28].mxu0  ;;  %v1231_v40 = vpop.f32.mrb[28].mxu1 }
 0x12e   :  { %v1184_v38 = vpop.f32.mrb[29].mxu0  ;;  %v1103_v39 = vpack.c.bf16 %v1598_v30, %v1594_v25  ;;  %v1232_v45 = vpop.f32.mrb[29].mxu1  ;;  %v859_v29 = vmul.f32 %v1562_v32, %v1562_v32 }
 0x12f   :  { %1115 = vst [vmem:[%s1669_s3 + $0x30] sm:$0xff] %v1063_v33   ;;  %v879_v41 = vadd.f32 %v878_v31, %v848_v35  ;;  %v1185_v42 = vadd.f32 %v1184_v38, %v1183_v36  ;;  %v1186_v44 = vpop.f32.mrb[30].mxu0  ;;  %v1233_v47 = vadd.f32 %v1232_v45, %v1231_v40  ;;  %v1234_v50 = vpop.f32.mrb[30].mxu1  ;;  %v861_v36 = vmul.f32 %v1578_v59, %v1578_v59 }
 0x130   :  { %v1187_v46 = vpop.f32.mrb[31].mxu0  ;;  %1123 = vst [vmem:[%s1669_s3 + $0x70] sm:$0xff] %v1103_v39   ;;  %v1235_v53 = vpop.f32.mrb[31].mxu1  ;;  %v862_v39 = vmul.f32 %v1582_v2, %v1582_v2 }
 0x131   :  { %v436_v51 = vadd.f32 %v1185_v42, %v1494_v49  ;;  %v1188_v52 = vadd.f32 %v1187_v46, %v1186_v44  ;;  %v500_v54 = vadd.f32 %v1233_v47, %v1494_v49  ;;  %v1236_v55 = vadd.f32 %v1235_v53, %v1234_v50 }
 0x132   :  { %v864_v44 = vmul.f32 %v1598_v30, %v1598_v30 }
 0x133   :  { %v810_v56 = vadd.f32 %v809_v34, %v436_v51  ;;  %v849_v57 = vmul.f32 %v436_v51, %v436_v51  ;;  %v439_v58 = vadd.f32 %v1188_v52, %v1494_v49  ;;  %v503_v60 = vadd.f32 %v1236_v55, %v1494_v49 }
 0x134   :  { %v852_v49 = vmul.f32 %v1502_v0, %v1502_v0  ;;  %v860_v34 = vmul.f32 %v1566_v37, %v1566_v37  ;;  %v865_v45 = vmul.f32 %v500_v54, %v500_v54 }
 0x135   :  { %v880_v62 = vadd.f32 %v879_v41, %v849_v57  ;;  %v1068_v63 = vpack.c.bf16 %v439_v58, %v436_v51  ;;  %v811_v1 = vadd.f32 %v810_v56, %v439_v58  ;;  %v850_v3 = vmul.f32 %v439_v58, %v439_v58 }
 0x136   :  { %v1108_v4 = vpack.c.bf16 %v503_v60, %v500_v54  ;;  %v863_v41 = vmul.f32 %v1594_v25, %v1594_v25  ;;  %v866_v51 = vmul.f32 %v503_v60, %v503_v60 }
 0x137   :  { %1116 = vst [vmem:[%s1669_s3 + $0x38] sm:$0xff] %v1068_v63   ;;  %v812_v7 = vadd.f32 %v811_v1, %v1498_v61  ;;  %v881_v8 = vadd.f32 %v880_v62, %v850_v3  ;;  %v854_v61 = vmul.f32 %v1518_v24, %v1518_v24 }
 0x138   :  { %1124 = vst [vmem:[%s1669_s3 + $0x78] sm:$0xff] %v1108_v4  }
 0x139   :  { %v813_v9 = vadd.f32 %v812_v7, %v1502_v0  ;;  %v882_v10 = vadd.f32 %v881_v8, %v851_v5  ;;  %v856_v0 = vmul.f32 %v1534_v48, %v1534_v48 }
 0x13b   :  { %v814_v13 = vadd.f32 %v813_v9, %v1514_v19  ;;  %v883_v14 = vadd.f32 %v882_v10, %v852_v49  ;;  %v857_v19 = vmul.f32 %v1546_v6, %v1546_v6 }
 0x13d   :  { %v815_v15 = vadd.f32 %v814_v13, %v1518_v24  ;;  %v884_v16 = vadd.f32 %v883_v14, %v853_v12  ;;  %v858_v24 = vmul.f32 %v1550_v11, %v1550_v11 }
 0x13f   :  { %v885_v18 = vadd.f32 %v884_v16, %v854_v61  ;;  %v816_v20 = vadd.f32 %v815_v15, %v1530_v43 }
 0x141   :  { %v817_v21 = vadd.f32 %v816_v20, %v1534_v48  ;;  %v886_v22 = vadd.f32 %v885_v18, %v855_v17 }
 0x143   :  { %v818_v23 = vadd.f32 %v817_v21, %v1546_v6  ;;  %v887_v26 = vadd.f32 %v886_v22, %v856_v0 }
 0x145   :  { %v819_v27 = vadd.f32 %v818_v23, %v1550_v11  ;;  %v888_v28 = vadd.f32 %v887_v26, %v857_v19 }
 0x147   :  { %v820_v43 = vadd.f32 %v819_v27, %v1562_v32  ;;  %v889_v31 = vadd.f32 %v888_v28, %v858_v24 }
 0x149   :  { %v890_v48 = vadd.f32 %v889_v31, %v859_v29  ;;  %v821_v33 = vadd.f32 %v820_v43, %v1566_v37 }
 0x14b   :  { %v891_v6 = vadd.f32 %v890_v48, %v860_v34  ;;  %v822_v35 = vadd.f32 %v821_v33, %v1578_v59 }
 0x14d   :  { %v892_v11 = vadd.f32 %v891_v6, %v861_v36  ;;  %v823_v38 = vadd.f32 %v822_v35, %v1582_v2 }
 0x14f   :  { %v893_v32 = vadd.f32 %v892_v11, %v862_v39  ;;  %v824_v40 = vadd.f32 %v823_v38, %v1594_v25 }
 0x151   :  { %v894_v42 = vadd.f32 %v893_v32, %v863_v41  ;;  %v825_v37 = vadd.f32 %v824_v40, %v1598_v30 }
 0x153   :  { %v895_v59 = vadd.f32 %v894_v42, %v864_v44  ;;  %v826_v46 = vadd.f32 %v825_v37, %v500_v54 }
 0x155   :  { %v896_v47 = vadd.f32 %v895_v59, %v865_v45  ;;  %v827_v50 = vadd.f32 %v826_v46, %v503_v60 }
 0x157   :  { %v828_v52 = vrot.slane %v827_v50, 4  ;;  %v897_v2 = vadd.f32 %v896_v47, %v866_v51 }
 0x159   :  { %v829_v53 = vadd.f32 %v828_v52, %v827_v50  ;;  %v898_v55 = vrot.slane %v897_v2, 4 }
 0x15b   :  { %v830_v56 = vrot.slane %v829_v53, 2  ;;  %v899_v57 = vadd.f32 %v898_v55, %v897_v2 }
 0x15d   :  { %v831_v58 = vadd.f32 %v830_v56, %v829_v53  ;;  %v900_v25 = vrot.slane %v899_v57, 2 }
 0x15f   :  { %v832_v62 = vrot.slane %v831_v58, 1  ;;  %v901_v63 = vadd.f32 %v900_v25, %v899_v57 }
 0x161   :  { %v833_v1 = vadd.f32 %v832_v62, %v831_v58  ;;  %v902_v3 = vrot.slane %v901_v63, 1 }
 0x163   :  { %834 = vst [vmem:[%s1670_s4] sm:$0x1] %v833_v1  ;;  %v903_v30 = vadd.f32 %v902_v3, %v901_v63 }
 0x165   :  { %904 = vst [vmem:[%s1671_s5] sm:$0x1] %v903_v30 }

// kernel: gcn_forward.7
= control target key start
LH: loop header
LB: loop body
LE: loop exit
PB: predicated region body
PF: predicated region fallthrough
CT: control target
= control target key end

     0   :  { %v2039_v0 = vmov 0   ;;  %s2853_s1 = inlined_call_operand.vmem [shape: f32[256,1], index: 1, kind: input, shape index: {}]   ;;  %s2854_s9 = inlined_call_operand.vmem [shape: bf16[128,128], index: 9, kind: input, shape index: {}]   ;;  %s2855_s0 = inlined_call_operand.vmem [shape: bf16[256,128], index: 0, kind: input, shape index: {}]   ;;  %s2856_s3 = inlined_call_operand.vmem [shape: f32[1,128], index: 3, kind: input, shape index: {}]   ;;  %s2857_s4 = inlined_call_operand.vmem [shape: f32[1,128], index: 4, kind: input, shape index: {}]   ;;  %s2858_s10 = inlined_call_operand.vmem [shape: bf16[128,128], index: 10, kind: input, shape index: {}]   ;;  %s2859_s11 = inlined_call_operand.vmem [shape: bf16[128,128], index: 11, kind: input, shape index: {}]   ;;  %s2860_s2 = inlined_call_operand.vmem [shape: bf16[256,128], index: 2, kind: input, shape index: {}]   ;;  %s2861_s7 = inlined_call_operand.vmem [shape: f32[1,128], index: 7, kind: input, shape index: {}]   ;;  %s2862_s8 = inlined_call_operand.vmem [shape: f32[1,128], index: 8, kind: input, shape index: {}]   ;;  %s2863_s5 = inlined_call_operand.vmem [shape: f32[1,128], index: 5, kind: input, shape index: {}]   ;;  %s2864_s6 = inlined_call_operand.vmem [shape: f32[1,128], index: 6, kind: input, shape index: {}]   ;;  %s2865_s12 = inlined_call_operand.vmem [shape: f32[1,128], index: 12, kind: input, shape index: {}]   ;;  %s2866_s13 = inlined_call_operand.vmem [shape: f32[256,128], index: 13, kind: output, shape index: {}]  }
   0x1   :  { %2012 = vset.pattern.permute.xlu1 %v2039_v0  ;;  %2011 = vset.pattern.permute.xlu0 %v2039_v0  ;;  %v237_v1 = vld [vmem:[%s2853_s1 + $0x10] sm:$0xff]  ;;  %v235_v2 = vld [vmem:[%s2853_s1] sm:$0xff]  ;;  %v238_v3 = vld [vmem:[%s2853_s1 + $0x18] sm:$0xff] }
   0x2   :  { %280 = vperm.xlu1 %2012, %v237_v1   ;;  %270 = vperm.xlu0 %2011, %v235_v2   ;;  %v236_v4 = vld [vmem:[%s2853_s1 + $0x8] sm:$0xff]  ;;  %v239_v6 = vld [vmem:[%s2853_s1 + $0x20] sm:$0xff]  ;;  %v242_v7 = vld [vmem:[%s2853_s1 + $0x38] sm:$0xff] }
   0x3   :  { %v240_v5 = vld [vmem:[%s2853_s1 + $0x28] sm:$0xff]  ;;  %v241_v8 = vld [vmem:[%s2853_s1 + $0x30] sm:$0xff]  ;;  %v2137_v9 = vld [vmem:[%s2854_s9] sm:$0xff]  }
   0x4   :  { %v2142_v10 = vld [vmem:[%s2854_s9 + $0x8] sm:$0xff]   ;;  %v243_v12 = vld [vmem:[%s2853_s1 + $0x40] sm:$0xff]  ;;  %1834 = vmatprep.subr.bf16.mxu0 %v2137_v9  ;;  %v2156_v13 = vld [vmem:[%s2854_s9 + $0x10] sm:$0xff]  }
   0x5   :  { %v244_v11 = vld [vmem:[%s2853_s1 + $0x48] sm:$0xff]  ;;  %1835 = vmatpush3.bf16.msra.mxu0 %v2137_v9  ;;  %v246_v14 = vld [vmem:[%s2853_s1 + $0x58] sm:$0xff]  ;;  %v245_v15 = vld [vmem:[%s2853_s1 + $0x50] sm:$0xff] }
   0x6   :  { %285 = vperm.xlu1 %2012, %v238_v3   ;;  %275 = vperm.xlu0 %2011, %v236_v4   ;;  %v1557_v16 = vld [vmem:[%s2855_s0] sm:$0xff]   ;;  %v2171_v17 = vld [vmem:[%s2854_s9 + $0x18] sm:$0xff]   ;;  %v248_v21 = vld [vmem:[%s2853_s1 + $0x68] sm:$0xff] }
   0x7   :  { %1836 = vmatprep.subr.bf16.mxu0 %v2142_v10  ;;  %v1558_v18 = vunpack.c.l.bf16 %v1557_v16  ;;  %v1559_v19 = vunpack.c.h.bf16 %v1557_v16  ;;  %v2176_v20 = vld [vmem:[%s2856_s3] ss:$0 sm:$0xff]  ;;  %v1684_v27 = vld [vmem:[%s2855_s0 + $0x8] sm:$0xff]   ;;  %v1685_v32 = vld [vmem:[%s2855_s0 + $0x10] sm:$0xff]  }
   0x8   :  { %v247_v22 = vld [vmem:[%s2853_s1 + $0x60] sm:$0xff]  ;;  %v2024_v30 = vld [vmem:[%s2858_s10 + $0x8] sm:$0xff]   ;;  %v250_v33 = vld [vmem:[%s2853_s1 + $0x78] sm:$0xff]  ;;  %v1562_v37 = vunpack.c.l.bf16 %v1684_v27  ;;  %v1563_v38 = vunpack.c.h.bf16 %v1684_v27  ;;  %v1566_v41 = vunpack.c.l.bf16 %v1685_v32  ;;  %v1567_v42 = vunpack.c.h.bf16 %v1685_v32 }
   0x9   :  { %1837 = vmatpush3.bf16.msra.mxu0 %v2142_v10  ;;  %v2188_v23 = vld [vmem:[%s2857_s4] ss:$0 sm:$0xff]  ;;  %v116_v24 = vmul.f32 %v1558_v18, %v2176_v20  ;;  %v117_v25 = vmul.f32 %v1559_v19, %v2176_v20  ;;  %v249_v34 = vld [vmem:[%s2853_s1 + $0x70] sm:$0xff]  ;;  %v252_v43 = vld [vmem:[%s2853_s1 + $0x88] sm:$0xff] }
   0xa   :  { %295 = vperm.xlu1 %2012, %v240_v5   ;;  %290 = vperm.xlu0 %2011, %v239_v6   ;;  %v2022_v26 = vld [vmem:[%s2858_s10] sm:$0xff]   ;;  %v2026_v39 = vld [vmem:[%s2858_s10 + $0x10] sm:$0xff]   ;;  %v2230_v44 = vld [vmem:[%s2854_s9 + $0x28] sm:$0xff]   ;;  %v118_v46 = vmul.f32 %v1562_v37, %v2176_v20  ;;  %v119_v47 = vmul.f32 %v1563_v38, %v2176_v20  ;;  %v120_v50 = vmul.f32 %v1566_v41, %v2176_v20 }
   0xb   :  { %1838 = vmatprep.subr.bf16.mxu0 %v2156_v13  ;;  %v155_v28 = vadd.f32 %v2188_v23, %v116_v24  ;;  %v156_v29 = vadd.f32 %v2188_v23, %v117_v25  ;;  %1786 = vmatprep.subr.bf16.mxu1 %v2022_v26  ;;  %v2208_v31 = vld [vmem:[%s2854_s9 + $0x20] sm:$0xff]   ;;  %v1686_v48 = vld [vmem:[%s2855_s0 + $0x18] sm:$0xff]   ;;  %v121_v51 = vmul.f32 %v1567_v42, %v2176_v20  ;;  %v2253_v53 = vld [vmem:[%s2854_s9 + $0x30] sm:$0xff]  }
   0xc   :  { %1787 = vmatpush3.bf16.msra.mxu1 %v2022_v26  ;;  %v251_v45 = vld [vmem:[%s2853_s1 + $0x80] sm:$0xff]  ;;  %v2028_v49 = vld [vmem:[%s2858_s10 + $0x18] sm:$0xff]   ;;  %v157_v55 = vadd.f32 %v2188_v23, %v118_v46  ;;  %v158_v56 = vadd.f32 %v2188_v23, %v119_v47  ;;  %v1570_v57 = vunpack.c.l.bf16 %v1686_v48  ;;  %v1571_v58 = vunpack.c.h.bf16 %v1686_v48  ;;  %v253_v59 = vld [vmem:[%s2853_s1 + $0x90] sm:$0xff] }
   0xd   :  { %1839 = vmatpush3.bf16.msra.mxu0 %v2156_v13  ;;  %v187_v35 = vmax.f32 %v155_v28, 0.0  ;;  %v188_v36 = vmax.f32 %v156_v29, 0.0  ;;  %1788 = vmatprep.subr.bf16.mxu1 %v2024_v30  ;;  %v1687_v52 = vld [vmem:[%s2855_s0 + $0x20] sm:$0xff]   ;;  %v254_v54 = vld [vmem:[%s2853_s1 + $0x98] sm:$0xff]  ;;  %v159_v63 = vadd.f32 %v2188_v23, %v120_v50  ;;  %v160_v0 = vadd.f32 %v2188_v23, %v121_v51  ;;  %v256_v1 = vld [vmem:[%s2853_s1 + $0xa8] sm:$0xff] }
   0xe   :  { %305 = vperm.xlu1 %2012, %v242_v7   ;;  %300 = vperm.xlu0 %2011, %v241_v8   ;;  %v1574_v60 = vunpack.c.l.bf16 %v1687_v52  ;;  %v1575_v61 = vunpack.c.h.bf16 %v1687_v52  ;;  %v2030_v62 = vld [vmem:[%s2858_s10 + $0x20] sm:$0xff]   ;;  %v2279_v3 = vld [vmem:[%s2854_s9 + $0x38] sm:$0xff]   ;;  %v189_v4 = vmax.f32 %v157_v55, 0.0  ;;  %v190_v5 = vmax.f32 %v158_v56, 0.0  ;;  %v1688_v16 = vld [vmem:[%s2855_s0 + $0x28] sm:$0xff]  }
   0xf   :  { %1840 = vmatprep.subr.bf16.mxu0 %v2171_v17  ;;  %v219_v40 = vpack.c.bf16 %v188_v36, %v187_v35  ;;  %v255_v2 = vld [vmem:[%s2853_s1 + $0xa0] sm:$0xff]  ;;  %v122_v6 = vmul.f32 %v1570_v57, %v2176_v20  ;;  %v123_v7 = vmul.f32 %v1571_v58, %v2176_v20  ;;  %v1689_v19 = vld [vmem:[%s2855_s0 + $0x30] sm:$0xff]   ;;  %v258_v25 = vld [vmem:[%s2853_s1 + $0xb8] sm:$0xff]  ;;  %v1578_v29 = vunpack.c.l.bf16 %v1688_v16 }
  0x10   :  { %1789 = vmatpush3.bf16.msra.mxu1 %v2024_v30  ;;  %v124_v8 = vmul.f32 %v1574_v60, %v2176_v20  ;;  %v2021_v18 = vld [vmem:[%s2859_s11] sm:$0xff]   ;;  %v257_v26 = vld [vmem:[%s2853_s1 + $0xb0] sm:$0xff]  ;;  %v1579_v30 = vunpack.c.h.bf16 %v1688_v16  ;;  %v1583_v35 = vunpack.c.h.bf16 %v1689_v19  ;;  %v2023_v36 = vld [vmem:[%s2859_s11 + $0x8] sm:$0xff]  }
  0x11   :  { %1841 = vmatpush3.bf16.msra.mxu0 %v2171_v17  ;;  %1850 = vmatprep.mubr.bf16.mxu0 %v219_v40  ;;  %v162_v24 = vadd.f32 %v2188_v23, %v123_v7  ;;  %v2034_v32 = vld [vmem:[%s2858_s10 + $0x30] sm:$0xff]   ;;  %v260_v37 = vld [vmem:[%s2853_s1 + $0xc8] sm:$0xff]  ;;  %v259_v40 = vld [vmem:[%s2853_s1 + $0xc0] sm:$0xff] }
  0x12   :  { %315 = vperm.xlu1 %2012, %v244_v11   ;;  %310 = vperm.xlu0 %2011, %v243_v12   ;;  %v125_v11 = vmul.f32 %v1575_v61, %v2176_v20  ;;  %v2032_v12 = vld [vmem:[%s2858_s10 + $0x28] sm:$0xff]   ;;  %v163_v27 = vadd.f32 %v2188_v23, %v124_v8  ;;  %v1690_v46 = vld [vmem:[%s2855_s0 + $0x38] sm:$0xff]   ;;  %v2025_v50 = vld [vmem:[%s2859_s11 + $0x10] sm:$0xff]  }
  0x13   :  { %1842 = vmatprep.subr.bf16.mxu0 %v2208_v31  ;;  %1790 = vmatprep.subr.bf16.mxu1 %v2026_v39  ;;  %v2036_v47 = vld [vmem:[%s2858_s10 + $0x38] sm:$0xff]   ;;  %v1621_v51 = vld [vmem:[%s2860_s2] sm:$0xff]   ;;  %v1586_v52 = vunpack.c.l.bf16 %v1690_v46  ;;  %v261_v56 = vld [vmem:[%s2853_s1 + $0xd0] sm:$0xff] }
  0x14   :  { %1791 = vmatpush3.bf16.msra.mxu1 %v2026_v39  ;;  %v164_v28 = vadd.f32 %v2188_v23, %v125_v11  ;;  %v194_v39 = vmax.f32 %v162_v24, 0.0  ;;  %v195_v41 = vmax.f32 %v163_v27, 0.0  ;;  %v262_v55 = vld [vmem:[%s2853_s1 + $0xd8] sm:$0xff]  ;;  %v263_v7 = vld [vmem:[%s2853_s1 + $0xe0] sm:$0xff]  ;;  %v265_v27 = vld [vmem:[%s2853_s1 + $0xf0] sm:$0xff] }
  0x15   :  { %1843 = vmatpush3.bf16.msra.mxu0 %v2208_v31  ;;  %1792 = vmatprep.subr.bf16.mxu1 %v2028_v49 }
  0x16   :  { %325 = vperm.xlu1 %2012, %v246_v14   ;;  %320 = vperm.xlu0 %2011, %v245_v15   ;;  %v191_v14 = vmax.f32 %v159_v63, 0.0  ;;  %v192_v15 = vmax.f32 %v160_v0, 0.0  ;;  %v196_v42 = vmax.f32 %v164_v28, 0.0  ;;  %v1622_v63 = vunpack.c.l.bf16 %v1621_v51 }
  0x17   :  { %1844 = vmatprep.subr.bf16.mxu0 %v2230_v44  ;;  %v1623_v0 = vunpack.c.h.bf16 %v1621_v51 }
  0x18   :  { %1793 = vmatpush3.bf16.msra.mxu1 %v2028_v49  ;;  %v129_v49 = vmul.f32 %v1583_v35, %v2176_v20  ;;  %v223_v58 = vpack.c.bf16 %v196_v42, %v195_v41 }
  0x19   :  { %1845 = vmatpush3.bf16.msra.mxu0 %v2230_v44  ;;  %1794 = vmatprep.subr.bf16.mxu1 %v2030_v62 }
  0x1a   :  { %335 = vperm.xlu1 %2012, %v248_v21   ;;  %330 = vperm.xlu0 %2011, %v247_v22   ;;  %v220_v21 = vpack.c.bf16 %v190_v5, %v189_v4  ;;  %v161_v22 = vadd.f32 %v2188_v23, %v122_v6  ;;  %v130_v4 = vmul.f32 %v1586_v52, %v2176_v20  ;;  %v264_v6 = vld [vmem:[%s2853_s1 + $0xe8] sm:$0xff] }
  0x1b   :  { %1846 = vmatprep.subr.bf16.mxu0 %v2253_v53 }
  0x1c   :  { %1795 = vmatpush3.bf16.msra.mxu1 %v2030_v62  ;;  %v193_v38 = vmax.f32 %v161_v22, 0.0  ;;  %v168_v62 = vadd.f32 %v2188_v23, %v129_v49  ;;  %v169_v22 = vadd.f32 %v2188_v23, %v130_v4 }
  0x1d   :  { %1847 = vmatpush3.bf16.msra.mxu0 %v2253_v53  ;;  %1796 = vmatprep.subr.bf16.mxu1 %v2032_v12 }
  0x1e   :  { %345 = vperm.xlu1 %2012, %v250_v33   ;;  %340 = vperm.xlu0 %2011, %v249_v34   ;;  %v221_v33 = vpack.c.bf16 %v192_v15, %v191_v14  ;;  %v1582_v34 = vunpack.c.l.bf16 %v1689_v19  ;;  %v222_v57 = vpack.c.bf16 %v194_v39, %v193_v38  ;;  %v200_v14 = vmax.f32 %v168_v62, 0.0  ;;  %v2029_v19 = vld [vmem:[%s2859_s11 + $0x20] sm:$0xff]  }
  0x1f   :  { %1848 = vmatprep.subr.bf16.mxu0 %v2279_v3 }
  0x20   :  { %1797 = vmatpush3.bf16.msra.mxu1 %v2032_v12  ;;  %v128_v48 = vmul.f32 %v1582_v34, %v2176_v20  ;;  %v1699_v12 = vld [vmem:[%s2860_s2 + $0x8] sm:$0xff]  }
  0x21   :  { %1849 = vmatpush3.bf16.msra.mxu0 %v2279_v3  ;;  %1798 = vmatprep.subr.bf16.mxu1 %v2034_v32 }
  0x22   :  { %355 = vperm.xlu1 %2012, %v252_v43   ;;  %350 = vperm.xlu0 %2011, %v251_v45   ;;  %v126_v43 = vmul.f32 %v1578_v29, %v2176_v20  ;;  %v127_v45 = vmul.f32 %v1579_v30, %v2176_v20  ;;  %v167_v61 = vadd.f32 %v2188_v23, %v128_v48  ;;  %v1627_v29 = vunpack.c.h.bf16 %v1699_v12 }
  0x23   :  { %1882 = vmatprep.subr.bf16.mxu0 %v2021_v18 }
  0x24   :  { %1851 = vmatmul.mubr.bf16.vlgmr.msra.gmra.mrb[0].mxu0 %v220_v21  ;;  %1799 = vmatpush3.bf16.msra.mxu1 %v2034_v32  ;;  %v166_v60 = vadd.f32 %v2188_v23, %v127_v45  ;;  %v2379_v21 = vld [vmem:[%s2862_s8] ss:$0 sm:$0xff]  ;;  %v1701_v45 = vld [vmem:[%s2860_s2 + $0x18] sm:$0xff]  }
  0x25   :  { %1883 = vmatpush3.bf16.msra.mxu0 %v2021_v18  ;;  %1854 = vmatprep.mubr.bf16.mxu0 %v221_v33  ;;  %v1700_v18 = vld [vmem:[%s2860_s2 + $0x10] sm:$0xff]   ;;  %v1634_v52 = vunpack.c.l.bf16 %v1701_v45 }
  0x26   :  { %365 = vperm.xlu1 %2012, %v254_v54   ;;  %360 = vperm.xlu0 %2011, %v253_v59   ;;  %v1587_v54 = vunpack.c.h.bf16 %v1690_v46  ;;  %v165_v59 = vadd.f32 %v2188_v23, %v126_v43  ;;  %v198_v11 = vmax.f32 %v166_v60, 0.0  ;;  %v1630_v30 = vunpack.c.l.bf16 %v1700_v18  ;;  %v2033_v46 = vld [vmem:[%s2859_s11 + $0x30] sm:$0xff]  }
  0x27   :  { %1884 = vmatprep.subr.bf16.mxu0 %v2023_v36  ;;  %1800 = vmatprep.subr.bf16.mxu1 %v2036_v47  ;;  %v1631_v35 = vunpack.c.h.bf16 %v1700_v18 }
  0x28   :  { %1801 = vmatpush3.bf16.msra.mxu1 %v2036_v47  ;;  %v131_v5 = vmul.f32 %v1587_v54, %v2176_v20  ;;  %v197_v8 = vmax.f32 %v165_v59, 0.0  ;;  %v199_v20 = vmax.f32 %v167_v61, 0.0  ;;  %v1702_v47 = vld [vmem:[%s2860_s2 + $0x20] sm:$0xff]   ;;  %v1635_v54 = vunpack.c.h.bf16 %v1701_v45  ;;  %v2035_v59 = vld [vmem:[%s2859_s11 + $0x38] sm:$0xff]  }
  0x29   :  { %1885 = vmatpush3.bf16.msra.mxu0 %v2023_v36  ;;  %1930 = vmatprep.subr.bf16.mxu1 %v2137_v9  ;;  %v201_v36 = vmax.f32 %v169_v22, 0.0 }
  0x2a   :  { %375 = vperm.xlu1 %2012, %v256_v1   ;;  %370 = vperm.xlu0 %2011, %v255_v2   ;;  %v2027_v1 = vld [vmem:[%s2859_s11 + $0x18] sm:$0xff]   ;;  %v2354_v2 = vld [vmem:[%s2861_s7] ss:$0 sm:$0xff]  ;;  %v170_v24 = vadd.f32 %v2188_v23, %v131_v5  ;;  %v224_v28 = vpack.c.bf16 %v198_v11, %v197_v8  ;;  %v225_v32 = vpack.c.bf16 %v200_v14, %v199_v20  ;;  %v2031_v23 = vld [vmem:[%s2859_s11 + $0x28] sm:$0xff]  }
  0x2b   :  { %1886 = vmatprep.subr.bf16.mxu0 %v2025_v50  ;;  %v624_v15 = vmul.f32 %v1622_v63, %v2354_v2  ;;  %v625_v16 = vmul.f32 %v1623_v0, %v2354_v2  ;;  %v627_v39 = vmul.f32 %v1627_v29, %v2354_v2  ;;  %v629_v43 = vmul.f32 %v1631_v35, %v2354_v2  ;;  %v1703_v0 = vld [vmem:[%s2860_s2 + $0x28] sm:$0xff]   ;;  %v1705_v29 = vld [vmem:[%s2860_s2 + $0x38] sm:$0xff]  }
  0x2c   :  { %1855 = vmatmul.mubr.bf16.gmra.mrb[4].mxu0 %v222_v57  ;;  %v1638_v57 = vunpack.c.l.bf16 %v1702_v47  ;;  %v630_v62 = vmul.f32 %v1634_v52, %v2354_v2  ;;  %v631_v63 = vmul.f32 %v1635_v54, %v2354_v2  ;;  %v1642_v8 = vunpack.c.l.bf16 %v1703_v0  ;;  %v1707_v54 = vld [vmem:[%s2860_s2 + $0x48] sm:$0xff]  }
  0x2d   :  { %1887 = vmatpush3.bf16.msra.mxu0 %v2025_v50  ;;  %1858 = vmatprep.mubr.bf16.mxu0 %v223_v58  ;;  %v663_v33 = vadd.f32 %v2379_v21, %v624_v15  ;;  %v664_v34 = vadd.f32 %v2379_v21, %v625_v16  ;;  %v666_v50 = vadd.f32 %v2379_v21, %v627_v39  ;;  %v1639_v58 = vunpack.c.h.bf16 %v1702_v47 }
  0x2e   :  { %385 = vperm.xlu1 %2012, %v258_v25   ;;  %380 = vperm.xlu0 %2011, %v257_v26   ;;  %v1626_v25 = vunpack.c.l.bf16 %v1699_v12  ;;  %v266_v26 = vld [vmem:[%s2853_s1 + $0xf8] sm:$0xff]  ;;  %v632_v5 = vmul.f32 %v1638_v57, %v2354_v2  ;;  %v1643_v11 = vunpack.c.h.bf16 %v1703_v0  ;;  %v669_v20 = vadd.f32 %v2379_v21, %v630_v62 }
  0x2f   :  { %1888 = vmatprep.subr.bf16.mxu0 %v2027_v1  ;;  %v695_v41 = vmax.f32 %v663_v33, 0.0  ;;  %v696_v42 = vmax.f32 %v664_v34, 0.0  ;;  %v698_v61 = vmax.f32 %v666_v50, 0.0  ;;  %v670_v14 = vadd.f32 %v2379_v21, %v631_v63  ;;  %v1706_v34 = vld [vmem:[%s2860_s2 + $0x40] sm:$0xff]  }
  0x30   :  { %v626_v38 = vmul.f32 %v1626_v25, %v2354_v2  ;;  %v671_v18 = vadd.f32 %v2379_v21, %v632_v5  ;;  %v635_v25 = vmul.f32 %v1643_v11, %v2354_v2 }
  0x31   :  { %1889 = vmatpush3.bf16.msra.mxu0 %v2027_v1 }
  0x32   :  { %395 = vperm.xlu1 %2012, %v260_v37   ;;  %390 = vperm.xlu0 %2011, %v259_v40   ;;  %v202_v37 = vmax.f32 %v170_v24, 0.0  ;;  %v628_v40 = vmul.f32 %v1630_v30, %v2354_v2  ;;  %v665_v49 = vadd.f32 %v2379_v21, %v626_v38  ;;  %v634_v24 = vmul.f32 %v1642_v8, %v2354_v2 }
  0x33   :  { %1890 = vmatprep.subr.bf16.mxu0 %v2029_v19  ;;  %v703_v30 = vmax.f32 %v671_v18, 0.0 }
  0x34   :  { %1859 = vmatmul.mubr.bf16.gmra.mrb[8].mxu0 %v224_v28  ;;  %v226_v48 = vpack.c.bf16 %v202_v37, %v201_v36  ;;  %v667_v51 = vadd.f32 %v2379_v21, %v628_v40  ;;  %v697_v60 = vmax.f32 %v665_v49, 0.0  ;;  %v673_v35 = vadd.f32 %v2379_v21, %v634_v24 }
  0x35   :  { %1891 = vmatpush3.bf16.msra.mxu0 %v2029_v19  ;;  %1862 = vmatprep.mubr.bf16.mxu0 %v225_v32  ;;  %v1650_v36 = vunpack.c.l.bf16 %v1705_v29  ;;  %v1651_v37 = vunpack.c.h.bf16 %v1705_v29 }
  0x36   :  { %405 = vperm.xlu1 %2012, %v262_v55   ;;  %400 = vperm.xlu0 %2011, %v261_v56   ;;  %v727_v55 = vpack.c.bf16 %v696_v42, %v695_v41  ;;  %v668_v56 = vadd.f32 %v2379_v21, %v629_v43  ;;  %v699_v1 = vmax.f32 %v667_v51, 0.0  ;;  %v728_v12 = vpack.c.bf16 %v698_v61, %v697_v60 }
  0x37   :  { %1892 = vmatprep.subr.bf16.mxu0 %v2031_v23  ;;  %v1654_v42 = vunpack.c.l.bf16 %v1706_v34  ;;  %v1655_v43 = vunpack.c.h.bf16 %v1706_v34  ;;  %v705_v45 = vmax.f32 %v673_v35, 0.0  ;;  %v638_v47 = vmul.f32 %v1650_v36, %v2354_v2 }
  0x38   :  { %v700_v4 = vmax.f32 %v668_v56, 0.0  ;;  %v1659_v60 = vunpack.c.h.bf16 %v1707_v54 }
  0x39   :  { %1893 = vmatpush3.bf16.msra.mxu0 %v2031_v23  ;;  %v674_v23 = vadd.f32 %v2379_v21, %v635_v25  ;;  %v640_v51 = vmul.f32 %v1654_v42, %v2354_v2  ;;  %v641_v52 = vmul.f32 %v1655_v43, %v2354_v2  ;;  %v677_v57 = vadd.f32 %v2379_v21, %v638_v47 }
  0x3a   :  { %415 = vperm.xlu1 %2012, %v264_v6   ;;  %410 = vperm.xlu0 %2011, %v263_v7   ;;  %v633_v6 = vmul.f32 %v1639_v58, %v2354_v2  ;;  %v1704_v7 = vld [vmem:[%s2860_s2 + $0x30] sm:$0xff]   ;;  %v729_v16 = vpack.c.bf16 %v700_v4, %v699_v1 }
  0x3b   :  { %1894 = vmatprep.subr.bf16.mxu0 %v2033_v46  ;;  %v1646_v15 = vunpack.c.l.bf16 %v1704_v7  ;;  %v1647_v22 = vunpack.c.h.bf16 %v1704_v7  ;;  %v679_v0 = vadd.f32 %v2379_v21, %v640_v51  ;;  %v680_v1 = vadd.f32 %v2379_v21, %v641_v52 }
  0x3c   :  { %1863 = vmatmul.mubr.bf16.gmra.mrb[12].mxu0 %v226_v48  ;;  %v672_v19 = vadd.f32 %v2379_v21, %v633_v6  ;;  %v639_v48 = vmul.f32 %v1651_v37, %v2354_v2  ;;  %v709_v4 = vmax.f32 %v677_v57, 0.0  ;;  %v643_v7 = vmul.f32 %v1659_v60, %v2354_v2  ;;  %v1713_v60 = vld [vmem:[%s2860_s2 + $0x78] sm:$0xff]  }
  0x3d   :  { %1895 = vmatpush3.bf16.msra.mxu0 %v2033_v46  ;;  %1898 = vmatprep.mubr.bf16.mxu0 %v727_v55  ;;  %v636_v28 = vmul.f32 %v1646_v15, %v2354_v2  ;;  %v637_v33 = vmul.f32 %v1647_v22, %v2354_v2  ;;  %v706_v46 = vmax.f32 %v674_v23, 0.0  ;;  %v1708_v55 = vld [vmem:[%s2860_s2 + $0x50] sm:$0xff]   ;;  %v1710_v15 = vld [vmem:[%s2860_s2 + $0x60] sm:$0xff]  }
  0x3e   :  { %425 = vperm.xlu1 %2012, %v266_v26   ;;  %420 = vperm.xlu0 %2011, %v265_v27   ;;  %v701_v26 = vmax.f32 %v669_v20, 0.0  ;;  %v702_v27 = vmax.f32 %v670_v14, 0.0  ;;  %v704_v32 = vmax.f32 %v672_v19, 0.0  ;;  %v678_v58 = vadd.f32 %v2379_v21, %v639_v48 }
  0x3f   :  { %1896 = vmatprep.subr.bf16.mxu0 %v2035_v59  ;;  %v675_v39 = vadd.f32 %v2379_v21, %v636_v28  ;;  %v676_v41 = vadd.f32 %v2379_v21, %v637_v33  ;;  %v732_v56 = vpack.c.bf16 %v706_v46, %v705_v45  ;;  %v1662_v61 = vunpack.c.l.bf16 %v1708_v55 }
  0x40   :  { %v730_v38 = vpack.c.bf16 %v702_v27, %v701_v26  ;;  %v731_v40 = vpack.c.bf16 %v704_v32, %v703_v30  ;;  %v1663_v62 = vunpack.c.h.bf16 %v1708_v55  ;;  %v710_v5 = vmax.f32 %v678_v58, 0.0 }
  0x41   :  { %1897 = vmatpush3.bf16.msra.mxu0 %v2035_v59  ;;  %v707_v49 = vmax.f32 %v675_v39, 0.0  ;;  %v708_v50 = vmax.f32 %v676_v41, 0.0  ;;  %v1658_v59 = vunpack.c.l.bf16 %v1707_v54  ;;  %v644_v8 = vmul.f32 %v1662_v61, %v2354_v2  ;;  %v1712_v39 = vld [vmem:[%s2860_s2 + $0x70] sm:$0xff]  }
  0x42   :  { %v645_v11 = vmul.f32 %v1663_v62, %v2354_v2  ;;  %v711_v20 = vmax.f32 %v679_v0, 0.0  ;;  %v712_v14 = vmax.f32 %v680_v1, 0.0  ;;  %v682_v24 = vadd.f32 %v2379_v21, %v643_v7 }
  0x43   :  { %v733_v63 = vpack.c.bf16 %v708_v50, %v707_v49  ;;  %v642_v6 = vmul.f32 %v1658_v59, %v2354_v2  ;;  %v683_v25 = vadd.f32 %v2379_v21, %v644_v8  ;;  %v1670_v28 = vunpack.c.l.bf16 %v1710_v15 }
  0x44   :  { %1899 = vmatmul.mubr.bf16.vlgmr.msra.gmra.mrb[0].mxu0 %v728_v12  ;;  %v1709_v12 = vld [vmem:[%s2860_s2 + $0x58] sm:$0xff]   ;;  %v684_v26 = vadd.f32 %v2379_v21, %v645_v11  ;;  %v735_v27 = vpack.c.bf16 %v712_v14, %v711_v20  ;;  %v1671_v29 = vunpack.c.h.bf16 %v1710_v15  ;;  %v714_v34 = vmax.f32 %v682_v24, 0.0 }
  0x45   :  { %1902 = vmatprep.mubr.bf16.mxu0 %v729_v16  ;;  %v734_v16 = vpack.c.bf16 %v710_v5, %v709_v4  ;;  %v1666_v18 = vunpack.c.l.bf16 %v1709_v12  ;;  %v1667_v19 = vunpack.c.h.bf16 %v1709_v12  ;;  %v681_v22 = vadd.f32 %v2379_v21, %v642_v6 }
  0x46   :  { %v715_v35 = vmax.f32 %v683_v25, 0.0  ;;  %v716_v23 = vmax.f32 %v684_v26, 0.0  ;;  %v648_v36 = vmul.f32 %v1670_v28, %v2354_v2  ;;  %v649_v37 = vmul.f32 %v1671_v29, %v2354_v2 }
  0x47   :  { %v646_v30 = vmul.f32 %v1666_v18, %v2354_v2  ;;  %v647_v32 = vmul.f32 %v1667_v19, %v2354_v2  ;;  %v713_v33 = vmax.f32 %v681_v22, 0.0  ;;  %v1678_v49 = vunpack.c.l.bf16 %v1712_v39  ;;  %v2502_v22 = vld [vmem:[%s2863_s5] ss:$0 sm:$0xff] }
  0x48   :  { %v737_v43 = vpack.c.bf16 %v716_v23, %v715_v35  ;;  %v687_v47 = vadd.f32 %v2379_v21, %v648_v36  ;;  %v688_v48 = vadd.f32 %v2379_v21, %v649_v37  ;;  %v1679_v50 = vunpack.c.h.bf16 %v1712_v39 }
  0x49   :  { %v686_v41 = vadd.f32 %v2379_v21, %v647_v32  ;;  %v736_v42 = vpack.c.bf16 %v714_v34, %v713_v33  ;;  %v652_v58 = vmul.f32 %v1678_v49, %v2354_v2  ;;  %v1682_v0 = vunpack.c.l.bf16 %v1713_v60 }
  0x4a   :  { %v720_v57 = vmax.f32 %v688_v48, 0.0  ;;  %v653_v59 = vmul.f32 %v1679_v50, %v2354_v2  ;;  %v1683_v1 = vunpack.c.h.bf16 %v1713_v60 }
  0x4b   :  { %v718_v52 = vmax.f32 %v686_v41, 0.0  ;;  %v691_v5 = vadd.f32 %v2379_v21, %v652_v58  ;;  %v654_v11 = vmul.f32 %v1682_v0, %v2354_v2 }
  0x4c   :  { %1903 = vmatmul.mubr.bf16.gmra.mrb[4].mxu0 %v730_v38  ;;  %v1711_v38 = vld [vmem:[%s2860_s2 + $0x68] sm:$0xff]   ;;  %v692_v6 = vadd.f32 %v2379_v21, %v653_v59  ;;  %v655_v12 = vmul.f32 %v1683_v1, %v2354_v2 }
  0x4d   :  { %1906 = vmatprep.mubr.bf16.mxu0 %v731_v40  ;;  %v685_v40 = vadd.f32 %v2379_v21, %v646_v30  ;;  %v1674_v45 = vunpack.c.l.bf16 %v1711_v38  ;;  %v1675_v46 = vunpack.c.h.bf16 %v1711_v38  ;;  %v723_v20 = vmax.f32 %v691_v5, 0.0 }
  0x4e   :  { %v724_v14 = vmax.f32 %v692_v6, 0.0  ;;  %v694_v18 = vadd.f32 %v2379_v21, %v655_v12 }
  0x4f   :  { %v717_v51 = vmax.f32 %v685_v40, 0.0  ;;  %v650_v54 = vmul.f32 %v1674_v45, %v2354_v2  ;;  %v651_v55 = vmul.f32 %v1675_v46, %v2354_v2 }
  0x50   :  { %v741_v19 = vpack.c.bf16 %v724_v14, %v723_v20  ;;  %v726_v25 = vmax.f32 %v694_v18, 0.0 }
  0x51   :  { %v738_v61 = vpack.c.bf16 %v718_v52, %v717_v51  ;;  %v689_v62 = vadd.f32 %v2379_v21, %v650_v54 }
  0x53   :  { %v721_v7 = vmax.f32 %v689_v62, 0.0 }
  0x54   :  { %1907 = vmatmul.mubr.bf16.gmra.mrb[8].mxu0 %v732_v56  ;;  %v719_v56 = vmax.f32 %v687_v47, 0.0 }
  0x55   :  { %1910 = vmatprep.mubr.bf16.mxu0 %v733_v63  ;;  %v690_v63 = vadd.f32 %v2379_v21, %v651_v55 }
  0x56   :  { %v739_v4 = vpack.c.bf16 %v720_v57, %v719_v56 }
  0x57   :  { %v722_v8 = vmax.f32 %v690_v63, 0.0 }
  0x59   :  { %v740_v15 = vpack.c.bf16 %v722_v8, %v721_v7 }
  0x5c   :  { %1911 = vmatmul.mubr.bf16.gmra.mrb[12].mxu0 %v734_v16  ;;  %v693_v16 = vadd.f32 %v2379_v21, %v654_v11 }
  0x5d   :  { %1914 = vmatprep.mubr.bf16.mxu0 %v735_v27  ;;  %v2507_v27 = vld [vmem:[%s2864_s6] ss:$0 sm:$0xff] }
  0x5e   :  { %v725_v24 = vmax.f32 %v693_v16, 0.0 }
  0x60   :  { %v742_v29 = vpack.c.bf16 %v726_v25, %v725_v24 }
  0x64   :  { %1915 = vmatmul.mubr.bf16.gmra.mrb[16].mxu0 %v736_v42 }
  0x65   :  { %1918 = vmatprep.mubr.bf16.mxu0 %v737_v43 }
  0x6c   :  { %1919 = vmatmul.mubr.bf16.gmra.mrb[20].mxu0 %v738_v61 }
  0x6d   :  { %1922 = vmatprep.mubr.bf16.mxu0 %v739_v4 }
  0x74   :  { %1923 = vmatmul.mubr.bf16.gmra.mrb[24].mxu0 %v740_v15 }
  0x75   :  { %1926 = vmatprep.mubr.bf16.mxu0 %v741_v19 }
  0x7c   :  { %1927 = vmatmul.mubr.bf16.gmra.mrb[28].mxu0 %v742_v29 }
  0x81   :  { %v281_v26 = vpop.permute.xlu1 %280  ;;  %v271_v2 = vpop.permute.xlu0 %270 }
  0x82   :  { %v436_v28 = vmul.f32 %v2502_v22, %v281_v26  ;;  %v434_v21 = vmul.f32 %v2502_v22, %v271_v2 }
  0x84   :  { %v475_v30 = vadd.f32 %v2507_v27, %v436_v28  ;;  %v473_v34 = vadd.f32 %v2507_v27, %v434_v21 }
  0x85   :  { %v286_v32 = vpop.permute.xlu1 %285  ;;  %v276_v33 = vpop.permute.xlu0 %275 }
  0x86   :  { %v437_v35 = vmul.f32 %v2502_v22, %v286_v32  ;;  %v435_v23 = vmul.f32 %v2502_v22, %v276_v33  ;;  %v507_v38 = vmax.f32 %v475_v30, 0.0  ;;  %v505_v41 = vmax.f32 %v473_v34, 0.0 }
  0x88   :  { %v476_v36 = vadd.f32 %v2507_v27, %v437_v35  ;;  %v474_v37 = vadd.f32 %v2507_v27, %v435_v23 }
  0x89   :  { %v296_v39 = vpop.permute.xlu1 %295  ;;  %v291_v40 = vpop.permute.xlu0 %290 }
  0x8a   :  { %v508_v42 = vmax.f32 %v476_v36, 0.0  ;;  %v439_v43 = vmul.f32 %v2502_v22, %v296_v39  ;;  %v438_v45 = vmul.f32 %v2502_v22, %v291_v40  ;;  %v506_v46 = vmax.f32 %v474_v37, 0.0 }
  0x8c   :  { %v478_v47 = vadd.f32 %v2507_v27, %v439_v43  ;;  %v477_v48 = vadd.f32 %v2507_v27, %v438_v45  ;;  %v537_v49 = vpack.c.bf16 %v506_v46, %v505_v41  ;;  %v538_v50 = vpack.c.bf16 %v508_v42, %v507_v38 }
  0x8d   :  { %v306_v51 = vpop.permute.xlu1 %305  ;;  %v301_v52 = vpop.permute.xlu0 %300 }
  0x8e   :  { %v510_v54 = vmax.f32 %v478_v47, 0.0  ;;  %v509_v55 = vmax.f32 %v477_v48, 0.0  ;;  %v441_v56 = vmul.f32 %v2502_v22, %v306_v51  ;;  %v440_v57 = vmul.f32 %v2502_v22, %v301_v52  ;;  %1802 = vmatprep.mubr.bf16.mxu1 %v537_v49 }
  0x8f   :  { %1803 = vmatmul.mubr.bf16.vlgmr.msra.gmra.mrb[0].mxu1 %v538_v50 }
  0x90   :  { %v480_v58 = vadd.f32 %v2507_v27, %v441_v56  ;;  %v479_v59 = vadd.f32 %v2507_v27, %v440_v57  ;;  %1938 = vmatpush3.bf16.msra.mxu1 %v2137_v9  ;;  %v539_v60 = vpack.c.bf16 %v510_v54, %v509_v55 }
  0x91   :  { %v316_v61 = vpop.permute.xlu1 %315  ;;  %v311_v62 = vpop.permute.xlu0 %310  ;;  %1931 = vmatprep.subr.bf16.mxu1 %v2142_v10 }
  0x92   :  { %v512_v63 = vmax.f32 %v480_v58, 0.0  ;;  %v511_v0 = vmax.f32 %v479_v59, 0.0  ;;  %v443_v1 = vmul.f32 %v2502_v22, %v316_v61  ;;  %v442_v4 = vmul.f32 %v2502_v22, %v311_v62  ;;  %1806 = vmatprep.mubr.bf16.mxu1 %v539_v60 }
  0x94   :  { %v482_v5 = vadd.f32 %v2507_v27, %v443_v1  ;;  %v481_v6 = vadd.f32 %v2507_v27, %v442_v4  ;;  %v540_v7 = vpack.c.bf16 %v512_v63, %v511_v0  ;;  %1939 = vmatpush3.bf16.msra.mxu1 %v2142_v10 }
  0x95   :  { %v326_v9 = vpop.permute.xlu1 %325  ;;  %v321_v8 = vpop.permute.xlu0 %320  ;;  %1932 = vmatprep.subr.bf16.mxu1 %v2156_v13 }
  0x96   :  { %v514_v11 = vmax.f32 %v482_v5, 0.0  ;;  %v513_v12 = vmax.f32 %v481_v6, 0.0  ;;  %v445_v20 = vmul.f32 %v2502_v22, %v326_v9  ;;  %v444_v14 = vmul.f32 %v2502_v22, %v321_v8 }
  0x97   :  { %1807 = vmatmul.mubr.bf16.gmra.mrb[4].mxu1 %v540_v7 }
  0x98   :  { %v484_v15 = vadd.f32 %v2507_v27, %v445_v20  ;;  %v483_v16 = vadd.f32 %v2507_v27, %v444_v14  ;;  %v541_v18 = vpack.c.bf16 %v514_v11, %v513_v12  ;;  %1940 = vmatpush3.bf16.msra.mxu1 %v2156_v13  ;;  %v1691_v11 = vld [vmem:[%s2855_s0 + $0x40] sm:$0xff]  }
  0x99   :  { %v336_v19 = vpop.permute.xlu1 %335  ;;  %v331_v10 = vpop.permute.xlu0 %330  ;;  %1933 = vmatprep.subr.bf16.mxu1 %v2171_v17 }
  0x9a   :  { %v516_v24 = vmax.f32 %v484_v15, 0.0  ;;  %v515_v25 = vmax.f32 %v483_v16, 0.0  ;;  %v447_v26 = vmul.f32 %v2502_v22, %v336_v19  ;;  %v446_v2 = vmul.f32 %v2502_v22, %v331_v10  ;;  %1810 = vmatprep.mubr.bf16.mxu1 %v541_v18 }
  0x9b   :  { %v1590_v18 = vunpack.c.l.bf16 %v1691_v11 }
  0x9c   :  { %v486_v28 = vadd.f32 %v2507_v27, %v447_v26  ;;  %v485_v21 = vadd.f32 %v2507_v27, %v446_v2  ;;  %v542_v29 = vpack.c.bf16 %v516_v24, %v515_v25  ;;  %1941 = vmatpush3.bf16.msra.mxu1 %v2171_v17  ;;  %v1591_v25 = vunpack.c.h.bf16 %v1691_v11 }
  0x9d   :  { %v346_v30 = vpop.permute.xlu1 %345  ;;  %v341_v13 = vpop.permute.xlu0 %340  ;;  %1934 = vmatprep.subr.bf16.mxu1 %v2208_v31 }
  0x9e   :  { %v518_v32 = vmax.f32 %v486_v28, 0.0  ;;  %v517_v33 = vmax.f32 %v485_v21, 0.0  ;;  %v449_v34 = vmul.f32 %v2502_v22, %v346_v30  ;;  %v448_v35 = vmul.f32 %v2502_v22, %v341_v13  ;;  %v1692_v13 = vld [vmem:[%s2855_s0 + $0x48] sm:$0xff]  }
  0x9f   :  { %1811 = vmatmul.mubr.bf16.gmra.mrb[8].mxu1 %v542_v29 }
  0xa0   :  { %v488_v23 = vadd.f32 %v2507_v27, %v449_v34  ;;  %v487_v36 = vadd.f32 %v2507_v27, %v448_v35  ;;  %v543_v37 = vpack.c.bf16 %v518_v32, %v517_v33  ;;  %1942 = vmatpush3.bf16.msra.mxu1 %v2208_v31  ;;  %v2587_v32 = vld [vmem:[%s2856_s3] ss:$0 sm:$0xff] }
  0xa1   :  { %v356_v38 = vpop.permute.xlu1 %355  ;;  %v351_v17 = vpop.permute.xlu0 %350  ;;  %1935 = vmatprep.subr.bf16.mxu1 %v2230_v44  ;;  %v132_v33 = vmul.f32 %v2587_v32, %v1590_v18 }
  0xa2   :  { %v520_v39 = vmax.f32 %v488_v23, 0.0  ;;  %v519_v40 = vmax.f32 %v487_v36, 0.0  ;;  %v451_v41 = vmul.f32 %v2502_v22, %v356_v38  ;;  %v450_v42 = vmul.f32 %v2502_v22, %v351_v17  ;;  %1814 = vmatprep.mubr.bf16.mxu1 %v543_v37  ;;  %v1693_v37 = vld [vmem:[%s2855_s0 + $0x50] sm:$0xff]  }
  0xa3   :  { %v133_v36 = vmul.f32 %v2587_v32, %v1591_v25 }
  0xa4   :  { %v490_v43 = vadd.f32 %v2507_v27, %v451_v41  ;;  %v489_v45 = vadd.f32 %v2507_v27, %v450_v42  ;;  %v544_v46 = vpack.c.bf16 %v520_v39, %v519_v40  ;;  %1943 = vmatpush3.bf16.msra.mxu1 %v2230_v44  ;;  %v1594_v39 = vunpack.c.l.bf16 %v1692_v13 }
  0xa5   :  { %v366_v47 = vpop.permute.xlu1 %365  ;;  %v361_v31 = vpop.permute.xlu0 %360  ;;  %1936 = vmatprep.subr.bf16.mxu1 %v2253_v53 }
  0xa6   :  { %v522_v48 = vmax.f32 %v490_v43, 0.0  ;;  %v521_v49 = vmax.f32 %v489_v45, 0.0  ;;  %v453_v50 = vmul.f32 %v2502_v22, %v366_v47  ;;  %v452_v51 = vmul.f32 %v2502_v22, %v361_v31  ;;  %v2601_v45 = vld [vmem:[%s2857_s4] ss:$0 sm:$0xff] }
  0xa7   :  { %1815 = vmatmul.mubr.bf16.gmra.mrb[12].mxu1 %v544_v46  ;;  %v171_v46 = vadd.f32 %v2601_v45, %v132_v33  ;;  %v1595_v47 = vunpack.c.h.bf16 %v1692_v13  ;;  %v1598_v31 = vunpack.c.l.bf16 %v1693_v37 }
  0xa8   :  { %v492_v52 = vadd.f32 %v2507_v27, %v453_v50  ;;  %v491_v54 = vadd.f32 %v2507_v27, %v452_v51  ;;  %v545_v55 = vpack.c.bf16 %v522_v48, %v521_v49  ;;  %1944 = vmatpush3.bf16.msra.mxu1 %v2253_v53  ;;  %v1599_v48 = vunpack.c.h.bf16 %v1693_v37 }
  0xa9   :  { %v376_v56 = vpop.permute.xlu1 %375  ;;  %v371_v44 = vpop.permute.xlu0 %370  ;;  %1937 = vmatprep.subr.bf16.mxu1 %v2279_v3 }
  0xaa   :  { %v524_v57 = vmax.f32 %v492_v52, 0.0  ;;  %v523_v58 = vmax.f32 %v491_v54, 0.0  ;;  %v455_v59 = vmul.f32 %v2502_v22, %v376_v56  ;;  %v454_v60 = vmul.f32 %v2502_v22, %v371_v44  ;;  %1818 = vmatprep.mubr.bf16.mxu1 %v545_v55 }
  0xab   :  { %v172_v52 = vadd.f32 %v2601_v45, %v133_v36  ;;  %v134_v56 = vmul.f32 %v2587_v32, %v1594_v39 }
  0xac   :  { %v494_v61 = vadd.f32 %v2507_v27, %v455_v59  ;;  %v493_v62 = vadd.f32 %v2507_v27, %v454_v60  ;;  %v546_v63 = vpack.c.bf16 %v524_v57, %v523_v58  ;;  %1945 = vmatpush3.bf16.msra.mxu1 %v2279_v3  ;;  %v203_v60 = vmax.f32 %v171_v46, 0.0 }
  0xad   :  { %v386_v0 = vpop.permute.xlu1 %385  ;;  %v381_v53 = vpop.permute.xlu0 %380  ;;  %v173_v11 = vadd.f32 %v2601_v45, %v134_v56 }
  0xae   :  { %v526_v1 = vmax.f32 %v494_v61, 0.0  ;;  %v525_v4 = vmax.f32 %v493_v62, 0.0  ;;  %v457_v5 = vmul.f32 %v2502_v22, %v386_v0  ;;  %v456_v6 = vmul.f32 %v2502_v22, %v381_v53  ;;  %v1694_v0 = vld [vmem:[%s2855_s0 + $0x58] sm:$0xff]  }
  0xaf   :  { %1819 = vmatmul.mubr.bf16.gmra.mrb[16].mxu1 %v546_v63  ;;  %v135_v61 = vmul.f32 %v2587_v32, %v1595_v47  ;;  %v136_v62 = vmul.f32 %v2587_v32, %v1598_v31  ;;  %v137_v63 = vmul.f32 %v2587_v32, %v1599_v48  ;;  %v1698_v48 = vld [vmem:[%s2855_s0 + $0x78] sm:$0xff]  }
  0xb0   :  { %v496_v7 = vadd.f32 %v2507_v27, %v457_v5  ;;  %v495_v9 = vadd.f32 %v2507_v27, %v456_v6  ;;  %v547_v8 = vpack.c.bf16 %v526_v1, %v525_v4  ;;  %v204_v5 = vmax.f32 %v172_v52, 0.0 }
  0xb1   :  { %v396_v12 = vpop.permute.xlu1 %395  ;;  %v391_v3 = vpop.permute.xlu0 %390  ;;  %v1618_v52 = vunpack.c.l.bf16 %v1698_v48 }
  0xb2   :  { %v528_v20 = vmax.f32 %v496_v7, 0.0  ;;  %v527_v14 = vmax.f32 %v495_v9, 0.0  ;;  %v459_v15 = vmul.f32 %v2502_v22, %v396_v12  ;;  %v458_v16 = vmul.f32 %v2502_v22, %v391_v3  ;;  %1822 = vmatprep.mubr.bf16.mxu1 %v547_v8 }
  0xb3   :  { %v1602_v9 = vunpack.c.l.bf16 %v1694_v0  ;;  %v1603_v8 = vunpack.c.h.bf16 %v1694_v0  ;;  %v174_v12 = vadd.f32 %v2601_v45, %v135_v61  ;;  %v175_v3 = vadd.f32 %v2601_v45, %v136_v62 }
  0xb4   :  { %v498_v19 = vadd.f32 %v2507_v27, %v459_v15  ;;  %v497_v10 = vadd.f32 %v2507_v27, %v458_v16  ;;  %v548_v24 = vpack.c.bf16 %v528_v20, %v527_v14  ;;  %v176_v20 = vadd.f32 %v2601_v45, %v137_v63 }
  0xb5   :  { %v406_v26 = vpop.permute.xlu1 %405  ;;  %v401_v2 = vpop.permute.xlu0 %400  ;;  %v227_v14 = vpack.c.bf16 %v204_v5, %v203_v60  ;;  %v138_v18 = vmul.f32 %v2587_v32, %v1602_v9  ;;  %v207_v25 = vmax.f32 %v175_v3, 0.0 }
  0xb6   :  { %v530_v28 = vmax.f32 %v498_v19, 0.0  ;;  %v529_v21 = vmax.f32 %v497_v10, 0.0  ;;  %v461_v29 = vmul.f32 %v2502_v22, %v406_v26  ;;  %v460_v30 = vmul.f32 %v2502_v22, %v401_v2 }
  0xb7   :  { %1823 = vmatmul.mubr.bf16.gmra.mrb[20].mxu1 %v548_v24  ;;  %v139_v19 = vmul.f32 %v2587_v32, %v1603_v8  ;;  %v205_v10 = vmax.f32 %v173_v11, 0.0  ;;  %v206_v24 = vmax.f32 %v174_v12, 0.0  ;;  %v208_v26 = vmax.f32 %v176_v20, 0.0 }
  0xb8   :  { %v500_v34 = vadd.f32 %v2507_v27, %v461_v29  ;;  %v499_v35 = vadd.f32 %v2507_v27, %v460_v30  ;;  %v549_v23 = vpack.c.bf16 %v530_v28, %v529_v21  ;;  %v1696_v21 = vld [vmem:[%s2855_s0 + $0x68] sm:$0xff]   ;;  %v1697_v29 = vld [vmem:[%s2855_s0 + $0x70] sm:$0xff]   ;;  %v177_v30 = vadd.f32 %v2601_v45, %v138_v18 }
  0xb9   :  { %v416_v38 = vpop.permute.xlu1 %415  ;;  %v411_v17 = vpop.permute.xlu0 %410  ;;  %v178_v13 = vadd.f32 %v2601_v45, %v139_v19  ;;  %v228_v33 = vpack.c.bf16 %v206_v24, %v205_v10 }
  0xba   :  { %v532_v40 = vmax.f32 %v500_v34, 0.0  ;;  %v531_v41 = vmax.f32 %v499_v35, 0.0  ;;  %v463_v42 = vmul.f32 %v2502_v22, %v416_v38  ;;  %v462_v43 = vmul.f32 %v2502_v22, %v411_v17  ;;  %1826 = vmatprep.mubr.bf16.mxu1 %v549_v23 }
  0xbb   :  { %v229_v34 = vpack.c.bf16 %v208_v26, %v207_v25  ;;  %v1610_v35 = vunpack.c.l.bf16 %v1696_v21  ;;  %v1611_v23 = vunpack.c.h.bf16 %v1696_v21  ;;  %v1614_v38 = vunpack.c.l.bf16 %v1697_v29 }
  0xbc   :  { %v502_v49 = vadd.f32 %v2507_v27, %v463_v42  ;;  %v501_v50 = vadd.f32 %v2507_v27, %v462_v43  ;;  %v550_v51 = vpack.c.bf16 %v532_v40, %v531_v41  ;;  %v1615_v17 = vunpack.c.h.bf16 %v1697_v29 }
  0xbd   :  { %v426_v54 = vpop.permute.xlu1 %425  ;;  %v421_v55 = vpop.permute.xlu0 %420  ;;  %v209_v39 = vmax.f32 %v177_v30, 0.0  ;;  %v210_v40 = vmax.f32 %v178_v13, 0.0  ;;  %v142_v41 = vmul.f32 %v2587_v32, %v1610_v35  ;;  %v143_v42 = vmul.f32 %v2587_v32, %v1611_v23 }
  0xbe   :  { %v534_v44 = vmax.f32 %v502_v49, 0.0  ;;  %v533_v57 = vmax.f32 %v501_v50, 0.0  ;;  %v465_v58 = vmul.f32 %v2502_v22, %v426_v54  ;;  %v464_v59 = vmul.f32 %v2502_v22, %v421_v55  ;;  %v1695_v22 = vld [vmem:[%s2855_s0 + $0x60] sm:$0xff]  }
  0xbf   :  { %1827 = vmatmul.mubr.bf16.gmra.mrb[24].mxu1 %v550_v51  ;;  %v1606_v15 = vunpack.c.l.bf16 %v1695_v22  ;;  %v1607_v16 = vunpack.c.h.bf16 %v1695_v22  ;;  %v144_v47 = vmul.f32 %v2587_v32, %v1614_v38  ;;  %v145_v31 = vmul.f32 %v2587_v32, %v1615_v17  ;;  %v2701_v17 = vld [vmem:[%s2865_s12] ss:$0 sm:$0xff] }
  0xc0   :  { %v504_v53 = vadd.f32 %v2507_v27, %v465_v58  ;;  %v503_v1 = vadd.f32 %v2507_v27, %v464_v59  ;;  %v551_v4 = vpack.c.bf16 %v534_v44, %v533_v57  ;;  %v230_v49 = vpack.c.bf16 %v210_v40, %v209_v39 }
  0xc1   :  { %v140_v2 = vmul.f32 %v2587_v32, %v1606_v15  ;;  %v141_v28 = vmul.f32 %v2587_v32, %v1607_v16  ;;  %v181_v50 = vadd.f32 %v2601_v45, %v142_v41  ;;  %v182_v51 = vadd.f32 %v2601_v45, %v143_v42 }
  0xc2   :  { %v536_v6 = vmax.f32 %v504_v53, 0.0  ;;  %v535_v7 = vmax.f32 %v503_v1, 0.0  ;;  %1830 = vmatprep.mubr.bf16.mxu1 %v551_v4  ;;  %v1619_v54 = vunpack.c.h.bf16 %v1698_v48  ;;  %v183_v56 = vadd.f32 %v2601_v45, %v144_v47 }
  0xc3   :  { %v179_v36 = vadd.f32 %v2601_v45, %v140_v2  ;;  %v180_v37 = vadd.f32 %v2601_v45, %v141_v28  ;;  %v184_v44 = vadd.f32 %v2601_v45, %v145_v31  ;;  %v213_v57 = vmax.f32 %v181_v50, 0.0 }
  0xc4   :  { %v552_v27 = vpack.c.bf16 %v536_v6, %v535_v7  ;;  %v214_v58 = vmax.f32 %v182_v51, 0.0  ;;  %v146_v59 = vmul.f32 %v2587_v32, %v1618_v52  ;;  %v147_v60 = vmul.f32 %v2587_v32, %v1619_v54 }
  0xc5   :  { %v211_v43 = vmax.f32 %v179_v36, 0.0  ;;  %v212_v46 = vmax.f32 %v180_v37, 0.0  ;;  %v215_v61 = vmax.f32 %v183_v56, 0.0  ;;  %v216_v62 = vmax.f32 %v184_v44, 0.0 }
  0xc6   :  { %v232_v63 = vpack.c.bf16 %v214_v58, %v213_v57  ;;  %v185_v0 = vadd.f32 %v2601_v45, %v146_v59  ;;  %v186_v53 = vadd.f32 %v2601_v45, %v147_v60 }
  0xc7   :  { %1831 = vmatmul.mubr.bf16.gmra.mrb[28].mxu1 %v552_v27  ;;  %v231_v55 = vpack.c.bf16 %v212_v46, %v211_v43  ;;  %v233_v1 = vpack.c.bf16 %v216_v62, %v215_v61 }
  0xc8   :  { %1866 = vmatprep.mubr.bf16.mxu1 %v227_v14  ;;  %v217_v4 = vmax.f32 %v185_v0, 0.0  ;;  %v218_v5 = vmax.f32 %v186_v53, 0.0 }
  0xca   :  { %v234_v22 = vpack.c.bf16 %v218_v5, %v217_v4 }
  0xcf   :  { %1867 = vmatmul.mubr.bf16.vlgmr.msra.gmra.mrb[16].mxu1 %v228_v33 }
  0xd0   :  { %1870 = vmatprep.mubr.bf16.mxu1 %v229_v34 }
  0xd7   :  { %1871 = vmatmul.mubr.bf16.gmra.mrb[20].mxu1 %v230_v49 }
  0xd8   :  { %1874 = vmatprep.mubr.bf16.mxu1 %v231_v55 }
  0xdf   :  { %1875 = vmatmul.mubr.bf16.gmra.mrb[24].mxu1 %v232_v63 }
  0xe0   :  { %1878 = vmatprep.mubr.bf16.mxu1 %v233_v1 }
  0xe7   :  { %1879 = vmatmul.mubr.bf16.gmra.mrb[28].mxu1 %v234_v22 }
 0x117   :  { %v1900_v6 = vpop.f32.mrb[0].mxu0 }
 0x118   :  { %v1291_v7 = vpop.f32.mrb[1].mxu0 }
 0x119   :  { %v1901_v9 = vpop.f32.mrb[2].mxu0 }
 0x11a   :  { %v1294_v8 = vpop.f32.mrb[3].mxu0 }
 0x11f   :  { %v1904_v32 = vpop.f32.mrb[4].mxu0 }
 0x120   :  { %v1307_v11 = vpop.f32.mrb[5].mxu0 }
 0x121   :  { %v1905_v12 = vpop.f32.mrb[6].mxu0 }
 0x122   :  { %v1310_v3 = vpop.f32.mrb[7].mxu0 }
 0x127   :  { %v1908_v20 = vpop.f32.mrb[8].mxu0 }
 0x128   :  { %v1323_v27 = vpop.f32.mrb[9].mxu0 }
 0x129   :  { %v2654_v14 = vpop.f32.mrb[10].mxu0 }
 0x12a   :  { %v2656_v45 = vpop.f32.mrb[11].mxu0 }
 0x12f   :  { %v2658_v15 = vpop.f32.mrb[12].mxu0 }
 0x130   :  { %v2660_v16 = vpop.f32.mrb[13].mxu0 }
 0x131   :  { %v2662_v18 = vpop.f32.mrb[14].mxu0 }
 0x132   :  { %v2664_v19 = vpop.f32.mrb[15].mxu0 }
 0x137   :  { %v2666_v10 = vpop.f32.mrb[16].mxu0 }
 0x138   :  { %v2668_v24 = vpop.f32.mrb[17].mxu0 }
 0x139   :  { %v2670_v25 = vpop.f32.mrb[18].mxu0 }
 0x13a   :  { %v2672_v26 = vpop.f32.mrb[19].mxu0 }
 0x13f   :  { %v2674_v2 = vpop.f32.mrb[20].mxu0 }
 0x140   :  { %v2676_v28 = vpop.f32.mrb[21].mxu0 }
 0x141   :  { %v2678_v21 = vpop.f32.mrb[22].mxu0 }
 0x142   :  { %v2680_v29 = vpop.f32.mrb[23].mxu0 }
 0x147   :  { %v2682_v30 = vpop.f32.mrb[24].mxu0 }
 0x148   :  { %v2684_v13 = vpop.f32.mrb[25].mxu0 }
 0x149   :  { %v2686_v33 = vpop.f32.mrb[26].mxu0 }
 0x14a   :  { %v2688_v34 = vpop.f32.mrb[27].mxu0 }
 0x14f   :  { %v2690_v35 = vpop.f32.mrb[28].mxu0 }
 0x150   :  { %v2692_v23 = vpop.f32.mrb[29].mxu0 }
 0x151   :  { %v2694_v36 = vpop.f32.mrb[30].mxu0 }
 0x152   :  { %v2696_v37 = vpop.f32.mrb[31].mxu0 }
 0x162   :  { %v1804_v38 = vpop.f32.mrb[0].mxu1 }
 0x163   :  { %v1946_v39 = vadd.f32 %v1900_v6, %v1804_v38  ;;  %v857_v40 = vpop.f32.mrb[1].mxu1 }
 0x164   :  { %v1947_v41 = vadd.f32 %v1291_v7, %v857_v40  ;;  %v1805_v42 = vpop.f32.mrb[2].mxu1 }
 0x165   :  { %v1459_v43 = vadd.f32 %v1946_v39, %v2701_v17  ;;  %v1948_v46 = vadd.f32 %v1901_v9, %v1805_v42  ;;  %v860_v47 = vpop.f32.mrb[3].mxu1 }
 0x166   :  { %v1457_v31 = vadd.f32 %v1947_v41, %v2701_v17  ;;  %v1949_v48 = vadd.f32 %v1294_v8, %v860_v47 }
 0x167   :  { %1491 = vst [vmem:[%s2866_s13 + $0x10] sm:$0xff] %v1459_v43  ;;  %v1460_v49 = vadd.f32 %v1948_v46, %v2701_v17 }
 0x168   :  { %1489 = vst [vmem:[%s2866_s13] sm:$0xff] %v1457_v31  ;;  %v1458_v50 = vadd.f32 %v1949_v48, %v2701_v17 }
 0x169   :  { %1492 = vst [vmem:[%s2866_s13 + $0x18] sm:$0xff] %v1460_v49 }
 0x16a   :  { %1490 = vst [vmem:[%s2866_s13 + $0x8] sm:$0xff] %v1458_v50  ;;  %v1808_v51 = vpop.f32.mrb[4].mxu1 }
 0x16b   :  { %v1950_v52 = vadd.f32 %v1904_v32, %v1808_v51  ;;  %v873_v54 = vpop.f32.mrb[5].mxu1 }
 0x16c   :  { %v1951_v55 = vadd.f32 %v1307_v11, %v873_v54  ;;  %v1809_v56 = vpop.f32.mrb[6].mxu1 }
 0x16d   :  { %v1463_v44 = vadd.f32 %v1950_v52, %v2701_v17  ;;  %v1952_v57 = vadd.f32 %v1905_v12, %v1809_v56  ;;  %v876_v58 = vpop.f32.mrb[7].mxu1 }
 0x16e   :  { %v1461_v59 = vadd.f32 %v1951_v55, %v2701_v17  ;;  %v1953_v60 = vadd.f32 %v1310_v3, %v876_v58 }
 0x16f   :  { %1495 = vst [vmem:[%s2866_s13 + $0x30] sm:$0xff] %v1463_v44  ;;  %v1464_v61 = vadd.f32 %v1952_v57, %v2701_v17 }
 0x170   :  { %1493 = vst [vmem:[%s2866_s13 + $0x20] sm:$0xff] %v1461_v59  ;;  %v1462_v62 = vadd.f32 %v1953_v60, %v2701_v17 }
 0x171   :  { %1496 = vst [vmem:[%s2866_s13 + $0x38] sm:$0xff] %v1464_v61 }
 0x172   :  { %1494 = vst [vmem:[%s2866_s13 + $0x28] sm:$0xff] %v1462_v62  ;;  %v1812_v63 = vpop.f32.mrb[8].mxu1 }
 0x173   :  { %v1954_v0 = vadd.f32 %v1908_v20, %v1812_v63  ;;  %v889_v53 = vpop.f32.mrb[9].mxu1 }
 0x174   :  { %v1955_v1 = vadd.f32 %v1323_v27, %v889_v53  ;;  %v1813_v4 = vpop.f32.mrb[10].mxu1 }
 0x175   :  { %v1467_v5 = vadd.f32 %v1954_v0, %v2701_v17  ;;  %v1956_v22 = vadd.f32 %v2654_v14, %v1813_v4  ;;  %v892_v6 = vpop.f32.mrb[11].mxu1 }
 0x176   :  { %v1465_v7 = vadd.f32 %v1955_v1, %v2701_v17  ;;  %v1957_v9 = vadd.f32 %v2656_v45, %v892_v6 }
 0x177   :  { %1499 = vst [vmem:[%s2866_s13 + $0x50] sm:$0xff] %v1467_v5  ;;  %v1468_v8 = vadd.f32 %v1956_v22, %v2701_v17 }
 0x178   :  { %1497 = vst [vmem:[%s2866_s13 + $0x40] sm:$0xff] %v1465_v7  ;;  %v1466_v32 = vadd.f32 %v1957_v9, %v2701_v17 }
 0x179   :  { %1500 = vst [vmem:[%s2866_s13 + $0x58] sm:$0xff] %v1468_v8 }
 0x17a   :  { %1498 = vst [vmem:[%s2866_s13 + $0x48] sm:$0xff] %v1466_v32  ;;  %v1816_v11 = vpop.f32.mrb[12].mxu1 }
 0x17b   :  { %v1958_v12 = vadd.f32 %v2658_v15, %v1816_v11  ;;  %v905_v3 = vpop.f32.mrb[13].mxu1 }
 0x17c   :  { %v1959_v20 = vadd.f32 %v2660_v16, %v905_v3  ;;  %v1817_v27 = vpop.f32.mrb[14].mxu1 }
 0x17d   :  { %v1471_v14 = vadd.f32 %v1958_v12, %v2701_v17  ;;  %v1960_v45 = vadd.f32 %v2662_v18, %v1817_v27  ;;  %v908_v38 = vpop.f32.mrb[15].mxu1 }
 0x17e   :  { %v1469_v39 = vadd.f32 %v1959_v20, %v2701_v17  ;;  %v1961_v40 = vadd.f32 %v2664_v19, %v908_v38 }
 0x17f   :  { %1503 = vst [vmem:[%s2866_s13 + $0x70] sm:$0xff] %v1471_v14  ;;  %v1472_v41 = vadd.f32 %v1960_v45, %v2701_v17 }
 0x180   :  { %1501 = vst [vmem:[%s2866_s13 + $0x60] sm:$0xff] %v1469_v39  ;;  %v1470_v15 = vadd.f32 %v1961_v40, %v2701_v17 }
 0x181   :  { %1504 = vst [vmem:[%s2866_s13 + $0x78] sm:$0xff] %v1472_v41 }
 0x182   :  { %1502 = vst [vmem:[%s2866_s13 + $0x68] sm:$0xff] %v1470_v15 }
 0x1a2   :  { %v1868_v16 = vpop.f32.mrb[16].mxu1 }
 0x1a3   :  { %v1962_v18 = vadd.f32 %v2666_v10, %v1868_v16  ;;  %v1130_v19 = vpop.f32.mrb[17].mxu1 }
 0x1a4   :  { %v1963_v42 = vadd.f32 %v2668_v24, %v1130_v19  ;;  %v1869_v43 = vpop.f32.mrb[18].mxu1 }
 0x1a5   :  { %v1475_v46 = vadd.f32 %v1962_v18, %v2701_v17  ;;  %v1964_v47 = vadd.f32 %v2670_v25, %v1869_v43  ;;  %v1133_v31 = vpop.f32.mrb[19].mxu1 }
 0x1a6   :  { %v1473_v48 = vadd.f32 %v1963_v42, %v2701_v17  ;;  %v1965_v49 = vadd.f32 %v2672_v26, %v1133_v31 }
 0x1a7   :  { %1507 = vst [vmem:[%s2866_s13 + $0x90] sm:$0xff] %v1475_v46  ;;  %v1476_v50 = vadd.f32 %v1964_v47, %v2701_v17 }
 0x1a8   :  { %1505 = vst [vmem:[%s2866_s13 + $0x80] sm:$0xff] %v1473_v48  ;;  %v1474_v10 = vadd.f32 %v1965_v49, %v2701_v17 }
 0x1a9   :  { %1508 = vst [vmem:[%s2866_s13 + $0x98] sm:$0xff] %v1476_v50 }
 0x1aa   :  { %1506 = vst [vmem:[%s2866_s13 + $0x88] sm:$0xff] %v1474_v10  ;;  %v1872_v24 = vpop.f32.mrb[20].mxu1 }
 0x1ab   :  { %v1966_v25 = vadd.f32 %v2674_v2, %v1872_v24  ;;  %v1146_v26 = vpop.f32.mrb[21].mxu1 }
 0x1ac   :  { %v1967_v51 = vadd.f32 %v2676_v28, %v1146_v26  ;;  %v1873_v52 = vpop.f32.mrb[22].mxu1 }
 0x1ad   :  { %v1479_v54 = vadd.f32 %v1966_v25, %v2701_v17  ;;  %v1968_v55 = vadd.f32 %v2678_v21, %v1873_v52  ;;  %v1149_v56 = vpop.f32.mrb[23].mxu1 }
 0x1ae   :  { %v1477_v44 = vadd.f32 %v1967_v51, %v2701_v17  ;;  %v1969_v57 = vadd.f32 %v2680_v29, %v1149_v56 }
 0x1af   :  { %1511 = vst [vmem:[%s2866_s13 + $0xb0] sm:$0xff] %v1479_v54  ;;  %v1480_v58 = vadd.f32 %v1968_v55, %v2701_v17 }
 0x1b0   :  { %1509 = vst [vmem:[%s2866_s13 + $0xa0] sm:$0xff] %v1477_v44  ;;  %v1478_v2 = vadd.f32 %v1969_v57, %v2701_v17 }
 0x1b1   :  { %1512 = vst [vmem:[%s2866_s13 + $0xb8] sm:$0xff] %v1480_v58 }
 0x1b2   :  { %1510 = vst [vmem:[%s2866_s13 + $0xa8] sm:$0xff] %v1478_v2  ;;  %v1876_v28 = vpop.f32.mrb[24].mxu1 }
 0x1b3   :  { %v1970_v21 = vadd.f32 %v2682_v30, %v1876_v28  ;;  %v1162_v29 = vpop.f32.mrb[25].mxu1 }
 0x1b4   :  { %v1971_v59 = vadd.f32 %v2684_v13, %v1162_v29  ;;  %v1877_v60 = vpop.f32.mrb[26].mxu1 }
 0x1b5   :  { %v1483_v61 = vadd.f32 %v1970_v21, %v2701_v17  ;;  %v1972_v62 = vadd.f32 %v2686_v33, %v1877_v60  ;;  %v1165_v63 = vpop.f32.mrb[27].mxu1 }
 0x1b6   :  { %v1481_v0 = vadd.f32 %v1971_v59, %v2701_v17  ;;  %v1973_v53 = vadd.f32 %v2688_v34, %v1165_v63 }
 0x1b7   :  { %1515 = vst [vmem:[%s2866_s13 + $0xd0] sm:$0xff] %v1483_v61  ;;  %v1484_v1 = vadd.f32 %v1972_v62, %v2701_v17 }
 0x1b8   :  { %1513 = vst [vmem:[%s2866_s13 + $0xc0] sm:$0xff] %v1481_v0  ;;  %v1482_v30 = vadd.f32 %v1973_v53, %v2701_v17 }
 0x1b9   :  { %1516 = vst [vmem:[%s2866_s13 + $0xd8] sm:$0xff] %v1484_v1 }
 0x1ba   :  { %1514 = vst [vmem:[%s2866_s13 + $0xc8] sm:$0xff] %v1482_v30  ;;  %v1880_v13 = vpop.f32.mrb[28].mxu1 }
 0x1bb   :  { %v1974_v33 = vadd.f32 %v2690_v35, %v1880_v13  ;;  %v1178_v34 = vpop.f32.mrb[29].mxu1 }
 0x1bc   :  { %v1975_v4 = vadd.f32 %v2692_v23, %v1178_v34  ;;  %v1881_v5 = vpop.f32.mrb[30].mxu1 }
 0x1bd   :  { %v1487_v22 = vadd.f32 %v1974_v33, %v2701_v17  ;;  %v1976_v6 = vadd.f32 %v2694_v36, %v1881_v5  ;;  %v1181_v7 = vpop.f32.mrb[31].mxu1 }
 0x1be   :  { %v1485_v9 = vadd.f32 %v1975_v4, %v2701_v17  ;;  %v1977_v8 = vadd.f32 %v2696_v37, %v1181_v7 }
 0x1bf   :  { %1519 = vst [vmem:[%s2866_s13 + $0xf0] sm:$0xff] %v1487_v22  ;;  %v1488_v32 = vadd.f32 %v1976_v6, %v2701_v17 }
 0x1c0   :  { %1517 = vst [vmem:[%s2866_s13 + $0xe0] sm:$0xff] %v1485_v9  ;;  %v1486_v35 = vadd.f32 %v1977_v8, %v2701_v17 }
 0x1c1   :  { %1520 = vst [vmem:[%s2866_s13 + $0xf8] sm:$0xff] %v1488_v32 }
 0x1c2   :  { %1518 = vst [vmem:[%s2866_s13 + $0xe8] sm:$0xff] %v1486_v35 }

</bundles_post_ra>
